<compile_context>
chip_gen: v5e
topology: v5e:2x2
jax: 0.10.0
libtpu: 0.0.40
codegen_flags: <defaults>
</compile_context>

<pallas_src>
import functools

import jax
import jax.numpy as jnp
from jax.experimental import pallas as pl
from jax.experimental.pallas import tpu as pltpu

# Geometry fixed by the module (32x32 input is forced by the 16*5*5 flatten).
_H0, _W0, _C0 = 32, 32, 3       # input
_K = 5                          # conv kernel size
_C1, _C2 = 6, 16                # conv channel counts
_H1, _W1 = 28, 28               # conv1 output
_HP1, _WP1 = 14, 14             # pool1 output
_H2, _W2 = 10, 10               # conv2 output
_HP2, _WP2 = 5, 5               # pool2 output
_F1, _F2, _F3 = 120, 84, 10     # fc sizes
_NOUT = 128                     # lane-padded logits width


# ------------------------------ the fused kernel ------------------------------

def _lenet_kernel(tb, x_ref, cw1_ref, cb1_ref, cw2_ref, cb2_ref, s1_ref,
                  fw1_ref, fb1_ref, fw2_ref, fb2_ref, fw3_ref, fb3_ref,
                  out_ref, y1_s, z1_s, p1_s, y2_s, z2_s):
    """TB samples end-to-end in VMEM.

    x_ref: (32*TB, 96) h-major row matrix, row = h*TB + b, col = w*3 + ci.
    All intermediates keep this h-major row layout so conv shifts are
    contiguous row slices and every matmul is 2-D with M = TB * rows.
    """
    f32 = jnp.float32
    cdt = cw1_ref.dtype                      # matmul operand dtype (bf16 default)

    # ---- conv1 (5x5 valid) + bias + ReLU: 5 banded matmuls, M = 28*TB ----
    m1 = _H1 * tb
    y1_s[...] = jnp.dot(x_ref[0:m1, :], cw1_ref[0], preferred_element_type=f32)
    for kh in range(1, _K):
        y1_s[...] += jnp.dot(x_ref[kh * tb:kh * tb + m1, :], cw1_ref[kh],
                             preferred_element_type=f32)
    y1_s[...] = jnp.maximum(y1_s[...] + cb1_ref[...], 0.0)

    # ---- pool1: exact 2x2 max.  Row max = static-slice max of the two h-row
    # blocks (f32), column max = lane-shifted max; even-column selection is a
    # single exact 0/1 matmul.  Result stored once as bf16. ----
    for ho in range(_HP1):
        rm = jnp.maximum(y1_s[(2 * ho) * tb:(2 * ho + 1) * tb, :],
                         y1_s[(2 * ho + 1) * tb:(2 * ho + 2) * tb, :])
        z1_s[ho * tb:(ho + 1) * tb, :] = jnp.maximum(
            rm[:, :(_W1 - 1) * _C1], rm[:, _C1:]).astype(cdt)
    p1_s[...] = jnp.dot(z1_s[...], s1_ref[...],
                        preferred_element_type=f32).astype(cdt)      # (14*TB, 84)

    # ---- conv2 + bias + ReLU: 5 banded matmuls, M = 10*TB ----
    m2 = _H2 * tb
    y2_s[...] = jnp.dot(p1_s[0:m2, :], cw2_ref[0], preferred_element_type=f32)
    for kh in range(1, _K):
        y2_s[...] += jnp.dot(p1_s[kh * tb:kh * tb + m2, :], cw2_ref[kh],
                             preferred_element_type=f32)
    y2_s[...] = jnp.maximum(y2_s[...] + cb2_ref[...], 0.0)

    # ---- pool2: row+column max only; even-column selection is folded into fc1 ----
    for ho in range(_HP2):
        rm = jnp.maximum(y2_s[(2 * ho) * tb:(2 * ho + 1) * tb, :],
                         y2_s[(2 * ho + 1) * tb:(2 * ho + 2) * tb, :])
        z2_s[ho * tb:(ho + 1) * tb, :] = jnp.maximum(
            rm[:, :(_W2 - 1) * _C2], rm[:, _C2:]).astype(cdt)        # (TB, 144)

    # ---- fc1 (400->120) with pool2 column selection folded into the weights:
    # sum over the 5 pooled rows of (TB,144) @ (144,120) ----
    h = jnp.dot(z2_s[0:tb, :], fw1_ref[0], preferred_element_type=f32)
    for ho in range(1, _HP2):
        h = h + jnp.dot(z2_s[ho * tb:(ho + 1) * tb, :], fw1_ref[ho],
                        preferred_element_type=f32)
    h = jnp.maximum(h + fb1_ref[...], 0.0)

    # ---- fc2 (120->84) + ReLU, fc3 (84->10, padded to 128 lanes) ----
    h = jnp.dot(h.astype(cdt), fw2_ref[...], preferred_element_type=f32)
    h = jnp.maximum(h + fb2_ref[...], 0.0)
    h = jnp.dot(h.astype(cdt), fw3_ref[...], preferred_element_type=f32)
    out_ref[...] = (h + fb3_ref[...]).astype(out_ref.dtype)


# ------------------------------ wrapper-side constants ------------------------------

def _banded_conv_mats(w, w_in):
    """Torch-layout conv weight (Cout, Cin, Kh, Kw) -> (Kh, w_in*Cin, wo*Cout)
    banded operands for the row-matrix conv  Y[h] = sum_kh  X[h+kh] @ B[kh]."""
    cout, cin, kh, kw = w.shape
    wo = w_in - kw + 1
    w = w.astype(jnp.float32)
    mats = []
    for r in range(kh):
        m = jnp.zeros((w_in * cin, wo * cout), jnp.float32)
        for c in range(kw):
            shift = jnp.eye(w_in, wo, k=-c, dtype=jnp.float32)   # [w, wo]=1 iff w==wo+c
            m = m + jnp.kron(shift, w[:, :, r, c].T)             # rows w*Cin+ci, cols wo*Cout+co
        mats.append(m)
    return jnp.stack(mats, axis=0)


def _pool_col_selector(w_conv, cout):
    """Exact 0/1 selector ((w_conv-1)*cout, (w_conv//2)*cout): picks the even
    adjacent-column-pair maxes (column blocks 0,2,4,...)."""
    wp = w_conv // 2
    colsel = jnp.zeros((w_conv - 1, wp), jnp.float32)
    colsel = colsel.at[2 * jnp.arange(wp), jnp.arange(wp)].set(1.0)
    return jnp.kron(colsel, jnp.eye(cout, dtype=jnp.float32))


def _fold_pool2_into_fc1(fc1_w):
    """fc1_w (400,120) with rows ordered (h, w, c) -> (5, 144, 120) where
    slot 2*wo*16+c of row-block ho carries fc1_w[ho*80 + wo*16 + c, :].  Exact
    (pure 0/1 selection), so folding pool2's even-column pick into fc1 loses
    nothing numerically."""
    w = fc1_w.reshape(_HP2, _WP2, _C2, _F1).astype(jnp.float32)
    m = jnp.zeros((_HP2, (_W2 - 1) * _C2, _F1), jnp.float32)
    for wo in range(_WP2):
        m = m.at[:, 2 * wo * _C2:(2 * wo + 1) * _C2, :].set(w[:, wo, :, :])
    return m


# ------------------------------ forward pass ------------------------------

def convnet_forward(params, x, *, compute_dtype=jnp.bfloat16, block_batch=128):
    n = x.shape[0]
    assert x.shape[1:] == (_C0, _H0, _W0), x.shape
    cdt = compute_dtype
    f32 = jnp.float32

    tb = min(int(block_batch), n)                   # samples per grid step
    nb = -(-n // tb)                                # number of grid steps
    n_pad = nb * tb

    # One-time layout prep at the module boundary: NCHW -> h-major row-matrix
    # blocks  X[block, h*TB + b, w*Cin + ci].  Everything downstream stays in VMEM.
    xr = jnp.transpose(x, (0, 2, 3, 1)).reshape(n, _H0, _W0 * _C0)
    if n_pad != n:
        xr = jnp.concatenate(
            [xr, jnp.zeros((n_pad - n, _H0, _W0 * _C0), xr.dtype)], axis=0)
    xr = (xr.reshape(nb, tb, _H0, _W0 * _C0)
            .transpose(0, 2, 1, 3)
            .reshape(nb, _H0 * tb, _W0 * _C0)
            .astype(cdt))

    cw1 = _banded_conv_mats(params["conv1_w"], _W0).astype(cdt)     # (5, 96, 168)
    cw2 = _banded_conv_mats(params["conv2_w"], _WP1).astype(cdt)    # (5, 84, 160)
    cb1 = jnp.tile(params["conv1_b"].astype(f32), _W1).reshape(1, _W1 * _C1)
    cb2 = jnp.tile(params["conv2_b"].astype(f32), _W2).reshape(1, _W2 * _C2)

    s1 = _pool_col_selector(_W1, _C1).astype(cdt)                   # (162, 84)
    fw1m = _fold_pool2_into_fc1(params["fc1_w"]).astype(cdt)        # (5, 144, 120)
    fb1 = params["fc1_b"].astype(f32).reshape(1, _F1)
    fw2 = params["fc2_w"].astype(cdt)
    fb2 = params["fc2_b"].astype(f32).reshape(1, _F2)
    fw3p = jnp.pad(params["fc3_w"].astype(f32),
                   ((0, 0), (0, _NOUT - _F3))).astype(cdt)          # (84, 128)
    fb3p = jnp.pad(params["fc3_b"].astype(f32), (0, _NOUT - _F3)).reshape(1, _NOUT)

    operands = (xr, cw1, cb1, cw2, cb2, s1, fw1m, fb1, fw2, fb2, fw3p, fb3p)

    flops_per_sample = 2 * (
        _K * _H1 * (_W0 * _C0) * (_W1 * _C1)            # conv1 banded matmuls
        + _HP1 * ((_W1 - 1) * _C1) * (_WP1 * _C1)       # pool1 column selector
        + _K * _H2 * (_WP1 * _C1) * (_W2 * _C2)         # conv2 banded matmuls
        + _HP2 * ((_W2 - 1) * _C2) * _F1                # fc1 (pool2 folded in)
        + _F1 * _F2 + _F2 * _NOUT)                      # fc2, fc3 (padded)
    bytes_accessed = (sum(int(a.size) * a.dtype.itemsize for a in operands)
                      + n_pad * _NOUT * 4)
    cost = pl.CostEstimate(flops=int(n_pad * flops_per_sample), transcendentals=0,
                           bytes_accessed=int(bytes_accessed))

    def full(shape):
        return pl.BlockSpec(shape, lambda i: (0,) * len(shape))

    out = pl.pallas_call(
        functools.partial(_lenet_kernel, tb),
        out_shape=jax.ShapeDtypeStruct((nb, tb, _NOUT), jnp.float32),
        grid=(nb,),
        in_specs=[
            pl.BlockSpec((None, _H0 * tb, _W0 * _C0), lambda i: (i, 0, 0)),  # input block
            full((_K, _W0 * _C0, _W1 * _C1)),                                # banded conv1
            full((1, _W1 * _C1)),                                            # conv1 bias row
            full((_K, _WP1 * _C1, _W2 * _C2)),                               # banded conv2
            full((1, _W2 * _C2)),                                            # conv2 bias row
            full(((_W1 - 1) * _C1, _WP1 * _C1)),                             # pool1 col selector
            full((_HP2, (_W2 - 1) * _C2, _F1)),                              # fc1 (pool2 folded)
            full((1, _F1)),
            full((_F1, _F2)),                                                # fc2 W
            full((1, _F2)),
            full((_F2, _NOUT)),                                              # fc3 W (lane-padded)
            full((1, _NOUT)),
        ],
        out_specs=pl.BlockSpec((None, tb, _NOUT), lambda i: (i, 0, 0)),
        scratch_shapes=[
            pltpu.VMEM((_H1 * tb, _W1 * _C1), jnp.float32),       # conv1 out (28TB, 168)
            pltpu.VMEM((_HP1 * tb, (_W1 - 1) * _C1), cdt),        # pool1 maxes (14TB, 162)
            pltpu.VMEM((_HP1 * tb, _WP1 * _C1), cdt),             # pool1 out (14TB, 84)
            pltpu.VMEM((_H2 * tb, _W2 * _C2), jnp.float32),       # conv2 out (10TB, 160)
            pltpu.VMEM((_HP2 * tb, (_W2 - 1) * _C2), cdt),        # pool2 maxes (5TB, 144)
        ],
        compiler_params=pltpu.CompilerParams(
            dimension_semantics=("parallel",),
            vmem_limit_bytes=48 * 1024 * 1024,   # fits v7x's 64 MiB; covers TB up to ~768
        ),
        cost_estimate=cost,
    )(*operands)
    return out.reshape(n_pad, _NOUT)[:n, :_F3]


# ------------------------------ parameters ------------------------------

def init_params(key):
    """PyTorch-default-style uniform init.
    NOTE: fc1_w rows are ordered (h, w, c) over the pooled 5x5x16 map (NHWC flatten);
    permute (c,h,w)->(h,w,c) when importing torch weights.  fc weights stored as (in, out)."""
    ks = jax.random.split(key, 10)

    def u(k, shape, fan_in):
        bound = 1.0 / jnp.sqrt(jnp.float32(fan_in))
        return jax.random.uniform(k, shape, jnp.float32, -bound, bound)

    return {
        "conv1_w": u(ks[0], (_C1, _C0, _K, _K), _C0 * _K * _K),
        "conv1_b": u(ks[1], (_C1,), _C0 * _K * _K),
        "conv2_w": u(ks[2], (_C2, _C1, _K, _K), _C1 * _K * _K),
        "conv2_b": u(ks[3], (_C2,), _C1 * _K * _K),
        "fc1_w":   u(ks[4], (_HP2 * _WP2 * _C2, _F1), 400),
        "fc1_b":   u(ks[5], (_F1,), 400),
        "fc2_w":   u(ks[6], (_F1, _F2), _F1),
        "fc2_b":   u(ks[7], (_F2,), _F1),
        "fc3_w":   u(ks[8], (_F2, _F3), _F2),
        "fc3_b":   u(ks[9], (_F3,), _F2),
    }


# ------------------------------ pure-XLA reference (for checking) ------------------------------

def convnet_reference(params, x, *, compute_dtype=jnp.bfloat16):
    """Same forward, pure XLA, with matmul operands rounded to compute_dtype
    and f32 accumulation so it matches the kernel's numerics closely."""
    cdt, f32 = compute_dtype, jnp.float32
    dn = ("NCHW", "OIHW", "NCHW")

    def conv(inp, w, b):
        y = jax.lax.conv_general_dilated(inp.astype(cdt), w.astype(cdt), (1, 1), "VALID",
                                         dimension_numbers=dn, preferred_element_type=f32)
        return jnp.maximum(y + b.astype(f32)[None, :, None, None], 0.0)

    def pool(y):
        return jax.lax.reduce_window(y, -jnp.inf, jax.lax.max,
                                     (1, 1, 2, 2), (1, 1, 2, 2), "VALID")

    y = pool(conv(x, params["conv1_w"], params["conv1_b"]))
    y = pool(conv(y, params["conv2_w"], params["conv2_b"]))
    y = jnp.transpose(y, (0, 2, 3, 1)).reshape(x.shape[0], -1)   # (h, w, c) flatten

    def fc(inp, w, b, relu):
        h = jnp.dot(inp.astype(cdt), w.astype(cdt), preferred_element_type=f32)
        h = h + b.astype(f32)
        return jnp.maximum(h, 0.0) if relu else h

    y = fc(y, params["fc1_w"], params["fc1_b"], True)
    y = fc(y, params["fc2_w"], params["fc2_b"], True)
    return fc(y, params["fc3_w"], params["fc3_b"], False)


if __name__ == "__main__":
    key = jax.random.PRNGKey(0)
    pkey, xkey = jax.random.split(key)
    params = init_params(pkey)
    # Spatial size 32 is forced by the module: 32 -5+1=28 ->pool 14 -5+1=10 ->pool 5 => 16*5*5.
    x = jax.random.normal(xkey, (2, _C0, _H0, _W0), jnp.float32)

    out = jax.jit(convnet_forward)(params, x)
    out = jax.block_until_ready(out)
    assert out.shape == (2, _F3)

    ref = convnet_reference(params, x)
    assert jnp.allclose(out, ref, atol=5e-3, rtol=1e-2), float(jnp.max(jnp.abs(out - ref)))
    print("KERNEL_OK")
</pallas_src>

<mosaic_0001>
module attributes {stable_mosaic.version = 11 : i64} {
  func.func @_lenet_kernel(%arg0: i32, %arg1: memref<1x64x96xbf16, #tpu.memory_space<vmem>>, %arg2: memref<5x96x168xbf16, #tpu.memory_space<vmem>>, %arg3: memref<1x168xf32, #tpu.memory_space<vmem>>, %arg4: memref<5x84x160xbf16, #tpu.memory_space<vmem>>, %arg5: memref<1x160xf32, #tpu.memory_space<vmem>>, %arg6: memref<162x84xbf16, #tpu.memory_space<vmem>>, %arg7: memref<5x144x120xbf16, #tpu.memory_space<vmem>>, %arg8: memref<1x120xf32, #tpu.memory_space<vmem>>, %arg9: memref<120x84xbf16, #tpu.memory_space<vmem>>, %arg10: memref<1x84xf32, #tpu.memory_space<vmem>>, %arg11: memref<84x128xbf16, #tpu.memory_space<vmem>>, %arg12: memref<1x128xf32, #tpu.memory_space<vmem>>, %arg13: memref<1x2x128xf32, #tpu.memory_space<vmem>>, %arg14: memref<56x168xf32, #tpu.memory_space<vmem>>, %arg15: memref<28x162xbf16, #tpu.memory_space<vmem>>, %arg16: memref<28x84xbf16, #tpu.memory_space<vmem>>, %arg17: memref<20x160xf32, #tpu.memory_space<vmem>>, %arg18: memref<10x144xbf16, #tpu.memory_space<vmem>>) attributes {dimension_semantics = [#tpu.dimension_semantics<parallel>], iteration_bounds = array<i64: 1>, scalar_prefetch = 0 : i64, scratch_operands = 5 : i64, tpu.core_type = #tpu.core_type<tc>, window_params = [{transform_indices = @transform_0, window_bounds = array<i64: 1, 64, 96>}, {pipeline_mode = #tpu.pipeline_mode<synchronous>, transform_indices = @transform_1, window_bounds = array<i64: 5, 96, 168>}, {pipeline_mode = #tpu.pipeline_mode<synchronous>, transform_indices = @transform_2, window_bounds = array<i64: 1, 168>}, {pipeline_mode = #tpu.pipeline_mode<synchronous>, transform_indices = @transform_3, window_bounds = array<i64: 5, 84, 160>}, {pipeline_mode = #tpu.pipeline_mode<synchronous>, transform_indices = @transform_4, window_bounds = array<i64: 1, 160>}, {pipeline_mode = #tpu.pipeline_mode<synchronous>, transform_indices = @transform_5, window_bounds = array<i64: 162, 84>}, {pipeline_mode = #tpu.pipeline_mode<synchronous>, transform_indices = @transform_6, window_bounds = array<i64: 5, 144, 120>}, {pipeline_mode = #tpu.pipeline_mode<synchronous>, transform_indices = @transform_7, window_bounds = array<i64: 1, 120>}, {pipeline_mode = #tpu.pipeline_mode<synchronous>, transform_indices = @transform_8, window_bounds = array<i64: 120, 84>}, {pipeline_mode = #tpu.pipeline_mode<synchronous>, transform_indices = @transform_9, window_bounds = array<i64: 1, 84>}, {pipeline_mode = #tpu.pipeline_mode<synchronous>, transform_indices = @transform_10, window_bounds = array<i64: 84, 128>}, {pipeline_mode = #tpu.pipeline_mode<synchronous>, transform_indices = @transform_11, window_bounds = array<i64: 1, 128>}, {transform_indices = @transform_12, window_bounds = array<i64: 1, 2, 128>}]} {
    %c0 = arith.constant 0 : index
    %c0_0 = arith.constant 0 : index
    %c0_1 = arith.constant 0 : index
    %0 = vector.load %arg1[%c0, %c0_0, %c0_1] : memref<1x64x96xbf16, #tpu.memory_space<vmem>>, vector<1x56x96xbf16>
    %1 = vector.shape_cast %0 : vector<1x56x96xbf16> to vector<56x96xbf16>
    %c0_2 = arith.constant 0 : index
    %c0_3 = arith.constant 0 : index
    %c0_4 = arith.constant 0 : index
    %2 = vector.load %arg2[%c0_2, %c0_3, %c0_4] : memref<5x96x168xbf16, #tpu.memory_space<vmem>>, vector<1x96x168xbf16>
    %3 = vector.shape_cast %2 : vector<1x96x168xbf16> to vector<96x168xbf16>
    %cst = arith.constant dense<0.000000e+00> : vector<56x168xf32>
    %4 = tpu.matmul %1, %3, %cst {dimension_numbers = #tpu.dot_dimension_numbers<[1], [0], [0], [1], [0, 0, 1, 1], [], []>} : vector<56x96xbf16>, vector<96x168xbf16>, vector<56x168xf32> -> vector<56x168xf32>
    %c0_5 = arith.constant 0 : index
    %c0_6 = arith.constant 0 : index
    %5 = vector.load %arg14[%c0_5, %c0_6] : memref<56x168xf32, #tpu.memory_space<vmem>>, vector<56x168xf32>
    tpu.vector_store %arg14[%c0_5, %c0_6], %4 {strides = array<i32>} : memref<56x168xf32, #tpu.memory_space<vmem>>, vector<56x168xf32>,
    %c0_7 = arith.constant 0 : index
    %c0_8 = arith.constant 0 : index
    %6 = vector.load %arg14[%c0_7, %c0_8] : memref<56x168xf32, #tpu.memory_space<vmem>>, vector<56x168xf32>
    %c0_9 = arith.constant 0 : index
    %c2 = arith.constant 2 : index
    %c0_10 = arith.constant 0 : index
    %7 = vector.load %arg1[%c0_9, %c2, %c0_10] : memref<1x64x96xbf16, #tpu.memory_space<vmem>>, vector<1x56x96xbf16>
    %8 = vector.shape_cast %7 : vector<1x56x96xbf16> to vector<56x96xbf16>
    %c1 = arith.constant 1 : index
    %c0_11 = arith.constant 0 : index
    %c0_12 = arith.constant 0 : index
    %9 = vector.load %arg2[%c1, %c0_11, %c0_12] : memref<5x96x168xbf16, #tpu.memory_space<vmem>>, vector<1x96x168xbf16>
    %10 = vector.shape_cast %9 : vector<1x96x168xbf16> to vector<96x168xbf16>
    %cst_13 = arith.constant dense<0.000000e+00> : vector<56x168xf32>
    %11 = tpu.matmul %8, %10, %cst_13 {dimension_numbers = #tpu.dot_dimension_numbers<[1], [0], [0], [1], [0, 0, 1, 1], [], []>} : vector<56x96xbf16>, vector<96x168xbf16>, vector<56x168xf32> -> vector<56x168xf32>
    %12 = arith.addf %6, %11 : vector<56x168xf32>
    %c0_14 = arith.constant 0 : index
    %c0_15 = arith.constant 0 : index
    %13 = vector.load %arg14[%c0_14, %c0_15] : memref<56x168xf32, #tpu.memory_space<vmem>>, vector<56x168xf32>
    tpu.vector_store %arg14[%c0_14, %c0_15], %12 {strides = array<i32>} : memref<56x168xf32, #tpu.memory_space<vmem>>, vector<56x168xf32>,
    %c0_16 = arith.constant 0 : index
    %c0_17 = arith.constant 0 : index
    %14 = vector.load %arg14[%c0_16, %c0_17] : memref<56x168xf32, #tpu.memory_space<vmem>>, vector<56x168xf32>
    %c0_18 = arith.constant 0 : index
    %c4 = arith.constant 4 : index
    %c0_19 = arith.constant 0 : index
    %15 = vector.load %arg1[%c0_18, %c4, %c0_19] : memref<1x64x96xbf16, #tpu.memory_space<vmem>>, vector<1x56x96xbf16>
    %16 = vector.shape_cast %15 : vector<1x56x96xbf16> to vector<56x96xbf16>
    %c2_20 = arith.constant 2 : index
    %c0_21 = arith.constant 0 : index
    %c0_22 = arith.constant 0 : index
    %17 = vector.load %arg2[%c2_20, %c0_21, %c0_22] : memref<5x96x168xbf16, #tpu.memory_space<vmem>>, vector<1x96x168xbf16>
    %18 = vector.shape_cast %17 : vector<1x96x168xbf16> to vector<96x168xbf16>
    %cst_23 = arith.constant dense<0.000000e+00> : vector<56x168xf32>
    %19 = tpu.matmul %16, %18, %cst_23 {dimension_numbers = #tpu.dot_dimension_numbers<[1], [0], [0], [1], [0, 0, 1, 1], [], []>} : vector<56x96xbf16>, vector<96x168xbf16>, vector<56x168xf32> -> vector<56x168xf32>
    %20 = arith.addf %14, %19 : vector<56x168xf32>
    %c0_24 = arith.constant 0 : index
    %c0_25 = arith.constant 0 : index
    %21 = vector.load %arg14[%c0_24, %c0_25] : memref<56x168xf32, #tpu.memory_space<vmem>>, vector<56x168xf32>
    tpu.vector_store %arg14[%c0_24, %c0_25], %20 {strides = array<i32>} : memref<56x168xf32, #tpu.memory_space<vmem>>, vector<56x168xf32>,
    %c0_26 = arith.constant 0 : index
    %c0_27 = arith.constant 0 : index
    %22 = vector.load %arg14[%c0_26, %c0_27] : memref<56x168xf32, #tpu.memory_space<vmem>>, vector<56x168xf32>
    %c0_28 = arith.constant 0 : index
    %c6 = arith.constant 6 : index
    %c0_29 = arith.constant 0 : index
    %23 = vector.load %arg1[%c0_28, %c6, %c0_29] : memref<1x64x96xbf16, #tpu.memory_space<vmem>>, vector<1x56x96xbf16>
    %24 = vector.shape_cast %23 : vector<1x56x96xbf16> to vector<56x96xbf16>
    %c3 = arith.constant 3 : index
    %c0_30 = arith.constant 0 : index
    %c0_31 = arith.constant 0 : index
    %25 = vector.load %arg2[%c3, %c0_30, %c0_31] : memref<5x96x168xbf16, #tpu.memory_space<vmem>>, vector<1x96x168xbf16>
    %26 = vector.shape_cast %25 : vector<1x96x168xbf16> to vector<96x168xbf16>
    %cst_32 = arith.constant dense<0.000000e+00> : vector<56x168xf32>
    %27 = tpu.matmul %24, %26, %cst_32 {dimension_numbers = #tpu.dot_dimension_numbers<[1], [0], [0], [1], [0, 0, 1, 1], [], []>} : vector<56x96xbf16>, vector<96x168xbf16>, vector<56x168xf32> -> vector<56x168xf32>
    %28 = arith.addf %22, %27 : vector<56x168xf32>
    %c0_33 = arith.constant 0 : index
    %c0_34 = arith.constant 0 : index
    %29 = vector.load %arg14[%c0_33, %c0_34] : memref<56x168xf32, #tpu.memory_space<vmem>>, vector<56x168xf32>
    tpu.vector_store %arg14[%c0_33, %c0_34], %28 {strides = array<i32>} : memref<56x168xf32, #tpu.memory_space<vmem>>, vector<56x168xf32>,
    %c0_35 = arith.constant 0 : index
    %c0_36 = arith.constant 0 : index
    %30 = vector.load %arg14[%c0_35, %c0_36] : memref<56x168xf32, #tpu.memory_space<vmem>>, vector<56x168xf32>
    %c0_37 = arith.constant 0 : index
    %c8 = arith.constant 8 : index
    %c0_38 = arith.constant 0 : index
    %31 = vector.load %arg1[%c0_37, %c8, %c0_38] : memref<1x64x96xbf16, #tpu.memory_space<vmem>>, vector<1x56x96xbf16>
    %32 = vector.shape_cast %31 : vector<1x56x96xbf16> to vector<56x96xbf16>
    %c4_39 = arith.constant 4 : index
    %c0_40 = arith.constant 0 : index
    %c0_41 = arith.constant 0 : index
    %33 = vector.load %arg2[%c4_39, %c0_40, %c0_41] : memref<5x96x168xbf16, #tpu.memory_space<vmem>>, vector<1x96x168xbf16>
    %34 = vector.shape_cast %33 : vector<1x96x168xbf16> to vector<96x168xbf16>
    %cst_42 = arith.constant dense<0.000000e+00> : vector<56x168xf32>
    %35 = tpu.matmul %32, %34, %cst_42 {dimension_numbers = #tpu.dot_dimension_numbers<[1], [0], [0], [1], [0, 0, 1, 1], [], []>} : vector<56x96xbf16>, vector<96x168xbf16>, vector<56x168xf32> -> vector<56x168xf32>
    %36 = arith.addf %30, %35 : vector<56x168xf32>
    %c0_43 = arith.constant 0 : index
    %c0_44 = arith.constant 0 : index
    %37 = vector.load %arg14[%c0_43, %c0_44] : memref<56x168xf32, #tpu.memory_space<vmem>>, vector<56x168xf32>
    tpu.vector_store %arg14[%c0_43, %c0_44], %36 {strides = array<i32>} : memref<56x168xf32, #tpu.memory_space<vmem>>, vector<56x168xf32>,
    %c0_45 = arith.constant 0 : index
    %c0_46 = arith.constant 0 : index
    %38 = vector.load %arg14[%c0_45, %c0_46] : memref<56x168xf32, #tpu.memory_space<vmem>>, vector<56x168xf32>
    %c0_47 = arith.constant 0 : index
    %c0_48 = arith.constant 0 : index
    %39 = vector.load %arg3[%c0_47, %c0_48] : memref<1x168xf32, #tpu.memory_space<vmem>>, vector<1x168xf32>
    %40 = vector.broadcast %39 : vector<1x168xf32> to vector<56x168xf32>
    %41 = arith.addf %38, %40 : vector<56x168xf32>
    %cst_49 = arith.constant 0.000000e+00 : f32
    %42 = vector.broadcast %cst_49 : f32 to vector<56x168xf32>
    %43 = arith.maximumf %41, %42 : vector<56x168xf32>
    %c0_50 = arith.constant 0 : index
    %c0_51 = arith.constant 0 : index
    %44 = vector.load %arg14[%c0_50, %c0_51] : memref<56x168xf32, #tpu.memory_space<vmem>>, vector<56x168xf32>
    tpu.vector_store %arg14[%c0_50, %c0_51], %43 {strides = array<i32>} : memref<56x168xf32, #tpu.memory_space<vmem>>, vector<56x168xf32>,
    %c0_52 = arith.constant 0 : index
    %c0_53 = arith.constant 0 : index
    %45 = vector.load %arg14[%c0_52, %c0_53] : memref<56x168xf32, #tpu.memory_space<vmem>>, vector<2x168xf32>
    %c2_54 = arith.constant 2 : index
    %c0_55 = arith.constant 0 : index
    %46 = vector.load %arg14[%c2_54, %c0_55] : memref<56x168xf32, #tpu.memory_space<vmem>>, vector<2x168xf32>
    %47 = arith.maximumf %45, %46 : vector<2x168xf32>
    %48 = vector.extract_strided_slice %47 {offsets = [0, 0], sizes = [2, 162], strides = [1, 1]} : vector<2x168xf32> to vector<2x162xf32>
    %49 = vector.extract_strided_slice %47 {offsets = [0, 6], sizes = [2, 162], strides = [1, 1]} : vector<2x168xf32> to vector<2x162xf32>
    %50 = arith.maximumf %48, %49 : vector<2x162xf32>
    %51 = arith.truncf %50 : vector<2x162xf32> to vector<2x162xbf16>
    %c0_56 = arith.constant 0 : index
    %c0_57 = arith.constant 0 : index
    %52 = vector.load %arg15[%c0_56, %c0_57] : memref<28x162xbf16, #tpu.memory_space<vmem>>, vector<2x162xbf16>
    tpu.vector_store %arg15[%c0_56, %c0_57], %51 {strides = array<i32>} : memref<28x162xbf16, #tpu.memory_space<vmem>>, vector<2x162xbf16>,
    %c4_58 = arith.constant 4 : index
    %c0_59 = arith.constant 0 : index
    %53 = vector.load %arg14[%c4_58, %c0_59] : memref<56x168xf32, #tpu.memory_space<vmem>>, vector<2x168xf32>
    %c6_60 = arith.constant 6 : index
    %c0_61 = arith.constant 0 : index
    %54 = vector.load %arg14[%c6_60, %c0_61] : memref<56x168xf32, #tpu.memory_space<vmem>>, vector<2x168xf32>
    %55 = arith.maximumf %53, %54 : vector<2x168xf32>
    %56 = vector.extract_strided_slice %55 {offsets = [0, 0], sizes = [2, 162], strides = [1, 1]} : vector<2x168xf32> to vector<2x162xf32>
    %57 = vector.extract_strided_slice %55 {offsets = [0, 6], sizes = [2, 162], strides = [1, 1]} : vector<2x168xf32> to vector<2x162xf32>
    %58 = arith.maximumf %56, %57 : vector<2x162xf32>
    %59 = arith.truncf %58 : vector<2x162xf32> to vector<2x162xbf16>
    %c2_62 = arith.constant 2 : index
    %c0_63 = arith.constant 0 : index
    %60 = vector.load %arg15[%c2_62, %c0_63] : memref<28x162xbf16, #tpu.memory_space<vmem>>, vector<2x162xbf16>
    tpu.vector_store %arg15[%c2_62, %c0_63], %59 {strides = array<i32>} : memref<28x162xbf16, #tpu.memory_space<vmem>>, vector<2x162xbf16>,
    %c8_64 = arith.constant 8 : index
    %c0_65 = arith.constant 0 : index
    %61 = vector.load %arg14[%c8_64, %c0_65] : memref<56x168xf32, #tpu.memory_space<vmem>>, vector<2x168xf32>
    %c10 = arith.constant 10 : index
    %c0_66 = arith.constant 0 : index
    %62 = vector.load %arg14[%c10, %c0_66] : memref<56x168xf32, #tpu.memory_space<vmem>>, vector<2x168xf32>
    %63 = arith.maximumf %61, %62 : vector<2x168xf32>
    %64 = vector.extract_strided_slice %63 {offsets = [0, 0], sizes = [2, 162], strides = [1, 1]} : vector<2x168xf32> to vector<2x162xf32>
    %65 = vector.extract_strided_slice %63 {offsets = [0, 6], sizes = [2, 162], strides = [1, 1]} : vector<2x168xf32> to vector<2x162xf32>
    %66 = arith.maximumf %64, %65 : vector<2x162xf32>
    %67 = arith.truncf %66 : vector<2x162xf32> to vector<2x162xbf16>
    %c4_67 = arith.constant 4 : index
    %c0_68 = arith.constant 0 : index
    %68 = vector.load %arg15[%c4_67, %c0_68] : memref<28x162xbf16, #tpu.memory_space<vmem>>, vector<2x162xbf16>
    tpu.vector_store %arg15[%c4_67, %c0_68], %67 {strides = array<i32>} : memref<28x162xbf16, #tpu.memory_space<vmem>>, vector<2x162xbf16>,
    %c12 = arith.constant 12 : index
    %c0_69 = arith.constant 0 : index
    %69 = vector.load %arg14[%c12, %c0_69] : memref<56x168xf32, #tpu.memory_space<vmem>>, vector<2x168xf32>
    %c14 = arith.constant 14 : index
    %c0_70 = arith.constant 0 : index
    %70 = vector.load %arg14[%c14, %c0_70] : memref<56x168xf32, #tpu.memory_space<vmem>>, vector<2x168xf32>
    %71 = arith.maximumf %69, %70 : vector<2x168xf32>
    %72 = vector.extract_strided_slice %71 {offsets = [0, 0], sizes = [2, 162], strides = [1, 1]} : vector<2x168xf32> to vector<2x162xf32>
    %73 = vector.extract_strided_slice %71 {offsets = [0, 6], sizes = [2, 162], strides = [1, 1]} : vector<2x168xf32> to vector<2x162xf32>
    %74 = arith.maximumf %72, %73 : vector<2x162xf32>
    %75 = arith.truncf %74 : vector<2x162xf32> to vector<2x162xbf16>
    %c6_71 = arith.constant 6 : index
    %c0_72 = arith.constant 0 : index
    %76 = vector.load %arg15[%c6_71, %c0_72] : memref<28x162xbf16, #tpu.memory_space<vmem>>, vector<2x162xbf16>
    tpu.vector_store %arg15[%c6_71, %c0_72], %75 {strides = array<i32>} : memref<28x162xbf16, #tpu.memory_space<vmem>>, vector<2x162xbf16>,
    %c16 = arith.constant 16 : index
    %c0_73 = arith.constant 0 : index
    %77 = vector.load %arg14[%c16, %c0_73] : memref<56x168xf32, #tpu.memory_space<vmem>>, vector<2x168xf32>
    %c18 = arith.constant 18 : index
    %c0_74 = arith.constant 0 : index
    %78 = vector.load %arg14[%c18, %c0_74] : memref<56x168xf32, #tpu.memory_space<vmem>>, vector<2x168xf32>
    %79 = arith.maximumf %77, %78 : vector<2x168xf32>
    %80 = vector.extract_strided_slice %79 {offsets = [0, 0], sizes = [2, 162], strides = [1, 1]} : vector<2x168xf32> to vector<2x162xf32>
    %81 = vector.extract_strided_slice %79 {offsets = [0, 6], sizes = [2, 162], strides = [1, 1]} : vector<2x168xf32> to vector<2x162xf32>
    %82 = arith.maximumf %80, %81 : vector<2x162xf32>
    %83 = arith.truncf %82 : vector<2x162xf32> to vector<2x162xbf16>
    %c8_75 = arith.constant 8 : index
    %c0_76 = arith.constant 0 : index
    %84 = vector.load %arg15[%c8_75, %c0_76] : memref<28x162xbf16, #tpu.memory_space<vmem>>, vector<2x162xbf16>
    tpu.vector_store %arg15[%c8_75, %c0_76], %83 {strides = array<i32>} : memref<28x162xbf16, #tpu.memory_space<vmem>>, vector<2x162xbf16>,
    %c20 = arith.constant 20 : index
    %c0_77 = arith.constant 0 : index
    %85 = vector.load %arg14[%c20, %c0_77] : memref<56x168xf32, #tpu.memory_space<vmem>>, vector<2x168xf32>
    %c22 = arith.constant 22 : index
    %c0_78 = arith.constant 0 : index
    %86 = vector.load %arg14[%c22, %c0_78] : memref<56x168xf32, #tpu.memory_space<vmem>>, vector<2x168xf32>
    %87 = arith.maximumf %85, %86 : vector<2x168xf32>
    %88 = vector.extract_strided_slice %87 {offsets = [0, 0], sizes = [2, 162], strides = [1, 1]} : vector<2x168xf32> to vector<2x162xf32>
    %89 = vector.extract_strided_slice %87 {offsets = [0, 6], sizes = [2, 162], strides = [1, 1]} : vector<2x168xf32> to vector<2x162xf32>
    %90 = arith.maximumf %88, %89 : vector<2x162xf32>
    %91 = arith.truncf %90 : vector<2x162xf32> to vector<2x162xbf16>
    %c10_79 = arith.constant 10 : index
    %c0_80 = arith.constant 0 : index
    %92 = vector.load %arg15[%c10_79, %c0_80] : memref<28x162xbf16, #tpu.memory_space<vmem>>, vector<2x162xbf16>
    tpu.vector_store %arg15[%c10_79, %c0_80], %91 {strides = array<i32>} : memref<28x162xbf16, #tpu.memory_space<vmem>>, vector<2x162xbf16>,
    %c24 = arith.constant 24 : index
    %c0_81 = arith.constant 0 : index
    %93 = vector.load %arg14[%c24, %c0_81] : memref<56x168xf32, #tpu.memory_space<vmem>>, vector<2x168xf32>
    %c26 = arith.constant 26 : index
    %c0_82 = arith.constant 0 : index
    %94 = vector.load %arg14[%c26, %c0_82] : memref<56x168xf32, #tpu.memory_space<vmem>>, vector<2x168xf32>
    %95 = arith.maximumf %93, %94 : vector<2x168xf32>
    %96 = vector.extract_strided_slice %95 {offsets = [0, 0], sizes = [2, 162], strides = [1, 1]} : vector<2x168xf32> to vector<2x162xf32>
    %97 = vector.extract_strided_slice %95 {offsets = [0, 6], sizes = [2, 162], strides = [1, 1]} : vector<2x168xf32> to vector<2x162xf32>
    %98 = arith.maximumf %96, %97 : vector<2x162xf32>
    %99 = arith.truncf %98 : vector<2x162xf32> to vector<2x162xbf16>
    %c12_83 = arith.constant 12 : index
    %c0_84 = arith.constant 0 : index
    %100 = vector.load %arg15[%c12_83, %c0_84] : memref<28x162xbf16, #tpu.memory_space<vmem>>, vector<2x162xbf16>
    tpu.vector_store %arg15[%c12_83, %c0_84], %99 {strides = array<i32>} : memref<28x162xbf16, #tpu.memory_space<vmem>>, vector<2x162xbf16>,
    %c28 = arith.constant 28 : index
    %c0_85 = arith.constant 0 : index
    %101 = vector.load %arg14[%c28, %c0_85] : memref<56x168xf32, #tpu.memory_space<vmem>>, vector<2x168xf32>
    %c30 = arith.constant 30 : index
    %c0_86 = arith.constant 0 : index
    %102 = vector.load %arg14[%c30, %c0_86] : memref<56x168xf32, #tpu.memory_space<vmem>>, vector<2x168xf32>
    %103 = arith.maximumf %101, %102 : vector<2x168xf32>
    %104 = vector.extract_strided_slice %103 {offsets = [0, 0], sizes = [2, 162], strides = [1, 1]} : vector<2x168xf32> to vector<2x162xf32>
    %105 = vector.extract_strided_slice %103 {offsets = [0, 6], sizes = [2, 162], strides = [1, 1]} : vector<2x168xf32> to vector<2x162xf32>
    %106 = arith.maximumf %104, %105 : vector<2x162xf32>
    %107 = arith.truncf %106 : vector<2x162xf32> to vector<2x162xbf16>
    %c14_87 = arith.constant 14 : index
    %c0_88 = arith.constant 0 : index
    %108 = vector.load %arg15[%c14_87, %c0_88] : memref<28x162xbf16, #tpu.memory_space<vmem>>, vector<2x162xbf16>
    tpu.vector_store %arg15[%c14_87, %c0_88], %107 {strides = array<i32>} : memref<28x162xbf16, #tpu.memory_space<vmem>>, vector<2x162xbf16>,
    %c32 = arith.constant 32 : index
    %c0_89 = arith.constant 0 : index
    %109 = vector.load %arg14[%c32, %c0_89] : memref<56x168xf32, #tpu.memory_space<vmem>>, vector<2x168xf32>
    %c34 = arith.constant 34 : index
    %c0_90 = arith.constant 0 : index
    %110 = vector.load %arg14[%c34, %c0_90] : memref<56x168xf32, #tpu.memory_space<vmem>>, vector<2x168xf32>
    %111 = arith.maximumf %109, %110 : vector<2x168xf32>
    %112 = vector.extract_strided_slice %111 {offsets = [0, 0], sizes = [2, 162], strides = [1, 1]} : vector<2x168xf32> to vector<2x162xf32>
    %113 = vector.extract_strided_slice %111 {offsets = [0, 6], sizes = [2, 162], strides = [1, 1]} : vector<2x168xf32> to vector<2x162xf32>
    %114 = arith.maximumf %112, %113 : vector<2x162xf32>
    %115 = arith.truncf %114 : vector<2x162xf32> to vector<2x162xbf16>
    %c16_91 = arith.constant 16 : index
    %c0_92 = arith.constant 0 : index
    %116 = vector.load %arg15[%c16_91, %c0_92] : memref<28x162xbf16, #tpu.memory_space<vmem>>, vector<2x162xbf16>
    tpu.vector_store %arg15[%c16_91, %c0_92], %115 {strides = array<i32>} : memref<28x162xbf16, #tpu.memory_space<vmem>>, vector<2x162xbf16>,
    %c36 = arith.constant 36 : index
    %c0_93 = arith.constant 0 : index
    %117 = vector.load %arg14[%c36, %c0_93] : memref<56x168xf32, #tpu.memory_space<vmem>>, vector<2x168xf32>
    %c38 = arith.constant 38 : index
    %c0_94 = arith.constant 0 : index
    %118 = vector.load %arg14[%c38, %c0_94] : memref<56x168xf32, #tpu.memory_space<vmem>>, vector<2x168xf32>
    %119 = arith.maximumf %117, %118 : vector<2x168xf32>
    %120 = vector.extract_strided_slice %119 {offsets = [0, 0], sizes = [2, 162], strides = [1, 1]} : vector<2x168xf32> to vector<2x162xf32>
    %121 = vector.extract_strided_slice %119 {offsets = [0, 6], sizes = [2, 162], strides = [1, 1]} : vector<2x168xf32> to vector<2x162xf32>
    %122 = arith.maximumf %120, %121 : vector<2x162xf32>
    %123 = arith.truncf %122 : vector<2x162xf32> to vector<2x162xbf16>
    %c18_95 = arith.constant 18 : index
    %c0_96 = arith.constant 0 : index
    %124 = vector.load %arg15[%c18_95, %c0_96] : memref<28x162xbf16, #tpu.memory_space<vmem>>, vector<2x162xbf16>
    tpu.vector_store %arg15[%c18_95, %c0_96], %123 {strides = array<i32>} : memref<28x162xbf16, #tpu.memory_space<vmem>>, vector<2x162xbf16>,
    %c40 = arith.constant 40 : index
    %c0_97 = arith.constant 0 : index
    %125 = vector.load %arg14[%c40, %c0_97] : memref<56x168xf32, #tpu.memory_space<vmem>>, vector<2x168xf32>
    %c42 = arith.constant 42 : index
    %c0_98 = arith.constant 0 : index
    %126 = vector.load %arg14[%c42, %c0_98] : memref<56x168xf32, #tpu.memory_space<vmem>>, vector<2x168xf32>
    %127 = arith.maximumf %125, %126 : vector<2x168xf32>
    %128 = vector.extract_strided_slice %127 {offsets = [0, 0], sizes = [2, 162], strides = [1, 1]} : vector<2x168xf32> to vector<2x162xf32>
    %129 = vector.extract_strided_slice %127 {offsets = [0, 6], sizes = [2, 162], strides = [1, 1]} : vector<2x168xf32> to vector<2x162xf32>
    %130 = arith.maximumf %128, %129 : vector<2x162xf32>
    %131 = arith.truncf %130 : vector<2x162xf32> to vector<2x162xbf16>
    %c20_99 = arith.constant 20 : index
    %c0_100 = arith.constant 0 : index
    %132 = vector.load %arg15[%c20_99, %c0_100] : memref<28x162xbf16, #tpu.memory_space<vmem>>, vector<2x162xbf16>
    tpu.vector_store %arg15[%c20_99, %c0_100], %131 {strides = array<i32>} : memref<28x162xbf16, #tpu.memory_space<vmem>>, vector<2x162xbf16>,
    %c44 = arith.constant 44 : index
    %c0_101 = arith.constant 0 : index
    %133 = vector.load %arg14[%c44, %c0_101] : memref<56x168xf32, #tpu.memory_space<vmem>>, vector<2x168xf32>
    %c46 = arith.constant 46 : index
    %c0_102 = arith.constant 0 : index
    %134 = vector.load %arg14[%c46, %c0_102] : memref<56x168xf32, #tpu.memory_space<vmem>>, vector<2x168xf32>
    %135 = arith.maximumf %133, %134 : vector<2x168xf32>
    %136 = vector.extract_strided_slice %135 {offsets = [0, 0], sizes = [2, 162], strides = [1, 1]} : vector<2x168xf32> to vector<2x162xf32>
    %137 = vector.extract_strided_slice %135 {offsets = [0, 6], sizes = [2, 162], strides = [1, 1]} : vector<2x168xf32> to vector<2x162xf32>
    %138 = arith.maximumf %136, %137 : vector<2x162xf32>
    %139 = arith.truncf %138 : vector<2x162xf32> to vector<2x162xbf16>
    %c22_103 = arith.constant 22 : index
    %c0_104 = arith.constant 0 : index
    %140 = vector.load %arg15[%c22_103, %c0_104] : memref<28x162xbf16, #tpu.memory_space<vmem>>, vector<2x162xbf16>
    tpu.vector_store %arg15[%c22_103, %c0_104], %139 {strides = array<i32>} : memref<28x162xbf16, #tpu.memory_space<vmem>>, vector<2x162xbf16>,
    %c48 = arith.constant 48 : index
    %c0_105 = arith.constant 0 : index
    %141 = vector.load %arg14[%c48, %c0_105] : memref<56x168xf32, #tpu.memory_space<vmem>>, vector<2x168xf32>
    %c50 = arith.constant 50 : index
    %c0_106 = arith.constant 0 : index
    %142 = vector.load %arg14[%c50, %c0_106] : memref<56x168xf32, #tpu.memory_space<vmem>>, vector<2x168xf32>
    %143 = arith.maximumf %141, %142 : vector<2x168xf32>
    %144 = vector.extract_strided_slice %143 {offsets = [0, 0], sizes = [2, 162], strides = [1, 1]} : vector<2x168xf32> to vector<2x162xf32>
    %145 = vector.extract_strided_slice %143 {offsets = [0, 6], sizes = [2, 162], strides = [1, 1]} : vector<2x168xf32> to vector<2x162xf32>
    %146 = arith.maximumf %144, %145 : vector<2x162xf32>
    %147 = arith.truncf %146 : vector<2x162xf32> to vector<2x162xbf16>
    %c24_107 = arith.constant 24 : index
    %c0_108 = arith.constant 0 : index
    %148 = vector.load %arg15[%c24_107, %c0_108] : memref<28x162xbf16, #tpu.memory_space<vmem>>, vector<2x162xbf16>
    tpu.vector_store %arg15[%c24_107, %c0_108], %147 {strides = array<i32>} : memref<28x162xbf16, #tpu.memory_space<vmem>>, vector<2x162xbf16>,
    %c52 = arith.constant 52 : index
    %c0_109 = arith.constant 0 : index
    %149 = vector.load %arg14[%c52, %c0_109] : memref<56x168xf32, #tpu.memory_space<vmem>>, vector<2x168xf32>
    %c54 = arith.constant 54 : index
    %c0_110 = arith.constant 0 : index
    %150 = vector.load %arg14[%c54, %c0_110] : memref<56x168xf32, #tpu.memory_space<vmem>>, vector<2x168xf32>
    %151 = arith.maximumf %149, %150 : vector<2x168xf32>
    %152 = vector.extract_strided_slice %151 {offsets = [0, 0], sizes = [2, 162], strides = [1, 1]} : vector<2x168xf32> to vector<2x162xf32>
    %153 = vector.extract_strided_slice %151 {offsets = [0, 6], sizes = [2, 162], strides = [1, 1]} : vector<2x168xf32> to vector<2x162xf32>
    %154 = arith.maximumf %152, %153 : vector<2x162xf32>
    %155 = arith.truncf %154 : vector<2x162xf32> to vector<2x162xbf16>
    %c26_111 = arith.constant 26 : index
    %c0_112 = arith.constant 0 : index
    %156 = vector.load %arg15[%c26_111, %c0_112] : memref<28x162xbf16, #tpu.memory_space<vmem>>, vector<2x162xbf16>
    tpu.vector_store %arg15[%c26_111, %c0_112], %155 {strides = array<i32>} : memref<28x162xbf16, #tpu.memory_space<vmem>>, vector<2x162xbf16>,
    %c0_113 = arith.constant 0 : index
    %c0_114 = arith.constant 0 : index
    %157 = vector.load %arg15[%c0_113, %c0_114] : memref<28x162xbf16, #tpu.memory_space<vmem>>, vector<28x162xbf16>
    %c0_115 = arith.constant 0 : index
    %c0_116 = arith.constant 0 : index
    %158 = vector.load %arg6[%c0_115, %c0_116] : memref<162x84xbf16, #tpu.memory_space<vmem>>, vector<162x84xbf16>
    %cst_117 = arith.constant dense<0.000000e+00> : vector<28x84xf32>
    %159 = tpu.matmul %157, %158, %cst_117 {dimension_numbers = #tpu.dot_dimension_numbers<[1], [0], [0], [1], [0, 0, 1, 1], [], []>} : vector<28x162xbf16>, vector<162x84xbf16>, vector<28x84xf32> -> vector<28x84xf32>
    %160 = arith.truncf %159 : vector<28x84xf32> to vector<28x84xbf16>
    %c0_118 = arith.constant 0 : index
    %c0_119 = arith.constant 0 : index
    %161 = vector.load %arg16[%c0_118, %c0_119] : memref<28x84xbf16, #tpu.memory_space<vmem>>, vector<28x84xbf16>
    tpu.vector_store %arg16[%c0_118, %c0_119], %160 {strides = array<i32>} : memref<28x84xbf16, #tpu.memory_space<vmem>>, vector<28x84xbf16>,
    %c0_120 = arith.constant 0 : index
    %c0_121 = arith.constant 0 : index
    %162 = vector.load %arg16[%c0_120, %c0_121] : memref<28x84xbf16, #tpu.memory_space<vmem>>, vector<20x84xbf16>
    %c0_122 = arith.constant 0 : index
    %c0_123 = arith.constant 0 : index
    %c0_124 = arith.constant 0 : index
    %163 = vector.load %arg4[%c0_122, %c0_123, %c0_124] : memref<5x84x160xbf16, #tpu.memory_space<vmem>>, vector<1x84x160xbf16>
    %164 = vector.shape_cast %163 : vector<1x84x160xbf16> to vector<84x160xbf16>
    %cst_125 = arith.constant dense<0.000000e+00> : vector<20x160xf32>
    %165 = tpu.matmul %162, %164, %cst_125 {dimension_numbers = #tpu.dot_dimension_numbers<[1], [0], [0], [1], [0, 0, 1, 1], [], []>} : vector<20x84xbf16>, vector<84x160xbf16>, vector<20x160xf32> -> vector<20x160xf32>
    %c0_126 = arith.constant 0 : index
    %c0_127 = arith.constant 0 : index
    %166 = vector.load %arg17[%c0_126, %c0_127] : memref<20x160xf32, #tpu.memory_space<vmem>>, vector<20x160xf32>
    tpu.vector_store %arg17[%c0_126, %c0_127], %165 {strides = array<i32>} : memref<20x160xf32, #tpu.memory_space<vmem>>, vector<20x160xf32>,
    %c0_128 = arith.constant 0 : index
    %c0_129 = arith.constant 0 : index
    %167 = vector.load %arg17[%c0_128, %c0_129] : memref<20x160xf32, #tpu.memory_space<vmem>>, vector<20x160xf32>
    %c2_130 = arith.constant 2 : index
    %c0_131 = arith.constant 0 : index
    %168 = vector.load %arg16[%c2_130, %c0_131] : memref<28x84xbf16, #tpu.memory_space<vmem>>, vector<20x84xbf16>
    %c1_132 = arith.constant 1 : index
    %c0_133 = arith.constant 0 : index
    %c0_134 = arith.constant 0 : index
    %169 = vector.load %arg4[%c1_132, %c0_133, %c0_134] : memref<5x84x160xbf16, #tpu.memory_space<vmem>>, vector<1x84x160xbf16>
    %170 = vector.shape_cast %169 : vector<1x84x160xbf16> to vector<84x160xbf16>
    %cst_135 = arith.constant dense<0.000000e+00> : vector<20x160xf32>
    %171 = tpu.matmul %168, %170, %cst_135 {dimension_numbers = #tpu.dot_dimension_numbers<[1], [0], [0], [1], [0, 0, 1, 1], [], []>} : vector<20x84xbf16>, vector<84x160xbf16>, vector<20x160xf32> -> vector<20x160xf32>
    %172 = arith.addf %167, %171 : vector<20x160xf32>
    %c0_136 = arith.constant 0 : index
    %c0_137 = arith.constant 0 : index
    %173 = vector.load %arg17[%c0_136, %c0_137] : memref<20x160xf32, #tpu.memory_space<vmem>>, vector<20x160xf32>
    tpu.vector_store %arg17[%c0_136, %c0_137], %172 {strides = array<i32>} : memref<20x160xf32, #tpu.memory_space<vmem>>, vector<20x160xf32>,
    %c0_138 = arith.constant 0 : index
    %c0_139 = arith.constant 0 : index
    %174 = vector.load %arg17[%c0_138, %c0_139] : memref<20x160xf32, #tpu.memory_space<vmem>>, vector<20x160xf32>
    %c4_140 = arith.constant 4 : index
    %c0_141 = arith.constant 0 : index
    %175 = vector.load %arg16[%c4_140, %c0_141] : memref<28x84xbf16, #tpu.memory_space<vmem>>, vector<20x84xbf16>
    %c2_142 = arith.constant 2 : index
    %c0_143 = arith.constant 0 : index
    %c0_144 = arith.constant 0 : index
    %176 = vector.load %arg4[%c2_142, %c0_143, %c0_144] : memref<5x84x160xbf16, #tpu.memory_space<vmem>>, vector<1x84x160xbf16>
    %177 = vector.shape_cast %176 : vector<1x84x160xbf16> to vector<84x160xbf16>
    %cst_145 = arith.constant dense<0.000000e+00> : vector<20x160xf32>
    %178 = tpu.matmul %175, %177, %cst_145 {dimension_numbers = #tpu.dot_dimension_numbers<[1], [0], [0], [1], [0, 0, 1, 1], [], []>} : vector<20x84xbf16>, vector<84x160xbf16>, vector<20x160xf32> -> vector<20x160xf32>
    %179 = arith.addf %174, %178 : vector<20x160xf32>
    %c0_146 = arith.constant 0 : index
    %c0_147 = arith.constant 0 : index
    %180 = vector.load %arg17[%c0_146, %c0_147] : memref<20x160xf32, #tpu.memory_space<vmem>>, vector<20x160xf32>
    tpu.vector_store %arg17[%c0_146, %c0_147], %179 {strides = array<i32>} : memref<20x160xf32, #tpu.memory_space<vmem>>, vector<20x160xf32>,
    %c0_148 = arith.constant 0 : index
    %c0_149 = arith.constant 0 : index
    %181 = vector.load %arg17[%c0_148, %c0_149] : memref<20x160xf32, #tpu.memory_space<vmem>>, vector<20x160xf32>
    %c6_150 = arith.constant 6 : index
    %c0_151 = arith.constant 0 : index
    %182 = vector.load %arg16[%c6_150, %c0_151] : memref<28x84xbf16, #tpu.memory_space<vmem>>, vector<20x84xbf16>
    %c3_152 = arith.constant 3 : index
    %c0_153 = arith.constant 0 : index
    %c0_154 = arith.constant 0 : index
    %183 = vector.load %arg4[%c3_152, %c0_153, %c0_154] : memref<5x84x160xbf16, #tpu.memory_space<vmem>>, vector<1x84x160xbf16>
    %184 = vector.shape_cast %183 : vector<1x84x160xbf16> to vector<84x160xbf16>
    %cst_155 = arith.constant dense<0.000000e+00> : vector<20x160xf32>
    %185 = tpu.matmul %182, %184, %cst_155 {dimension_numbers = #tpu.dot_dimension_numbers<[1], [0], [0], [1], [0, 0, 1, 1], [], []>} : vector<20x84xbf16>, vector<84x160xbf16>, vector<20x160xf32> -> vector<20x160xf32>
    %186 = arith.addf %181, %185 : vector<20x160xf32>
    %c0_156 = arith.constant 0 : index
    %c0_157 = arith.constant 0 : index
    %187 = vector.load %arg17[%c0_156, %c0_157] : memref<20x160xf32, #tpu.memory_space<vmem>>, vector<20x160xf32>
    tpu.vector_store %arg17[%c0_156, %c0_157], %186 {strides = array<i32>} : memref<20x160xf32, #tpu.memory_space<vmem>>, vector<20x160xf32>,
    %c0_158 = arith.constant 0 : index
    %c0_159 = arith.constant 0 : index
    %188 = vector.load %arg17[%c0_158, %c0_159] : memref<20x160xf32, #tpu.memory_space<vmem>>, vector<20x160xf32>
    %c8_160 = arith.constant 8 : index
    %c0_161 = arith.constant 0 : index
    %189 = vector.load %arg16[%c8_160, %c0_161] : memref<28x84xbf16, #tpu.memory_space<vmem>>, vector<20x84xbf16>
    %c4_162 = arith.constant 4 : index
    %c0_163 = arith.constant 0 : index
    %c0_164 = arith.constant 0 : index
    %190 = vector.load %arg4[%c4_162, %c0_163, %c0_164] : memref<5x84x160xbf16, #tpu.memory_space<vmem>>, vector<1x84x160xbf16>
    %191 = vector.shape_cast %190 : vector<1x84x160xbf16> to vector<84x160xbf16>
    %cst_165 = arith.constant dense<0.000000e+00> : vector<20x160xf32>
    %192 = tpu.matmul %189, %191, %cst_165 {dimension_numbers = #tpu.dot_dimension_numbers<[1], [0], [0], [1], [0, 0, 1, 1], [], []>} : vector<20x84xbf16>, vector<84x160xbf16>, vector<20x160xf32> -> vector<20x160xf32>
    %193 = arith.addf %188, %192 : vector<20x160xf32>
    %c0_166 = arith.constant 0 : index
    %c0_167 = arith.constant 0 : index
    %194 = vector.load %arg17[%c0_166, %c0_167] : memref<20x160xf32, #tpu.memory_space<vmem>>, vector<20x160xf32>
    tpu.vector_store %arg17[%c0_166, %c0_167], %193 {strides = array<i32>} : memref<20x160xf32, #tpu.memory_space<vmem>>, vector<20x160xf32>,
    %c0_168 = arith.constant 0 : index
    %c0_169 = arith.constant 0 : index
    %195 = vector.load %arg17[%c0_168, %c0_169] : memref<20x160xf32, #tpu.memory_space<vmem>>, vector<20x160xf32>
    %c0_170 = arith.constant 0 : index
    %c0_171 = arith.constant 0 : index
    %196 = vector.load %arg5[%c0_170, %c0_171] : memref<1x160xf32, #tpu.memory_space<vmem>>, vector<1x160xf32>
    %197 = vector.broadcast %196 : vector<1x160xf32> to vector<20x160xf32>
    %198 = arith.addf %195, %197 : vector<20x160xf32>
    %cst_172 = arith.constant 0.000000e+00 : f32
    %199 = vector.broadcast %cst_172 : f32 to vector<20x160xf32>
    %200 = arith.maximumf %198, %199 : vector<20x160xf32>
    %c0_173 = arith.constant 0 : index
    %c0_174 = arith.constant 0 : index
    %201 = vector.load %arg17[%c0_173, %c0_174] : memref<20x160xf32, #tpu.memory_space<vmem>>, vector<20x160xf32>
    tpu.vector_store %arg17[%c0_173, %c0_174], %200 {strides = array<i32>} : memref<20x160xf32, #tpu.memory_space<vmem>>, vector<20x160xf32>,
    %c0_175 = arith.constant 0 : index
    %c0_176 = arith.constant 0 : index
    %202 = vector.load %arg17[%c0_175, %c0_176] : memref<20x160xf32, #tpu.memory_space<vmem>>, vector<2x160xf32>
    %c2_177 = arith.constant 2 : index
    %c0_178 = arith.constant 0 : index
    %203 = vector.load %arg17[%c2_177, %c0_178] : memref<20x160xf32, #tpu.memory_space<vmem>>, vector<2x160xf32>
    %204 = arith.maximumf %202, %203 : vector<2x160xf32>
    %205 = vector.extract_strided_slice %204 {offsets = [0, 0], sizes = [2, 144], strides = [1, 1]} : vector<2x160xf32> to vector<2x144xf32>
    %206 = vector.extract_strided_slice %204 {offsets = [0, 16], sizes = [2, 144], strides = [1, 1]} : vector<2x160xf32> to vector<2x144xf32>
    %207 = arith.maximumf %205, %206 : vector<2x144xf32>
    %208 = arith.truncf %207 : vector<2x144xf32> to vector<2x144xbf16>
    %c0_179 = arith.constant 0 : index
    %c0_180 = arith.constant 0 : index
    %209 = vector.load %arg18[%c0_179, %c0_180] : memref<10x144xbf16, #tpu.memory_space<vmem>>, vector<2x144xbf16>
    tpu.vector_store %arg18[%c0_179, %c0_180], %208 {strides = array<i32>} : memref<10x144xbf16, #tpu.memory_space<vmem>>, vector<2x144xbf16>,
    %c4_181 = arith.constant 4 : index
    %c0_182 = arith.constant 0 : index
    %210 = vector.load %arg17[%c4_181, %c0_182] : memref<20x160xf32, #tpu.memory_space<vmem>>, vector<2x160xf32>
    %c6_183 = arith.constant 6 : index
    %c0_184 = arith.constant 0 : index
    %211 = vector.load %arg17[%c6_183, %c0_184] : memref<20x160xf32, #tpu.memory_space<vmem>>, vector<2x160xf32>
    %212 = arith.maximumf %210, %211 : vector<2x160xf32>
    %213 = vector.extract_strided_slice %212 {offsets = [0, 0], sizes = [2, 144], strides = [1, 1]} : vector<2x160xf32> to vector<2x144xf32>
    %214 = vector.extract_strided_slice %212 {offsets = [0, 16], sizes = [2, 144], strides = [1, 1]} : vector<2x160xf32> to vector<2x144xf32>
    %215 = arith.maximumf %213, %214 : vector<2x144xf32>
    %216 = arith.truncf %215 : vector<2x144xf32> to vector<2x144xbf16>
    %c2_185 = arith.constant 2 : index
    %c0_186 = arith.constant 0 : index
    %217 = vector.load %arg18[%c2_185, %c0_186] : memref<10x144xbf16, #tpu.memory_space<vmem>>, vector<2x144xbf16>
    tpu.vector_store %arg18[%c2_185, %c0_186], %216 {strides = array<i32>} : memref<10x144xbf16, #tpu.memory_space<vmem>>, vector<2x144xbf16>,
    %c8_187 = arith.constant 8 : index
    %c0_188 = arith.constant 0 : index
    %218 = vector.load %arg17[%c8_187, %c0_188] : memref<20x160xf32, #tpu.memory_space<vmem>>, vector<2x160xf32>
    %c10_189 = arith.constant 10 : index
    %c0_190 = arith.constant 0 : index
    %219 = vector.load %arg17[%c10_189, %c0_190] : memref<20x160xf32, #tpu.memory_space<vmem>>, vector<2x160xf32>
    %220 = arith.maximumf %218, %219 : vector<2x160xf32>
    %221 = vector.extract_strided_slice %220 {offsets = [0, 0], sizes = [2, 144], strides = [1, 1]} : vector<2x160xf32> to vector<2x144xf32>
    %222 = vector.extract_strided_slice %220 {offsets = [0, 16], sizes = [2, 144], strides = [1, 1]} : vector<2x160xf32> to vector<2x144xf32>
    %223 = arith.maximumf %221, %222 : vector<2x144xf32>
    %224 = arith.truncf %223 : vector<2x144xf32> to vector<2x144xbf16>
    %c4_191 = arith.constant 4 : index
    %c0_192 = arith.constant 0 : index
    %225 = vector.load %arg18[%c4_191, %c0_192] : memref<10x144xbf16, #tpu.memory_space<vmem>>, vector<2x144xbf16>
    tpu.vector_store %arg18[%c4_191, %c0_192], %224 {strides = array<i32>} : memref<10x144xbf16, #tpu.memory_space<vmem>>, vector<2x144xbf16>,
    %c12_193 = arith.constant 12 : index
    %c0_194 = arith.constant 0 : index
    %226 = vector.load %arg17[%c12_193, %c0_194] : memref<20x160xf32, #tpu.memory_space<vmem>>, vector<2x160xf32>
    %c14_195 = arith.constant 14 : index
    %c0_196 = arith.constant 0 : index
    %227 = vector.load %arg17[%c14_195, %c0_196] : memref<20x160xf32, #tpu.memory_space<vmem>>, vector<2x160xf32>
    %228 = arith.maximumf %226, %227 : vector<2x160xf32>
    %229 = vector.extract_strided_slice %228 {offsets = [0, 0], sizes = [2, 144], strides = [1, 1]} : vector<2x160xf32> to vector<2x144xf32>
    %230 = vector.extract_strided_slice %228 {offsets = [0, 16], sizes = [2, 144], strides = [1, 1]} : vector<2x160xf32> to vector<2x144xf32>
    %231 = arith.maximumf %229, %230 : vector<2x144xf32>
    %232 = arith.truncf %231 : vector<2x144xf32> to vector<2x144xbf16>
    %c6_197 = arith.constant 6 : index
    %c0_198 = arith.constant 0 : index
    %233 = vector.load %arg18[%c6_197, %c0_198] : memref<10x144xbf16, #tpu.memory_space<vmem>>, vector<2x144xbf16>
    tpu.vector_store %arg18[%c6_197, %c0_198], %232 {strides = array<i32>} : memref<10x144xbf16, #tpu.memory_space<vmem>>, vector<2x144xbf16>,
    %c16_199 = arith.constant 16 : index
    %c0_200 = arith.constant 0 : index
    %234 = vector.load %arg17[%c16_199, %c0_200] : memref<20x160xf32, #tpu.memory_space<vmem>>, vector<2x160xf32>
    %c18_201 = arith.constant 18 : index
    %c0_202 = arith.constant 0 : index
    %235 = vector.load %arg17[%c18_201, %c0_202] : memref<20x160xf32, #tpu.memory_space<vmem>>, vector<2x160xf32>
    %236 = arith.maximumf %234, %235 : vector<2x160xf32>
    %237 = vector.extract_strided_slice %236 {offsets = [0, 0], sizes = [2, 144], strides = [1, 1]} : vector<2x160xf32> to vector<2x144xf32>
    %238 = vector.extract_strided_slice %236 {offsets = [0, 16], sizes = [2, 144], strides = [1, 1]} : vector<2x160xf32> to vector<2x144xf32>
    %239 = arith.maximumf %237, %238 : vector<2x144xf32>
    %240 = arith.truncf %239 : vector<2x144xf32> to vector<2x144xbf16>
    %c8_203 = arith.constant 8 : index
    %c0_204 = arith.constant 0 : index
    %241 = vector.load %arg18[%c8_203, %c0_204] : memref<10x144xbf16, #tpu.memory_space<vmem>>, vector<2x144xbf16>
    tpu.vector_store %arg18[%c8_203, %c0_204], %240 {strides = array<i32>} : memref<10x144xbf16, #tpu.memory_space<vmem>>, vector<2x144xbf16>,
    %c0_205 = arith.constant 0 : index
    %c0_206 = arith.constant 0 : index
    %242 = vector.load %arg18[%c0_205, %c0_206] : memref<10x144xbf16, #tpu.memory_space<vmem>>, vector<2x144xbf16>
    %c0_207 = arith.constant 0 : index
    %c0_208 = arith.constant 0 : index
    %c0_209 = arith.constant 0 : index
    %243 = vector.load %arg7[%c0_207, %c0_208, %c0_209] : memref<5x144x120xbf16, #tpu.memory_space<vmem>>, vector<1x144x120xbf16>
    %244 = vector.shape_cast %243 : vector<1x144x120xbf16> to vector<144x120xbf16>
    %cst_210 = arith.constant dense<0.000000e+00> : vector<2x120xf32>
    %245 = tpu.matmul %242, %244, %cst_210 {dimension_numbers = #tpu.dot_dimension_numbers<[1], [0], [0], [1], [0, 0, 1, 1], [], []>} : vector<2x144xbf16>, vector<144x120xbf16>, vector<2x120xf32> -> vector<2x120xf32>
    %c2_211 = arith.constant 2 : index
    %c0_212 = arith.constant 0 : index
    %246 = vector.load %arg18[%c2_211, %c0_212] : memref<10x144xbf16, #tpu.memory_space<vmem>>, vector<2x144xbf16>
    %c1_213 = arith.constant 1 : index
    %c0_214 = arith.constant 0 : index
    %c0_215 = arith.constant 0 : index
    %247 = vector.load %arg7[%c1_213, %c0_214, %c0_215] : memref<5x144x120xbf16, #tpu.memory_space<vmem>>, vector<1x144x120xbf16>
    %248 = vector.shape_cast %247 : vector<1x144x120xbf16> to vector<144x120xbf16>
    %cst_216 = arith.constant dense<0.000000e+00> : vector<2x120xf32>
    %249 = tpu.matmul %246, %248, %cst_216 {dimension_numbers = #tpu.dot_dimension_numbers<[1], [0], [0], [1], [0, 0, 1, 1], [], []>} : vector<2x144xbf16>, vector<144x120xbf16>, vector<2x120xf32> -> vector<2x120xf32>
    %250 = arith.addf %245, %249 : vector<2x120xf32>
    %c4_217 = arith.constant 4 : index
    %c0_218 = arith.constant 0 : index
    %251 = vector.load %arg18[%c4_217, %c0_218] : memref<10x144xbf16, #tpu.memory_space<vmem>>, vector<2x144xbf16>
    %c2_219 = arith.constant 2 : index
    %c0_220 = arith.constant 0 : index
    %c0_221 = arith.constant 0 : index
    %252 = vector.load %arg7[%c2_219, %c0_220, %c0_221] : memref<5x144x120xbf16, #tpu.memory_space<vmem>>, vector<1x144x120xbf16>
    %253 = vector.shape_cast %252 : vector<1x144x120xbf16> to vector<144x120xbf16>
    %cst_222 = arith.constant dense<0.000000e+00> : vector<2x120xf32>
    %254 = tpu.matmul %251, %253, %cst_222 {dimension_numbers = #tpu.dot_dimension_numbers<[1], [0], [0], [1], [0, 0, 1, 1], [], []>} : vector<2x144xbf16>, vector<144x120xbf16>, vector<2x120xf32> -> vector<2x120xf32>
    %255 = arith.addf %250, %254 : vector<2x120xf32>
    %c6_223 = arith.constant 6 : index
    %c0_224 = arith.constant 0 : index
    %256 = vector.load %arg18[%c6_223, %c0_224] : memref<10x144xbf16, #tpu.memory_space<vmem>>, vector<2x144xbf16>
    %c3_225 = arith.constant 3 : index
    %c0_226 = arith.constant 0 : index
    %c0_227 = arith.constant 0 : index
    %257 = vector.load %arg7[%c3_225, %c0_226, %c0_227] : memref<5x144x120xbf16, #tpu.memory_space<vmem>>, vector<1x144x120xbf16>
    %258 = vector.shape_cast %257 : vector<1x144x120xbf16> to vector<144x120xbf16>
    %cst_228 = arith.constant dense<0.000000e+00> : vector<2x120xf32>
    %259 = tpu.matmul %256, %258, %cst_228 {dimension_numbers = #tpu.dot_dimension_numbers<[1], [0], [0], [1], [0, 0, 1, 1], [], []>} : vector<2x144xbf16>, vector<144x120xbf16>, vector<2x120xf32> -> vector<2x120xf32>
    %260 = arith.addf %255, %259 : vector<2x120xf32>
    %c8_229 = arith.constant 8 : index
    %c0_230 = arith.constant 0 : index
    %261 = vector.load %arg18[%c8_229, %c0_230] : memref<10x144xbf16, #tpu.memory_space<vmem>>, vector<2x144xbf16>
    %c4_231 = arith.constant 4 : index
    %c0_232 = arith.constant 0 : index
    %c0_233 = arith.constant 0 : index
    %262 = vector.load %arg7[%c4_231, %c0_232, %c0_233] : memref<5x144x120xbf16, #tpu.memory_space<vmem>>, vector<1x144x120xbf16>
    %263 = vector.shape_cast %262 : vector<1x144x120xbf16> to vector<144x120xbf16>
    %cst_234 = arith.constant dense<0.000000e+00> : vector<2x120xf32>
    %264 = tpu.matmul %261, %263, %cst_234 {dimension_numbers = #tpu.dot_dimension_numbers<[1], [0], [0], [1], [0, 0, 1, 1], [], []>} : vector<2x144xbf16>, vector<144x120xbf16>, vector<2x120xf32> -> vector<2x120xf32>
    %265 = arith.addf %260, %264 : vector<2x120xf32>
    %c0_235 = arith.constant 0 : index
    %c0_236 = arith.constant 0 : index
    %266 = vector.load %arg8[%c0_235, %c0_236] : memref<1x120xf32, #tpu.memory_space<vmem>>, vector<1x120xf32>
    %267 = vector.broadcast %266 : vector<1x120xf32> to vector<2x120xf32>
    %268 = arith.addf %265, %267 : vector<2x120xf32>
    %cst_237 = arith.constant 0.000000e+00 : f32
    %269 = vector.broadcast %cst_237 : f32 to vector<2x120xf32>
    %270 = arith.maximumf %268, %269 : vector<2x120xf32>
    %271 = arith.truncf %270 : vector<2x120xf32> to vector<2x120xbf16>
    %c0_238 = arith.constant 0 : index
    %c0_239 = arith.constant 0 : index
    %272 = vector.load %arg9[%c0_238, %c0_239] : memref<120x84xbf16, #tpu.memory_space<vmem>>, vector<120x84xbf16>
    %cst_240 = arith.constant dense<0.000000e+00> : vector<2x84xf32>
    %273 = tpu.matmul %271, %272, %cst_240 {dimension_numbers = #tpu.dot_dimension_numbers<[1], [0], [0], [1], [0, 0, 1, 1], [], []>} : vector<2x120xbf16>, vector<120x84xbf16>, vector<2x84xf32> -> vector<2x84xf32>
    %c0_241 = arith.constant 0 : index
    %c0_242 = arith.constant 0 : index
    %274 = vector.load %arg10[%c0_241, %c0_242] : memref<1x84xf32, #tpu.memory_space<vmem>>, vector<1x84xf32>
    %275 = vector.broadcast %274 : vector<1x84xf32> to vector<2x84xf32>
    %276 = arith.addf %273, %275 : vector<2x84xf32>
    %cst_243 = arith.constant 0.000000e+00 : f32
    %277 = vector.broadcast %cst_243 : f32 to vector<2x84xf32>
    %278 = arith.maximumf %276, %277 : vector<2x84xf32>
    %279 = arith.truncf %278 : vector<2x84xf32> to vector<2x84xbf16>
    %c0_244 = arith.constant 0 : index
    %c0_245 = arith.constant 0 : index
    %280 = vector.load %arg11[%c0_244, %c0_245] : memref<84x128xbf16, #tpu.memory_space<vmem>>, vector<84x128xbf16>
    %cst_246 = arith.constant dense<0.000000e+00> : vector<2x128xf32>
    %281 = tpu.matmul %279, %280, %cst_246 {dimension_numbers = #tpu.dot_dimension_numbers<[1], [0], [0], [1], [0, 0, 1, 1], [], []>} : vector<2x84xbf16>, vector<84x128xbf16>, vector<2x128xf32> -> vector<2x128xf32>
    %c0_247 = arith.constant 0 : index
    %c0_248 = arith.constant 0 : index
    %282 = vector.load %arg12[%c0_247, %c0_248] : memref<1x128xf32, #tpu.memory_space<vmem>>, vector<1x128xf32>
    %283 = vector.broadcast %282 : vector<1x128xf32> to vector<2x128xf32>
    %284 = arith.addf %281, %283 : vector<2x128xf32>
    %c0_249 = arith.constant 0 : index
    %c0_250 = arith.constant 0 : index
    %c0_251 = arith.constant 0 : index
    %285 = vector.load %arg13[%c0_249, %c0_250, %c0_251] : memref<1x2x128xf32, #tpu.memory_space<vmem>>, vector<1x2x128xf32>
    %286 = vector.shape_cast %285 : vector<1x2x128xf32> to vector<2x128xf32>
    %287 = vector.shape_cast %284 : vector<2x128xf32> to vector<1x2x128xf32>
    tpu.vector_store %arg13[%c0_249, %c0_250, %c0_251], %287 {strides = array<i32>} : memref<1x2x128xf32, #tpu.memory_space<vmem>>, vector<1x2x128xf32>,
    return
  }
  func.func @transform_0(%arg0: i32) -> (i32, i32, i32) {
    %c0_i32 = arith.constant 0 : i32
    %c0_i32_0 = arith.constant 0 : i32
    %c0_i32_1 = arith.constant 0 : i32
    return %arg0, %c0_i32, %c0_i32_0 : i32, i32, i32
  }
  func.func @transform_1(%arg0: i32) -> (i32, i32, i32) {
    %c0_i32 = arith.constant 0 : i32
    %c0_i32_0 = arith.constant 0 : i32
    %c0_i32_1 = arith.constant 0 : i32
    %c0_i32_2 = arith.constant 0 : i32
    return %c0_i32, %c0_i32_0, %c0_i32_1 : i32, i32, i32
  }
  func.func @transform_2(%arg0: i32) -> (i32, i32) {
    %c0_i32 = arith.constant 0 : i32
    %c0_i32_0 = arith.constant 0 : i32
    %c0_i32_1 = arith.constant 0 : i32
    return %c0_i32, %c0_i32_0 : i32, i32
  }
  func.func @transform_3(%arg0: i32) -> (i32, i32, i32) {
    %c0_i32 = arith.constant 0 : i32
    %c0_i32_0 = arith.constant 0 : i32
    %c0_i32_1 = arith.constant 0 : i32
    %c0_i32_2 = arith.constant 0 : i32
    return %c0_i32, %c0_i32_0, %c0_i32_1 : i32, i32, i32
  }
  func.func @transform_4(%arg0: i32) -> (i32, i32) {
    %c0_i32 = arith.constant 0 : i32
    %c0_i32_0 = arith.constant 0 : i32
    %c0_i32_1 = arith.constant 0 : i32
    return %c0_i32, %c0_i32_0 : i32, i32
  }
  func.func @transform_5(%arg0: i32) -> (i32, i32) {
    %c0_i32 = arith.constant 0 : i32
    %c0_i32_0 = arith.constant 0 : i32
    %c0_i32_1 = arith.constant 0 : i32
    return %c0_i32, %c0_i32_0 : i32, i32
  }
  func.func @transform_6(%arg0: i32) -> (i32, i32, i32) {
    %c0_i32 = arith.constant 0 : i32
    %c0_i32_0 = arith.constant 0 : i32
    %c0_i32_1 = arith.constant 0 : i32
    %c0_i32_2 = arith.constant 0 : i32
    return %c0_i32, %c0_i32_0, %c0_i32_1 : i32, i32, i32
  }
  func.func @transform_7(%arg0: i32) -> (i32, i32) {
    %c0_i32 = arith.constant 0 : i32
    %c0_i32_0 = arith.constant 0 : i32
    %c0_i32_1 = arith.constant 0 : i32
    return %c0_i32, %c0_i32_0 : i32, i32
  }
  func.func @transform_8(%arg0: i32) -> (i32, i32) {
    %c0_i32 = arith.constant 0 : i32
    %c0_i32_0 = arith.constant 0 : i32
    %c0_i32_1 = arith.constant 0 : i32
    return %c0_i32, %c0_i32_0 : i32, i32
  }
  func.func @transform_9(%arg0: i32) -> (i32, i32) {
    %c0_i32 = arith.constant 0 : i32
    %c0_i32_0 = arith.constant 0 : i32
    %c0_i32_1 = arith.constant 0 : i32
    return %c0_i32, %c0_i32_0 : i32, i32
  }
  func.func @transform_10(%arg0: i32) -> (i32, i32) {
    %c0_i32 = arith.constant 0 : i32
    %c0_i32_0 = arith.constant 0 : i32
    %c0_i32_1 = arith.constant 0 : i32
    return %c0_i32, %c0_i32_0 : i32, i32
  }
  func.func @transform_11(%arg0: i32) -> (i32, i32) {
    %c0_i32 = arith.constant 0 : i32
    %c0_i32_0 = arith.constant 0 : i32
    %c0_i32_1 = arith.constant 0 : i32
    return %c0_i32, %c0_i32_0 : i32, i32
  }
  func.func @transform_12(%arg0: i32) -> (i32, i32, i32) {
    %c0_i32 = arith.constant 0 : i32
    %c0_i32_0 = arith.constant 0 : i32
    %c0_i32_1 = arith.constant 0 : i32
    return %arg0, %c0_i32, %c0_i32_0 : i32, i32, i32
  }
}

</mosaic_0001>

<bundles_post_ra>
// kernel: tile.18
= control target key start
LH: loop header
LB: loop body
LE: loop exit
PB: predicated region body
PF: predicated region fallthrough
CT: control target
= control target key end

     0   :  { %2 = vsyncpa [#allocation1], 0  ;;  %s51_s8 = smov [#allocation0]   ;;  %s71_s0 = inlined_call_operand.hbm [shape: f32[16], index: 0, kind: input, shape index: {}]   ;;  %s72_s1 = inlined_call_operand.vmem [shape: f32[10,16], index: 1, kind: output, shape index: {}]  }
   0x1   :  { %s8_s0 = sshll.u32 %s71_s0, 4  ;;  %s10_s9 = sshll.u32 %s51_s8, 4  ;;  %s9_s0 = int_to_ptr.hbm [resolvable:$true] %s8_s0  ;;  %s11_s9 = int_to_ptr.vmem [resolvable:$true] %s10_s9 }
   0x2   :  { %13 = dma.hbm_to_vmem [thread:$0]  %s9_s0, 16, %s11_s9, [#allocation1]  }
   0x3   :  { %49 = dma.done.wait [#allocation1], 16  }
   0x4   :  { %50 = vsyncadd [#allocation1], 4294967280  ;;  %v18_v0 = vld [vmem:[#allocation0] ss:$0 sm:$0xff] }
   0x5   :  { %19 = vst [vmem:[%s72_s1] sm:$0xff] %v18_v0 }
   0x6   :  { %23 = vst [vmem:[%s72_s1 + $0x8] sm:$0xff] %v18_v0 }
   0x7   :  { %22 = vsyncpa [#allocation1], 1 }

// kernel: tile.19
= control target key start
LH: loop header
LB: loop body
LE: loop exit
PB: predicated region body
PF: predicated region fallthrough
CT: control target
= control target key end

     0   :  { %s76_s10 = smov 112   ;;  %s77_s11 = smov 80   ;;  %vm4_vm0 = vcmask 130048   ;;  %vm10_vm1 = vcmask 1048448   ;;  %vm16_vm2 = vcmask 917248   ;;  %vm22_vm3 = vcmask 786048   ;;  %s123_s0 = inlined_call_operand.vmem [shape: f32[10,16], index: 0, kind: input, shape index: {}]   ;;  %s124_s1 = inlined_call_operand.vmem [shape: f32[1,160], index: 1, kind: output, shape index: {}]  }
   0x1   :  { %v61_v0 = vld [vmem:[%s123_s0 + $0x7] sm:$0x1]   ;;  %v63_v1 = vld [vmem:[%s123_s0 + $0x5] sm:$0x1]   ;;  %v65_v2 = vld [vmem:[%s123_s0 + $0x3] sm:$0x1]  }
   0x2   :  { %8 = vrot.lane.b32.xlu0 %v61_v0, %s76_s10  ;;  %20 = vrot.lane.b32.xlu1 %v63_v1, %s77_s11  ;;  %s78_s14 = smov 48   ;;  %v62_v3 = vld [vmem:[%s123_s0 + $0x6] sm:$0x1]   ;;  %v64_v4 = vld [vmem:[%s123_s0 + $0x4] sm:$0x1]   ;;  %s79_s19 = smov 96  }
   0x3   :  { %32 = vrot.lane.b32.xlu2 %v65_v2, %s78_s14  ;;  %s80_s20 = smov 64   ;;  %v66_v5 = vld [vmem:[%s123_s0 + $0x2] sm:$0x1]   ;;  %s43_s23 = smov 3  ;;  %vm28_vm4 = vcmask 654848   ;;  %vm34_vm5 = vcmask 523648  }
   0x4   :  { %s81_s24 = smov 32   ;;  %v67_v6 = vld [vmem:[%s123_s0 + $0x1] ss:$8 sm:%s43_s23]   ;;  %s82_s27 = smov 16   ;;  %vm40_vm6 = vcmask 392448   ;;  %vm47_vm7 = vcmask 261248  }
   0x5   :  { %s2_s28 = smov 3 }
   0x6   :  { %v3_v7 = vld [vmem:[%s123_s0] ss:$8 sm:%s2_s28]  }
   0x7   :  { %5 = vst.msk [vmem:[#allocation0] ss:$8 sm:$0x3] %vm4_vm0, %v3_v7  }
   0xa   :  { %14 = vrot.lane.b32.xlu0 %v62_v3, %s79_s19  ;;  %26 = vrot.lane.b32.xlu1 %v64_v4, %s80_s20 }
   0xb   :  { %38 = vrot.lane.b32.xlu2 %v66_v5, %s81_s24 }
  0x12   :  { %45 = vrot.lane.b32.xlu0 %v67_v6, %s82_s27 }
  0x5d   :  { %v33_v8 = vpop.permute.xlu2 %32  }
  0x65   :  { %v39_v9 = vpop.permute.xlu2 %38  }
  0x74   :  { %v9_v10 = vpop.permute.xlu0 %8   ;;  %v21_v11 = vpop.permute.xlu1 %20  }
  0x75   :  { %11 = vst.msk [vmem:[#allocation0] sm:$0x1] %vm10_vm1, %v9_v10  }
  0x7c   :  { %v15_v12 = vpop.permute.xlu0 %14   ;;  %v27_v13 = vpop.permute.xlu1 %26  }
  0x7d   :  { %17 = vst.msk [vmem:[#allocation0] sm:$0x1] %vm16_vm2, %v15_v12  }
  0x7e   :  { %23 = vst.msk [vmem:[#allocation0] sm:$0x1] %vm22_vm3, %v21_v11  }
  0x7f   :  { %29 = vst.msk [vmem:[#allocation0] sm:$0x1] %vm28_vm4, %v27_v13  }
  0x80   :  { %35 = vst.msk [vmem:[#allocation0] sm:$0x1] %vm34_vm5, %v33_v8  }
  0x81   :  { %41 = vst.msk [vmem:[#allocation0] sm:$0x1] %vm40_vm6, %v39_v9  }
  0x84   :  { %v46_v14 = vpop.permute.xlu0 %45  }
  0x85   :  { %48 = vst.msk [vmem:[#allocation0] ss:$8 sm:$0x3] %vm47_vm7, %v46_v14  }
  0x8c   :  { %v51_v15 = vld [vmem:[#allocation0] sm:$0x1]  ;;  %v56_v16 = vld [vmem:[#allocation0 + $0x8] sm:$0x1] }
  0x8d   :  { %54 = vst [vmem:[%s124_s1] sm:$0x1] %v51_v15 }
  0x8e   :  { %68 = vst [vmem:[%s124_s1 + $0x1] sm:$0x1] %v56_v16 }

// kernel: tile.13
= control target key start
LH: loop header
LB: loop body
LE: loop exit
PB: predicated region body
PF: predicated region fallthrough
CT: control target
= control target key end

     0   :  { %s40_s0 = inlined_call_operand.vmem [shape: f32[6], index: 0, kind: input, shape index: {}]   ;;  %s41_s1 = inlined_call_operand.vmem [shape: f32[28,6], index: 1, kind: output, shape index: {}]  }
   0x1   :  { %v4_v0 = vld [vmem:[%s40_s0] ss:$0 sm:$0xff] }
   0x2   :  { %5 = vst [vmem:[%s41_s1] sm:$0xff] %v4_v0 }
   0x3   :  { %12 = vst [vmem:[%s41_s1 + $0x8] sm:$0xff] %v4_v0 }
   0x4   :  { %13 = vst [vmem:[%s41_s1 + $0x10] sm:$0xff] %v4_v0 }
   0x5   :  { %14 = vst [vmem:[%s41_s1 + $0x18] sm:$0xff] %v4_v0 }

// kernel: tile.14
= control target key start
LH: loop header
LB: loop body
LE: loop exit
PB: predicated region body
PF: predicated region fallthrough
CT: control target
= control target key end

     0   :  { %vm9_vm0 = vcmask 15360   ;;  %s248_s12 = smov 126   ;;  %s249_s13 = smov 114   ;;  %vm3_vm1 = vcmask 48128   ;;  %vm13_vm2 = vcmask 31744   ;;  %vm16_vm3 = vcmask 1048560   ;;  %s378_s0 = inlined_call_operand.vmem [shape: f32[28,6], index: 0, kind: input, shape index: {}]   ;;  %s379_s1 = inlined_call_operand.vmem [shape: f32[1,168], index: 1, kind: output, shape index: {}]  }
   0x1   :  { %v192_v0 = vld [vmem:[%s378_s0 + $0x15] sm:$0x1]   ;;  %v195_v3 = vld [vmem:[%s378_s0 + $0x13] sm:$0x1]   ;;  %v197_v4 = vld [vmem:[%s378_s0 + $0x11] sm:$0x1]  }
   0x2   :  { %v193_v1 = vld [vmem:[%s378_s0 + $0x15] sm:$0x1]   ;;  %26 = vrot.lane.b32.xlu1 %v195_v3, %s249_s13  ;;  %s250_s16 = smov 102   ;;  %v194_v5 = vld [vmem:[%s378_s0 + $0x14] sm:$0x1]   ;;  %s251_s21 = smov 120  }
   0x3   :  { %v10_v2 = vsel %vm9_vm0, %v193_v1, %v192_v0  ;;  %38 = vrot.lane.b32.xlu2 %v197_v4, %s250_s16  ;;  %v196_v6 = vld [vmem:[%s378_s0 + $0x12] sm:$0x1]   ;;  %s252_s22 = smov 108   ;;  %v198_v7 = vld [vmem:[%s378_s0 + $0x10] sm:$0x1]   ;;  %s253_s25 = smov 96  }
   0x4   :  { %11 = vrot.lane.b32.xlu0 %v10_v2, %s248_s12  ;;  %v199_v8 = vld [vmem:[%s378_s0 + $0xf] sm:$0x1]   ;;  %v200_v9 = vld [vmem:[%s378_s0 + $0xe] sm:$0x1]   ;;  %s254_s30 = smov 90   ;;  %s255_s2 = smov 84  }
   0x5   :  { %v201_v10 = vld [vmem:[%s378_s0 + $0xd] sm:$0x1]   ;;  %s256_s5 = smov 78   ;;  %v202_v11 = vld [vmem:[%s378_s0 + $0xc] sm:$0x1]   ;;  %s257_s10 = smov 72  }
   0x6   :  { %v203_v12 = vld [vmem:[%s378_s0 + $0xb] sm:$0x1]   ;;  %s258_s11 = smov 66   ;;  %v204_v13 = vld [vmem:[%s378_s0 + $0xa] sm:$0x1]   ;;  %s259_s14 = smov 60  }
   0x7   :  { %v205_v14 = vld [vmem:[%s378_s0 + $0x9] sm:$0x1]   ;;  %v206_v15 = vld [vmem:[%s378_s0 + $0x8] sm:$0x1]   ;;  %s260_s19 = smov 54   ;;  %s261_s20 = smov 48  }
   0x8   :  { %v207_v16 = vld [vmem:[%s378_s0 + $0x7] sm:$0x1]   ;;  %s262_s23 = smov 42   ;;  %v208_v17 = vld [vmem:[%s378_s0 + $0x6] sm:$0x1]   ;;  %s263_s28 = smov 36  }
   0x9   :  { %v209_v18 = vld [vmem:[%s378_s0 + $0x1b] sm:$0x1]   ;;  %s264_s29 = smov 34   ;;  %v210_v19 = vld [vmem:[%s378_s0 + $0x5] sm:$0x1]   ;;  %s265_s3 = smov 30  }
   0xa   :  { %32 = vrot.lane.b32.xlu1 %v196_v6, %s252_s22  ;;  %v211_v20 = vld [vmem:[%s378_s0 + $0x1a] sm:$0x1]   ;;  %v212_v21 = vld [vmem:[%s378_s0 + $0x4] sm:$0x1]   ;;  %s266_s8 = smov 28   ;;  %s267_s9 = smov 24  }
   0xb   :  { %44 = vrot.lane.b32.xlu2 %v198_v7, %s253_s25  ;;  %v213_v22 = vld [vmem:[%s378_s0 + $0x19] sm:$0x1]   ;;  %s268_s12 = smov 22   ;;  %v214_v23 = vld [vmem:[%s378_s0 + $0x3] sm:$0x1]   ;;  %s269_s17 = smov 18  }
   0xc   :  { %20 = vrot.lane.b32.xlu0 %v194_v5, %s251_s21  ;;  %v215_v24 = vld [vmem:[%s378_s0 + $0x18] sm:$0x1]   ;;  %s270_s18 = smov 16   ;;  %v216_v25 = vld [vmem:[%s378_s0 + $0x2] sm:$0x1]   ;;  %s271_s21 = smov 12  }
   0xd   :  { %v217_v26 = vld [vmem:[%s378_s0 + $0x17] sm:$0x1]   ;;  %v218_v27 = vld [vmem:[%s378_s0 + $0x1] sm:$0x1]   ;;  %s272_s26 = smov 10   ;;  %s273_s27 = smov 6  }
   0xe   :  { %v219_v28 = vld [vmem:[%s378_s0 + $0x16] sm:$0x1]   ;;  %v2_v29 = vld [vmem:[%s378_s0] sm:$0x1]   ;;  %vm22_vm4 = vcmask 1032128   ;;  %vm28_vm5 = vcmask 982928  }
   0xf   :  { %4 = vst.msk [vmem:[#allocation0] sm:$0x1] %vm3_vm1, %v2_v29   ;;  %vm34_vm6 = vcmask 933728   ;;  %vm40_vm7 = vcmask 884528   ;;  %vm46_vm8 = vcmask 835328   ;;  %vm52_vm9 = vcmask 786128  }
  0x10   :  { %vm58_vm10 = vcmask 736928   ;;  %vm64_vm11 = vcmask 687728   ;;  %vm70_vm12 = vcmask 638528   ;;  %vm76_vm13 = vcmask 589328  }
  0x11   :  { %vm82_vm14 = vcmask 540128   ;;  %vm88_vm15 = vcmask 490928   ;;  %vm94_vm0 = vcmask 441728   ;;  %vm100_vm1 = vcmask 392528  }
  0x12   :  { %56 = vrot.lane.b32.xlu1 %v200_v9, %s255_s2 }
  0x13   :  { %62 = vrot.lane.b32.xlu2 %v201_v10, %s256_s5 }
  0x14   :  { %50 = vrot.lane.b32.xlu0 %v199_v8, %s254_s30  ;;  %s274_s30 = smov 4  }
  0x1a   :  { %74 = vrot.lane.b32.xlu1 %v203_v12, %s258_s11 }
  0x1b   :  { %80 = vrot.lane.b32.xlu2 %v204_v13, %s259_s14 }
  0x1c   :  { %68 = vrot.lane.b32.xlu0 %v202_v11, %s257_s10 }
  0x22   :  { %92 = vrot.lane.b32.xlu1 %v206_v15, %s261_s20 }
  0x23   :  { %98 = vrot.lane.b32.xlu2 %v207_v16, %s262_s23 }
  0x24   :  { %86 = vrot.lane.b32.xlu0 %v205_v14, %s260_s19 }
  0x2a   :  { %110 = vrot.lane.b32.xlu1 %v209_v18, %s264_s29 }
  0x2b   :  { %117 = vrot.lane.b32.xlu2 %v210_v19, %s265_s3 }
  0x2c   :  { %104 = vrot.lane.b32.xlu0 %v208_v17, %s263_s28 }
  0x32   :  { %130 = vrot.lane.b32.xlu1 %v212_v21, %s267_s9 }
  0x33   :  { %136 = vrot.lane.b32.xlu2 %v213_v22, %s268_s12 }
  0x34   :  { %123 = vrot.lane.b32.xlu0 %v211_v20, %s266_s8 }
  0x3a   :  { %149 = vrot.lane.b32.xlu1 %v215_v24, %s270_s18 }
  0x3b   :  { %156 = vrot.lane.b32.xlu2 %v216_v25, %s271_s21 }
  0x3c   :  { %143 = vrot.lane.b32.xlu0 %v214_v23, %s269_s17 }
  0x42   :  { %169 = vrot.lane.b32.xlu1 %v218_v27, %s273_s27 }
  0x43   :  { %175 = vrot.lane.b32.xlu2 %v219_v28, %s274_s30 }
  0x44   :  { %162 = vrot.lane.b32.xlu0 %v217_v26, %s272_s26 }
  0x5d   :  { %v39_v30 = vpop.permute.xlu2 %38  }
  0x65   :  { %v45_v31 = vpop.permute.xlu2 %44  }
  0x6d   :  { %v63_v32 = vpop.permute.xlu2 %62  }
  0x74   :  { %v27_v34 = vpop.permute.xlu1 %26  }
  0x75   :  { %v81_v35 = vpop.permute.xlu2 %80  }
  0x76   :  { %v12_v33 = vpop.permute.xlu0 %11  }
  0x77   :  { %15 = vst.msk [vmem:[#allocation0 + $0x8] sm:$0x1] %vm13_vm2, %v12_v33   ;;  %vm106_vm2 = vcmask 343328  }
  0x78   :  { %17 = vst.msk [vmem:[#allocation0] sm:$0x1] %vm16_vm3, %v12_v33   ;;  %vm119_vm3 = vcmask 294128  }
  0x7c   :  { %v33_v37 = vpop.permute.xlu1 %32  }
  0x7d   :  { %v99_v38 = vpop.permute.xlu2 %98  }
  0x7e   :  { %v21_v36 = vpop.permute.xlu0 %20  }
  0x7f   :  { %23 = vst.msk [vmem:[#allocation0] sm:$0x1] %vm22_vm4, %v21_v36   ;;  %vm112_vm4 = vcmask 326928  }
  0x80   :  { %29 = vst.msk [vmem:[#allocation0] sm:$0x1] %vm28_vm5, %v27_v34   ;;  %vm125_vm5 = vcmask 277728  }
  0x81   :  { %35 = vst.msk [vmem:[#allocation0] sm:$0x1] %vm34_vm6, %v33_v37   ;;  %vm138_vm6 = vcmask 228528  }
  0x82   :  { %41 = vst.msk [vmem:[#allocation0] sm:$0x1] %vm40_vm7, %v39_v30   ;;  %vm132_vm7 = vcmask 244928  }
  0x83   :  { %47 = vst.msk [vmem:[#allocation0] sm:$0x1] %vm46_vm8, %v45_v31   ;;  %vm145_vm8 = vcmask 195728  }
  0x84   :  { %v57_v40 = vpop.permute.xlu1 %56  }
  0x85   :  { %v118_v41 = vpop.permute.xlu2 %117  }
  0x86   :  { %v51_v39 = vpop.permute.xlu0 %50  }
  0x87   :  { %53 = vst.msk [vmem:[#allocation0] sm:$0x1] %vm52_vm9, %v51_v39   ;;  %vm158_vm9 = vcmask 146528  }
  0x88   :  { %59 = vst.msk [vmem:[#allocation0] sm:$0x1] %vm58_vm10, %v57_v40   ;;  %vm151_vm10 = vcmask 179328  }
  0x89   :  { %65 = vst.msk [vmem:[#allocation0] sm:$0x1] %vm64_vm11, %v63_v32   ;;  %vm164_vm11 = vcmask 130128  }
  0x8c   :  { %v75_v43 = vpop.permute.xlu1 %74  }
  0x8d   :  { %v137_v44 = vpop.permute.xlu2 %136  }
  0x8e   :  { %v69_v42 = vpop.permute.xlu0 %68  }
  0x8f   :  { %71 = vst.msk [vmem:[#allocation0] sm:$0x1] %vm70_vm12, %v69_v42   ;;  %vm177_vm12 = vcmask 80928  }
  0x90   :  { %77 = vst.msk [vmem:[#allocation0] sm:$0x1] %vm76_vm13, %v75_v43   ;;  %vm171_vm13 = vcmask 97328  }
  0x91   :  { %83 = vst.msk [vmem:[#allocation0] sm:$0x1] %vm82_vm14, %v81_v35  }
  0x94   :  { %v93_v46 = vpop.permute.xlu1 %92  }
  0x95   :  { %v157_v47 = vpop.permute.xlu2 %156  }
  0x96   :  { %v87_v45 = vpop.permute.xlu0 %86  }
  0x97   :  { %89 = vst.msk [vmem:[#allocation0] sm:$0x1] %vm88_vm15, %v87_v45  }
  0x98   :  { %95 = vst.msk [vmem:[#allocation0] sm:$0x1] %vm94_vm0, %v93_v46  }
  0x99   :  { %101 = vst.msk [vmem:[#allocation0] sm:$0x1] %vm100_vm1, %v99_v38  }
  0x9c   :  { %v111_v49 = vpop.permute.xlu1 %110  }
  0x9d   :  { %114 = vst.msk [vmem:[#allocation0 + $0x8] sm:$0x1] %vm112_vm4, %v111_v49   ;;  %v176_v50 = vpop.permute.xlu2 %175  }
  0x9e   :  { %v105_v48 = vpop.permute.xlu0 %104  }
  0x9f   :  { %107 = vst.msk [vmem:[#allocation0] sm:$0x1] %vm106_vm2, %v105_v48  }
  0xa0   :  { %120 = vst.msk [vmem:[#allocation0] sm:$0x1] %vm119_vm3, %v118_v41  }
  0xa4   :  { %v131_v52 = vpop.permute.xlu1 %130  }
  0xa5   :  { %133 = vst.msk [vmem:[#allocation0] sm:$0x1] %vm132_vm7, %v131_v52  }
  0xa6   :  { %v124_v51 = vpop.permute.xlu0 %123  }
  0xa7   :  { %127 = vst.msk [vmem:[#allocation0 + $0x8] sm:$0x1] %vm125_vm5, %v124_v51  }
  0xa8   :  { %140 = vst.msk [vmem:[#allocation0 + $0x8] sm:$0x1] %vm138_vm6, %v137_v44  }
  0xac   :  { %v150_v54 = vpop.permute.xlu1 %149  }
  0xad   :  { %153 = vst.msk [vmem:[#allocation0 + $0x8] sm:$0x1] %vm151_vm10, %v150_v54  }
  0xae   :  { %v144_v53 = vpop.permute.xlu0 %143  }
  0xaf   :  { %146 = vst.msk [vmem:[#allocation0] sm:$0x1] %vm145_vm8, %v144_v53  }
  0xb0   :  { %159 = vst.msk [vmem:[#allocation0] sm:$0x1] %vm158_vm9, %v157_v47  }
  0xb4   :  { %v170_v56 = vpop.permute.xlu1 %169  }
  0xb5   :  { %172 = vst.msk [vmem:[#allocation0] sm:$0x1] %vm171_vm13, %v170_v56  }
  0xb6   :  { %v163_v55 = vpop.permute.xlu0 %162  }
  0xb7   :  { %166 = vst.msk [vmem:[#allocation0 + $0x8] sm:$0x1] %vm164_vm11, %v163_v55  }
  0xb8   :  { %179 = vst.msk [vmem:[#allocation0 + $0x8] sm:$0x1] %vm177_vm12, %v176_v50  }
  0xbc   :  { %v182_v58 = vld [vmem:[#allocation0] sm:$0x1] }
  0xbd   :  { %185 = vst [vmem:[%s379_s1] sm:$0x1] %v182_v58 }
  0xbf   :  { %v187_v57 = vld [vmem:[#allocation0 + $0x8] sm:$0x1] }
  0xc0   :  { %220 = vst [vmem:[%s379_s1 + $0x1] sm:$0x1] %v187_v57 }

// kernel: convnet_forward.1
= control target key start
LH: loop header
LB: loop body
LE: loop exit
PB: predicated region body
PF: predicated region fallthrough
CT: control target
= control target key end

     0   :  { %vm140_vm0 = vcmask 785408   ;;  %vm279_vm1 = vcmask 1046528   ;;  %s6298_s0 = inlined_call_operand.vmem [shape: bf16[1,64,96], index: 0, kind: input, shape index: {}]   ;;  %s6299_s1 = inlined_call_operand.vmem [shape: bf16[5,96,168], index: 1, kind: input, shape index: {}]   ;;  %s6300_s2 = inlined_call_operand.vmem [shape: f32[1,168], index: 2, kind: input, shape index: {}]   ;;  %s6301_s3 = inlined_call_operand.vmem [shape: bf16[5,84,160], index: 3, kind: input, shape index: {}]   ;;  %s6302_s4 = inlined_call_operand.vmem [shape: f32[1,160], index: 4, kind: input, shape index: {}]   ;;  %s6303_s5 = inlined_call_operand.vmem [shape: bf16[162,84], index: 5, kind: input, shape index: {}]   ;;  %s6304_s6 = inlined_call_operand.vmem [shape: bf16[5,144,120], index: 6, kind: input, shape index: {}]   ;;  %s6305_s7 = inlined_call_operand.vmem [shape: f32[1,120], index: 7, kind: input, shape index: {}]   ;;  %s6306_s8 = inlined_call_operand.vmem [shape: bf16[120,84], index: 8, kind: input, shape index: {}]   ;;  %s6307_s9 = inlined_call_operand.vmem [shape: f32[1,84], index: 9, kind: input, shape index: {}]   ;;  %s6308_s10 = inlined_call_operand.vmem [shape: bf16[84,128], index: 10, kind: input, shape index: {}]   ;;  %s6309_s11 = inlined_call_operand.vmem [shape: f32[1,128], index: 11, kind: input, shape index: {}]   ;;  %s6310_s12 = inlined_call_operand.hbm [shape: f32[1,2,128], index: 12, kind: output, shape index: {}]  }
   0x1   :  { %v3395_v0 = vld [vmem:[%s6299_s1 + $0x50] sm:$0xf]  ;;  %v4413_v1 = vld [vmem:[%s6299_s1 + $0x54] sm:$0xf0]  ;;  %v4412_v2 = vld [vmem:[%s6299_s1 + $0x54] sm:$0xf] }
   0x2   :  { %v3396_v3 = vor.u32 %v4413_v1, %v3395_v0  ;;  %v3397_v4 = vld [vmem:[%s6299_s1 + $0x58] sm:$0xf0]  ;;  %v3479_v5 = vld [vmem:[%s6299_s1 + $0xb0] sm:$0xf]  ;;  %v4429_v6 = vld [vmem:[%s6299_s1 + $0xb4] sm:$0xf0] }
   0x3   :  { %v3400_v7 = vor.u32 %v4412_v2, %v3397_v4  ;;  %v3480_v8 = vor.u32 %v4429_v6, %v3479_v5  ;;  %v4428_v9 = vld [vmem:[%s6299_s1 + $0xb4] sm:$0xf]  ;;  %v3481_v10 = vld [vmem:[%s6299_s1 + $0xb8] sm:$0xf0]  ;;  %v3387_v11 = vld [vmem:[%s6299_s1 + $0x40] sm:$0xf] }
   0x4   :  { %155 = vmatpush.bf16.msra.mxu0 %v3396_v3  ;;  %v3484_v12 = vor.u32 %v4428_v9, %v3481_v10  ;;  %v4411_v13 = vld [vmem:[%s6299_s1 + $0x44] sm:$0xf0]  ;;  %v4410_v14 = vld [vmem:[%s6299_s1 + $0x44] sm:$0xf]  ;;  %v3389_v15 = vld [vmem:[%s6299_s1 + $0x48] sm:$0xf0] }
   0x5   :  { %183 = vmatpush.bf16.msra.mxu1 %v3400_v7  ;;  %361 = vmatpush.bf16.msra.mxu2 %v3480_v8  ;;  %v3388_v16 = vor.u32 %v4411_v13, %v3387_v11  ;;  %v3392_v17 = vor.u32 %v4410_v14, %v3389_v15  ;;  %v3471_v18 = vld [vmem:[%s6299_s1 + $0xa0] sm:$0xf]  ;;  %v4427_v19 = vld [vmem:[%s6299_s1 + $0xa4] sm:$0xf0]  ;;  %v4426_v20 = vld [vmem:[%s6299_s1 + $0xa4] sm:$0xf] }
   0x6   :  { %389 = vmatpush.bf16.msra.mxu3 %v3484_v12  ;;  %v3472_v21 = vor.u32 %v4427_v19, %v3471_v18  ;;  %v3473_v22 = vld [vmem:[%s6299_s1 + $0xa8] sm:$0xf0]  ;;  %v3379_v23 = vld [vmem:[%s6299_s1 + $0x30] sm:$0xf]  ;;  %v4409_v24 = vld [vmem:[%s6299_s1 + $0x34] sm:$0xf0] }
   0x7   :  { %v3476_v25 = vor.u32 %v4426_v20, %v3473_v22  ;;  %v4408_v26 = vld [vmem:[%s6299_s1 + $0x34] sm:$0xf]  ;;  %v3381_v27 = vld [vmem:[%s6299_s1 + $0x38] sm:$0xf0]  ;;  %v3463_v28 = vld [vmem:[%s6299_s1 + $0x90] sm:$0xf]  ;;  %v3380_v29 = vor.u32 %v4409_v24, %v3379_v23 }
   0x8   :  { %156 = vmatpush.bf16.msra.mxu0 %v3388_v16  ;;  %v4425_v30 = vld [vmem:[%s6299_s1 + $0x94] sm:$0xf0]  ;;  %v4424_v31 = vld [vmem:[%s6299_s1 + $0x94] sm:$0xf]  ;;  %v3465_v32 = vld [vmem:[%s6299_s1 + $0x98] sm:$0xf0]  ;;  %v3384_v33 = vor.u32 %v4408_v26, %v3381_v27 }
   0x9   :  { %184 = vmatpush.bf16.msra.mxu1 %v3392_v17  ;;  %362 = vmatpush.bf16.msra.mxu2 %v3472_v21  ;;  %v3464_v34 = vor.u32 %v4425_v30, %v3463_v28  ;;  %v3371_v35 = vld [vmem:[%s6299_s1 + $0x20] sm:$0xf]  ;;  %v4407_v36 = vld [vmem:[%s6299_s1 + $0x24] sm:$0xf0]  ;;  %v4406_v37 = vld [vmem:[%s6299_s1 + $0x24] sm:$0xf]  ;;  %v3468_v38 = vor.u32 %v4424_v31, %v3465_v32 }
   0xa   :  { %390 = vmatpush.bf16.msra.mxu3 %v3476_v25  ;;  %v3373_v39 = vld [vmem:[%s6299_s1 + $0x28] sm:$0xf0]  ;;  %v3455_v40 = vld [vmem:[%s6299_s1 + $0x80] sm:$0xf]  ;;  %v4423_v41 = vld [vmem:[%s6299_s1 + $0x84] sm:$0xf0]  ;;  %v3372_v44 = vor.u32 %v4407_v36, %v3371_v35 }
   0xb   :  { %v4422_v42 = vld [vmem:[%s6299_s1 + $0x84] sm:$0xf]  ;;  %v3457_v43 = vld [vmem:[%s6299_s1 + $0x88] sm:$0xf0]  ;;  %v3376_v45 = vor.u32 %v4406_v37, %v3373_v39  ;;  %v3456_v46 = vor.u32 %v4423_v41, %v3455_v40  ;;  %v3363_v47 = vld [vmem:[%s6299_s1 + $0x10] sm:$0xf] }
   0xc   :  { %157 = vmatpush.bf16.msra.mxu0 %v3380_v29  ;;  %v4405_v48 = vld [vmem:[%s6299_s1 + $0x14] sm:$0xf0]  ;;  %v4404_v49 = vld [vmem:[%s6299_s1 + $0x14] sm:$0xf]  ;;  %v3460_v50 = vor.u32 %v4422_v42, %v3457_v43  ;;  %v3365_v51 = vld [vmem:[%s6299_s1 + $0x18] sm:$0xf0] }
   0xd   :  { %185 = vmatpush.bf16.msra.mxu1 %v3384_v33  ;;  %363 = vmatpush.bf16.msra.mxu2 %v3464_v34  ;;  %v3447_v52 = vld [vmem:[%s6299_s1 + $0x70] sm:$0xf]  ;;  %v4421_v53 = vld [vmem:[%s6299_s1 + $0x74] sm:$0xf0]  ;;  %v4420_v54 = vld [vmem:[%s6299_s1 + $0x74] sm:$0xf]  ;;  %v3364_v57 = vor.u32 %v4405_v48, %v3363_v47  ;;  %v3368_v61 = vor.u32 %v4404_v49, %v3365_v51 }
   0xe   :  { %391 = vmatpush.bf16.msra.mxu3 %v3468_v38  ;;  %v3449_v55 = vld [vmem:[%s6299_s1 + $0x78] sm:$0xf0]  ;;  %v3355_v56 = vld [vmem:[%s6299_s1] sm:$0xf]  ;;  %v4403_v58 = vld [vmem:[%s6299_s1 + $0x4] sm:$0xf0]  ;;  %v3448_v62 = vor.u32 %v4421_v53, %v3447_v52 }
   0xf   :  { %v4402_v59 = vld [vmem:[%s6299_s1 + $0x4] sm:$0xf]  ;;  %v3357_v60 = vld [vmem:[%s6299_s1 + $0x8] sm:$0xf0]  ;;  %v3439_v63 = vld [vmem:[%s6299_s1 + $0x60] sm:$0xf]  ;;  %v3452_v2 = vor.u32 %v4420_v54, %v3449_v55  ;;  %v3356_v9 = vor.u32 %v4403_v58, %v3355_v56 }
  0x10   :  { %158 = vmatpush.bf16.msra.mxu0 %v3372_v44  ;;  %v4419_v0 = vld [vmem:[%s6299_s1 + $0x64] sm:$0xf0]  ;;  %v4418_v1 = vld [vmem:[%s6299_s1 + $0x64] sm:$0xf]  ;;  %v3441_v3 = vld [vmem:[%s6299_s1 + $0x68] sm:$0xf0]  ;;  %v3360_v13 = vor.u32 %v4402_v59, %v3357_v60 }
  0x11   :  { %186 = vmatpush.bf16.msra.mxu1 %v3376_v45  ;;  %364 = vmatpush.bf16.msra.mxu2 %v3456_v46  ;;  %v3563_v4 = vld [vmem:[%s6299_s1 + $0x110] sm:$0xf]  ;;  %v3423_v5 = vld [vmem:[%s6298_s0] sm:$0xe]  ;;  %v4445_v6 = vld [vmem:[%s6299_s1 + $0x114] sm:$0xf0]  ;;  %v3440_v14 = vor.u32 %v4419_v0, %v3439_v63  ;;  %v3444_v15 = vor.u32 %v4418_v1, %v3441_v3 }
  0x12   :  { %392 = vmatpush.bf16.msra.mxu3 %v3460_v50  ;;  %v4414_v7 = vld [vmem:[%s6298_s0] sm:$0xf0]  ;;  %v4958_v8 = vld [vmem:[%s6298_s0 + $0x8] sm:$0xff]  ;;  %v4444_v10 = vld [vmem:[%s6299_s1 + $0x114] sm:$0xf]  ;;  %v3564_v18 = vor.u32 %v4445_v6, %v3563_v4 }
  0x13   :  { %v3565_v11 = vld [vmem:[%s6299_s1 + $0x118] sm:$0xf0]  ;;  %v3424_v12 = vor.u32 %v4414_v7, %v3423_v5  ;;  %v281_v16 = vrot.slane %v4958_v8, 1  ;;  %v4399_v17 = vld [vmem:[%s6298_s0] sm:$0xff]  ;;  %v4443_v22 = vld [vmem:[%s6299_s1 + $0x104] sm:$0xf0] }
  0x14   :  { %159 = vmatpush.bf16.msra.mxu0 %v3364_v57  ;;  %v3568_v20 = vor.u32 %v4444_v10, %v3565_v11  ;;  %v3555_v21 = vld [vmem:[%s6299_s1 + $0x100] sm:$0xf]  ;;  %v4442_v23 = vld [vmem:[%s6299_s1 + $0x104] sm:$0xf]  ;;  %v3557_v24 = vld [vmem:[%s6299_s1 + $0x108] sm:$0xf0] }
  0x15   :  { %187 = vmatpush.bf16.msra.mxu1 %v3368_v61  ;;  %365 = vmatpush.bf16.msra.mxu2 %v3448_v62  ;;  %v280_v19 = vrot.slane %v3424_v12, 1 }
  0x16   :  { %393 = vmatpush.bf16.msra.mxu3 %v3452_v2 }
  0x17   :  { %v282_v25 = vsel %vm279_vm1, %v280_v19, %v281_v16 }
  0x18   :  { %160 = vmatpush.bf16.msra.mxu0 %v3356_v9 }
  0x19   :  { %188 = vmatpush.bf16.msra.mxu1 %v3360_v13  ;;  %366 = vmatpush.bf16.msra.mxu2 %v3440_v14 }
  0x1a   :  { %17 = vsyncpa [#allocation8], 0  ;;  %394 = vmatpush.bf16.msra.mxu3 %v3444_v15  ;;  %v3556_v26 = vor.u32 %v4443_v22, %v3555_v21  ;;  %v3560_v27 = vor.u32 %v4442_v23, %v3557_v24  ;;  %v3547_v28 = vld [vmem:[%s6299_s1 + $0xf0] sm:$0xf]  ;;  %v4441_v29 = vld [vmem:[%s6299_s1 + $0xf4] sm:$0xf0] }
  0x1b   :  { %3401 = vmatmul.msk.bf16.vlgmr.msra.gmra.mxu0 %vm140_vm0, %v4399_v17  ;;  %v4440_v30 = vld [vmem:[%s6299_s1 + $0xf4] sm:$0xf]  ;;  %v3549_v31 = vld [vmem:[%s6299_s1 + $0xf8] sm:$0xf0]  ;;  %v3548_v32 = vor.u32 %v4441_v29, %v3547_v28  ;;  %v3539_v33 = vld [vmem:[%s6299_s1 + $0xe0] sm:$0xf] }
  0x1c   :  { %580 = vmatpush.bf16.msrb.mxu0 %v3564_v18  ;;  %3405 = vmatmul.msk.bf16.vlgmr.msra.gmra.mxu1 %vm140_vm0, %v4399_v17  ;;  %v4439_v34 = vld [vmem:[%s6299_s1 + $0xe4] sm:$0xf0]  ;;  %v3647_v35 = vld [vmem:[%s6299_s1 + $0x170] sm:$0xf]  ;;  %v3552_v36 = vor.u32 %v4440_v30, %v3549_v31  ;;  %v4461_v37 = vld [vmem:[%s6299_s1 + $0x174] sm:$0xf0] }
  0x1d   :  { %608 = vmatpush.bf16.msrb.mxu1 %v3568_v20  ;;  %3485 = vmatmul.msk.bf16.vlgmr.msra.gmra.mxu2 %vm140_vm0, %v282_v25  ;;  %v4460_v38 = vld [vmem:[%s6299_s1 + $0x174] sm:$0xf]  ;;  %v3649_v39 = vld [vmem:[%s6299_s1 + $0x178] sm:$0xf0]  ;;  %v4438_v40 = vld [vmem:[%s6299_s1 + $0xe4] sm:$0xf]  ;;  %v3648_v42 = vor.u32 %v4461_v37, %v3647_v35  ;;  %v3540_v45 = vor.u32 %v4439_v34, %v3539_v33 }
  0x1e   :  { %3489 = vmatmul.msk.bf16.vlgmr.msra.gmra.mxu3 %vm140_vm0, %v282_v25  ;;  %v3541_v41 = vld [vmem:[%s6299_s1 + $0xe8] sm:$0xf0]  ;;  %v3652_v43 = vor.u32 %v4460_v38, %v3649_v39  ;;  %v5028_v44 = vld [vmem:[%s6298_s0 + $0x10] sm:$0xff]  ;;  %v4437_v48 = vld [vmem:[%s6299_s1 + $0xd4] sm:$0xf0]  ;;  %vm498_vm2 = vcmask 1045504  }
  0x1f   :  { %799 = vmatpush.bf16.msrb.mxu2 %v3648_v42  ;;  %v3544_v46 = vor.u32 %v4438_v40, %v3541_v41  ;;  %v3531_v47 = vld [vmem:[%s6299_s1 + $0xd0] sm:$0xf]  ;;  %v4436_v49 = vld [vmem:[%s6299_s1 + $0xd4] sm:$0xf]  ;;  %v3533_v50 = vld [vmem:[%s6299_s1 + $0xd8] sm:$0xf0] }
  0x20   :  { %581 = vmatpush.bf16.msrb.mxu0 %v3556_v26  ;;  %827 = vmatpush.bf16.msrb.mxu3 %v3652_v43  ;;  %v283_v51 = vrot.slane %v5028_v44, 1  ;;  %v3532_v52 = vor.u32 %v4437_v48, %v3531_v47  ;;  %v3639_v53 = vld [vmem:[%s6299_s1 + $0x160] sm:$0xf]  ;;  %v4459_v54 = vld [vmem:[%s6299_s1 + $0x164] sm:$0xf0]  ;;  %v3536_v56 = vor.u32 %v4436_v49, %v3533_v50  ;;  %v4401_v28 = vld [vmem:[%s6298_s0 + $0x10] sm:$0xff] }
  0x21   :  { %609 = vmatpush.bf16.msrb.mxu1 %v3560_v27  ;;  %v4400_v55 = vld [vmem:[%s6298_s0 + $0x8] sm:$0xff]  ;;  %v3640_v57 = vor.u32 %v4459_v54, %v3639_v53  ;;  %v4458_v59 = vld [vmem:[%s6299_s1 + $0x164] sm:$0xf]  ;;  %v3631_v61 = vld [vmem:[%s6299_s1 + $0x150] sm:$0xf]  ;;  %vm717_vm3 = vcmask 1044480  }
  0x22   :  { %v284_v58 = vsel %vm279_vm1, %v281_v16, %v283_v51  ;;  %v3641_v60 = vld [vmem:[%s6299_s1 + $0x168] sm:$0xf0]  ;;  %v4457_v63 = vld [vmem:[%s6299_s1 + $0x154] sm:$0xf0]  ;;  %v4417_v1 = vld [vmem:[%s6298_s0 + $0x18] sm:$0x10] }
  0x23   :  { %800 = vmatpush.bf16.msrb.mxu2 %v3640_v57  ;;  %v3644_v62 = vor.u32 %v4458_v59, %v3641_v60  ;;  %v3435_v0 = vld [vmem:[%s6298_s0 + $0x18] sm:$0xf]  ;;  %v3632_v2 = vor.u32 %v4457_v63, %v3631_v61  ;;  %v4456_v3 = vld [vmem:[%s6299_s1 + $0x154] sm:$0xf]  ;;  %v3633_v4 = vld [vmem:[%s6299_s1 + $0x158] sm:$0xf0] }
  0x24   :  { %582 = vmatpush.bf16.msrb.mxu0 %v3548_v32  ;;  %v3523_v5 = vld [vmem:[%s6299_s1 + $0xc0] sm:$0xf]  ;;  %v3636_v6 = vor.u32 %v4456_v3, %v3633_v4  ;;  %v4435_v7 = vld [vmem:[%s6299_s1 + $0xc4] sm:$0xf0]  ;;  %v4434_v8 = vld [vmem:[%s6299_s1 + $0xc4] sm:$0xf]  ;;  %v3436_v19 = vor.u32 %v4417_v1, %v3435_v0 }
  0x25   :  { %610 = vmatpush.bf16.msrb.mxu1 %v3552_v36  ;;  %828 = vmatpush.bf16.msrb.mxu3 %v3644_v62  ;;  %v3525_v9 = vld [vmem:[%s6299_s1 + $0xc8] sm:$0xf0]  ;;  %v3524_v10 = vor.u32 %v4435_v7, %v3523_v5  ;;  %v3623_v12 = vld [vmem:[%s6299_s1 + $0x140] sm:$0xf]  ;;  %v4455_v13 = vld [vmem:[%s6299_s1 + $0x144] sm:$0xf0] }
  0x26   :  { %v3528_v11 = vor.u32 %v4434_v8, %v3525_v9  ;;  %v4454_v14 = vld [vmem:[%s6299_s1 + $0x144] sm:$0xf]  ;;  %v3624_v15 = vor.u32 %v4455_v13, %v3623_v12  ;;  %v3625_v16 = vld [vmem:[%s6299_s1 + $0x148] sm:$0xf0]  ;;  %v3615_v17 = vld [vmem:[%s6299_s1 + $0x130] sm:$0xf] }
  0x27   :  { %801 = vmatpush.bf16.msrb.mxu2 %v3632_v2  ;;  %v4453_v18 = vld [vmem:[%s6299_s1 + $0x134] sm:$0xf0]  ;;  %v3628_v20 = vor.u32 %v4454_v14, %v3625_v16  ;;  %v4452_v22 = vld [vmem:[%s6299_s1 + $0x134] sm:$0xf]  ;;  %v3617_v23 = vld [vmem:[%s6299_s1 + $0x138] sm:$0xf0] }
  0x28   :  { %583 = vmatpush.bf16.msrb.mxu0 %v3540_v45  ;;  %v3616_v21 = vor.u32 %v4453_v18, %v3615_v17  ;;  %v285_v24 = vrot.slane %v3436_v19, 1  ;;  %v3620_v25 = vor.u32 %v4452_v22, %v3617_v23  ;;  %v3607_v26 = vld [vmem:[%s6299_s1 + $0x120] sm:$0xf]  ;;  %v4451_v27 = vld [vmem:[%s6299_s1 + $0x124] sm:$0xf0]  ;;  %v5166_v45 = vld [vmem:[%s6298_s0 + $0x18] sm:$0xff]  }
  0x29   :  { %611 = vmatpush.bf16.msrb.mxu1 %v3544_v46  ;;  %829 = vmatpush.bf16.msrb.mxu3 %v3636_v6  ;;  %v3608_v29 = vor.u32 %v4451_v27, %v3607_v26  ;;  %v4450_v31 = vld [vmem:[%s6299_s1 + $0x124] sm:$0xf]  ;;  %v3609_v32 = vld [vmem:[%s6299_s1 + $0x128] sm:$0xf0]  ;;  %v3727_v34 = vld [vmem:[%s6299_s1 + $0x1d0] sm:$0xf]  ;;  %v75_v47 = vunpack.c.l.b16 %v5166_v45 }
  0x2a   :  { %v286_v30 = vsel %vm279_vm1, %v283_v51, %v285_v24  ;;  %v3612_v33 = vor.u32 %v4450_v31, %v3609_v32  ;;  %v4476_v35 = vld [vmem:[%s6299_s1 + $0x1d4] sm:$0xf0]  ;;  %v4475_v36 = vld [vmem:[%s6299_s1 + $0x1d4] sm:$0xf]  ;;  %v3729_v38 = vld [vmem:[%s6299_s1 + $0x1d8] sm:$0xf0] }
  0x2b   :  { %3402 = vmatmul.msk.bf16.gmra.mxu0 %vm140_vm0, %v4400_v55  ;;  %802 = vmatpush.bf16.msrb.mxu2 %v3624_v15  ;;  %v3728_v37 = vor.u32 %v4476_v35, %v3727_v34  ;;  %v3719_v39 = vld [vmem:[%s6299_s1 + $0x1c0] sm:$0xf]  ;;  %v4474_v40 = vld [vmem:[%s6299_s1 + $0x1c4] sm:$0xf0]  ;;  %v3732_v41 = vor.u32 %v4475_v36, %v3729_v38  ;;  %v4473_v42 = vld [vmem:[%s6299_s1 + $0x1c4] sm:$0xf]  ;;  %v79_v48 = vpack.c.b16 %v75_v47, %v75_v47 }
  0x2c   :  { %584 = vmatpush.bf16.msrb.mxu0 %v3532_v52  ;;  %3406 = vmatmul.msk.bf16.gmra.mxu1 %vm140_vm0, %v4400_v55  ;;  %v3721_v43 = vld [vmem:[%s6299_s1 + $0x1c8] sm:$0xf0]  ;;  %v3720_v44 = vor.u32 %v4474_v40, %v3719_v39  ;;  %v3507_v49 = vld [vmem:[%s6298_s0] sm:$0xc]  ;;  %v4430_v50 = vld [vmem:[%s6298_s0] sm:$0xf0] }
  0x2d   :  { %612 = vmatpush.bf16.msrb.mxu1 %v3536_v56  ;;  %3486 = vmatmul.msk.bf16.gmra.mxu2 %vm140_vm0, %v284_v58  ;;  %v3724_v46 = vor.u32 %v4473_v42, %v3721_v43  ;;  %v3711_v51 = vld [vmem:[%s6299_s1 + $0x1b0] sm:$0xf]  ;;  %v4472_v52 = vld [vmem:[%s6299_s1 + $0x1b4] sm:$0xf0]  ;;  %v4471_v53 = vld [vmem:[%s6299_s1 + $0x1b4] sm:$0xf]  ;;  %v3508_v60 = vor.u32 %v4430_v50, %v3507_v49 }
  0x2e   :  { %3490 = vmatmul.msk.bf16.gmra.mxu3 %vm140_vm0, %v284_v58  ;;  %v3591_v54 = vld [vmem:[%s6298_s0] sm:$0x8]  ;;  %v4446_v55 = vld [vmem:[%s6298_s0] sm:$0xf0]  ;;  %v3712_v56 = vor.u32 %v4472_v52, %v3711_v51  ;;  %v3713_v57 = vld [vmem:[%s6299_s1 + $0x1b8] sm:$0xf0] }
  0x2f   :  { %830 = vmatpush.bf16.msrb.mxu3 %v3628_v20  ;;  %803 = vmatpush.bf16.msrb.mxu2 %v3616_v21  ;;  %v3716_v58 = vor.u32 %v4471_v53, %v3713_v57  ;;  %v4431_v59 = vld [vmem:[%s6298_s0 + $0x8] sm:$0xff]  ;;  %v3592_v62 = vor.u32 %v4446_v55, %v3591_v54  ;;  %v499_v63 = vrot.slane %v3508_v60, 2  ;;  %v3703_v5 = vld [vmem:[%s6299_s1 + $0x1a0] sm:$0xf]  ;;  %v4469_v7 = vld [vmem:[%s6299_s1 + $0x1a4] sm:$0xf] }
  0x30   :  { %585 = vmatpush.bf16.msrb.mxu0 %v3524_v10  ;;  %v4447_v61 = vld [vmem:[%s6298_s0 + $0x8] sm:$0xff]  ;;  %v500_v0 = vrot.slane %v4431_v59, 2  ;;  %v3695_v10 = vld [vmem:[%s6299_s1 + $0x190] sm:$0xf]  ;;  %v4467_v13 = vld [vmem:[%s6299_s1 + $0x194] sm:$0xf] }
  0x31   :  { %613 = vmatpush.bf16.msrb.mxu1 %v3528_v11  ;;  %v718_v1 = vrot.slane %v3592_v62, 3  ;;  %v719_v2 = vrot.slane %v4447_v61, 3  ;;  %v4470_v6 = vld [vmem:[%s6299_s1 + $0x1a4] sm:$0xf0]  ;;  %v3705_v9 = vld [vmem:[%s6299_s1 + $0x1a8] sm:$0xf0] }
  0x32   :  { %v501_v3 = vsel %vm498_vm2, %v499_v63, %v500_v0  ;;  %v3704_v8 = vor.u32 %v4470_v6, %v3703_v5  ;;  %v4468_v11 = vld [vmem:[%s6299_s1 + $0x194] sm:$0xf0]  ;;  %v3708_v12 = vor.u32 %v4469_v7, %v3705_v9  ;;  %v3697_v14 = vld [vmem:[%s6299_s1 + $0x198] sm:$0xf0]  ;;  %v4432_v16 = vld [vmem:[%s6298_s0 + $0x10] sm:$0xff]  ;;  %vm210_vm4 = vcmask 326656  }
  0x33   :  { %831 = vmatpush.bf16.msrb.mxu3 %v3620_v25  ;;  %804 = vmatpush.bf16.msrb.mxu2 %v3608_v29  ;;  %v720_v4 = vsel %vm717_vm3, %v718_v1, %v719_v2  ;;  %v3696_v15 = vor.u32 %v4468_v11, %v3695_v10  ;;  %v3700_v17 = vor.u32 %v4467_v13, %v3697_v14  ;;  %v4448_v18 = vld [vmem:[%s6298_s0 + $0x10] sm:$0xff]  ;;  %v502_v19 = vrot.slane %v4432_v16, 2  ;;  %v3519_v23 = vld [vmem:[%s6298_s0 + $0x18] sm:$0xf]  ;;  %v3687_v25 = vld [vmem:[%s6299_s1 + $0x180] sm:$0xf] }
  0x34   :  { %1007 = vmatpush.bf16.msra.mxu0 %v3728_v37  ;;  %v721_v20 = vrot.slane %v4448_v18, 3  ;;  %v4466_v26 = vld [vmem:[%s6299_s1 + $0x184] sm:$0xf0]  ;;  %v4465_v27 = vld [vmem:[%s6299_s1 + $0x184] sm:$0xf]  ;;  %v4463_v51 = vld [vmem:[%s6298_s0 + $0xc] sm:$0xff]  ;;  %v928_v14 = vunpack.c.h.b16 %v5166_v45 }
  0x35   :  { %1035 = vmatpush.bf16.msra.mxu1 %v3732_v41  ;;  %v503_v21 = vsel %vm498_vm2, %v500_v0, %v502_v19  ;;  %v4449_v29 = vld [vmem:[%s6298_s0 + $0x18] sm:$0x70]  ;;  %v3689_v31 = vld [vmem:[%s6299_s1 + $0x188] sm:$0xf0]  ;;  %v4462_v39 = vld [vmem:[%s6298_s0 + $0x4] sm:$0xff]  ;;  %vm1176_vm5 = vcmask 1040384  }
  0x36   :  { %v722_v22 = vsel %vm717_vm3, %v719_v2, %v721_v20  ;;  %v3692_v32 = vor.u32 %v4465_v27, %v3689_v31  ;;  %v4464_v1 = vld [vmem:[%s6298_s0 + $0x14] sm:$0xff]  ;;  %v932_v16 = vpack.c.b16 %v928_v14, %v928_v14  ;;  %vm1169_vm6 = vcmask 998400   ;;  %s4733_s17 = smov [#allocation7]   ;;  %s3332_s20 = sshll.u32 %s6310_s12, 4  ;;  %s3333_s20 = int_to_ptr.hbm [resolvable:$true] %s3332_s20 }
  0x37   :  { %832 = vmatpush.bf16.msrb.mxu3 %v3612_v33  ;;  %vm1208_vm7 = vcmask 1041409   ;;  %vm1209_vm8 = vcmask 275461   ;;  %vm1239_vm9 = vcmask 1042434   ;;  %vm1240_vm10 = vcmask 276486   ;;  %s3330_s18 = sshll.u32 %s4733_s17, 4  ;;  %s3331_s18 = int_to_ptr.vmem [resolvable:$true] %s3330_s18 }
  0x38   :  { %1008 = vmatpush.bf16.msra.mxu0 %v3720_v44  ;;  %vm5571_vm11 = vmor %vm1209_vm8, %vm1208_vm7  ;;  %vm1270_vm13 = vcmask 1043459   ;;  %vm1271_vm14 = vcmask 277511   ;;  %vm1654_vm8 = vcmask 277504  }
  0x39   :  { %1036 = vmatpush.bf16.msra.mxu1 %v3724_v46  ;;  %vm5576_vm12 = vmor %vm1240_vm10, %vm1239_vm9  ;;  %vm1796_vm10 = vcmask 1041408  }
  0x3a   :  { %vm5595_vm15 = vmor %vm1271_vm14, %vm1270_vm13  ;;  %vm2521_vm14 = vcmask 128005  }
  0x3b   :  { %3403 = vmatmul.msk.bf16.gmra.mxu0 %vm140_vm0, %v4401_v28 }
  0x3c   :  { %3407 = vmatmul.msk.bf16.gmra.mxu1 %vm140_vm0, %v4401_v28  ;;  %1009 = vmatpush.bf16.msra.mxu0 %v3712_v56  ;;  %v3603_v28 = vld [vmem:[%s6298_s0 + $0x18] sm:$0xf] }
  0x3d   :  { %3487 = vmatmul.msk.bf16.gmra.mxu2 %vm140_vm0, %v286_v30  ;;  %1037 = vmatpush.bf16.msra.mxu1 %v3716_v58  ;;  %v3604_v34 = vor.u32 %v4449_v29, %v3603_v28 }
  0x3e   :  { %3491 = vmatmul.msk.bf16.gmra.mxu3 %vm140_vm0, %v286_v30  ;;  %v3688_v30 = vor.u32 %v4466_v26, %v3687_v25 }
  0x3f   :  { %v723_v36 = vrot.slane %v3604_v34, 3 }
  0x40   :  { %1010 = vmatpush.bf16.msra.mxu0 %v3704_v8 }
  0x41   :  { %1038 = vmatpush.bf16.msra.mxu1 %v3708_v12  ;;  %v724_v38 = vsel %vm717_vm3, %v721_v20, %v723_v36 }
  0x44   :  { %1011 = vmatpush.bf16.msra.mxu0 %v3696_v15 }
  0x45   :  { %1039 = vmatpush.bf16.msra.mxu1 %v3700_v17 }
  0x48   :  { %1012 = vmatpush.bf16.msra.mxu0 %v3688_v30 }
  0x49   :  { %1040 = vmatpush.bf16.msra.mxu1 %v3692_v32 }
  0x4b   :  { %3404 = vmatmul.msk.bf16.gmra.mxu0 %vm140_vm0, %v79_v48 }
  0x4c   :  { %3408 = vmatmul.msk.bf16.gmra.mxu1 %vm140_vm0, %v79_v48 }
  0x4d   :  { %3488 = vmatmul.msk.bf16.gmra.mxu2 %vm140_vm0, %v285_v24 }
  0x4e   :  { %3492 = vmatmul.msk.bf16.gmra.mxu3 %vm140_vm0, %v285_v24  ;;  %v4433_v24 = vld [vmem:[%s6298_s0 + $0x18] sm:$0x30]  ;;  %s4732_s0 = smov 112  }
  0x4f   :  { %v3520_v33 = vor.u32 %v4433_v24, %v3519_v23 }
  0x51   :  { %v504_v35 = vrot.slane %v3520_v33, 2 }
  0x53   :  { %v505_v37 = vsel %vm498_vm2, %v502_v19, %v504_v35 }
  0x5b   :  { %3569 = vmatmul.msk.bf16.vlgmr.msrb.gmra.mxu0 %vm140_vm0, %v501_v3 }
  0x5c   :  { %3573 = vmatmul.msk.bf16.vlgmr.msrb.gmra.mxu1 %vm140_vm0, %v501_v3 }
  0x5d   :  { %3653 = vmatmul.msk.bf16.vlgmr.msrb.gmra.mxu2 %vm140_vm0, %v720_v4 }
  0x5e   :  { %3657 = vmatmul.msk.bf16.vlgmr.msrb.gmra.mxu3 %vm140_vm0, %v720_v4 }
  0x6b   :  { %3570 = vmatmul.msk.bf16.gmra.mxu0 %vm140_vm0, %v503_v21 }
  0x6c   :  { %3574 = vmatmul.msk.bf16.gmra.mxu1 %vm140_vm0, %v503_v21 }
  0x6d   :  { %3654 = vmatmul.msk.bf16.gmra.mxu2 %vm140_vm0, %v722_v22 }
  0x6e   :  { %3658 = vmatmul.msk.bf16.gmra.mxu3 %vm140_vm0, %v722_v22 }
  0x7b   :  { %3571 = vmatmul.msk.bf16.gmra.mxu0 %vm140_vm0, %v505_v37 }
  0x7c   :  { %3575 = vmatmul.msk.bf16.gmra.mxu1 %vm140_vm0, %v505_v37 }
  0x7d   :  { %3655 = vmatmul.msk.bf16.gmra.mxu2 %vm140_vm0, %v724_v38 }
  0x7e   :  { %3659 = vmatmul.msk.bf16.gmra.mxu3 %vm140_vm0, %v724_v38 }
  0x8b   :  { %3572 = vmatmul.msk.bf16.gmra.mxu0 %vm140_vm0, %v504_v35 }
  0x8c   :  { %3576 = vmatmul.msk.bf16.gmra.mxu1 %vm140_vm0, %v504_v35 }
  0x8d   :  { %3656 = vmatmul.msk.bf16.gmra.mxu2 %vm140_vm0, %v723_v36 }
  0x8e   :  { %3660 = vmatmul.msk.bf16.gmra.mxu3 %vm140_vm0, %v723_v36 }
  0x98   :  { %v162_v40 = vpop.f32.mrf.mxu0 }
  0x99   :  { %v190_v41 = vpop.f32.mrf.mxu1 }
  0x9a   :  { %211 = vst.msk [vmem:[#allocation2 + $0x8] sm:$0xff] %vm210_vm4, %v190_v41 }
  0x9b   :  { %3733 = vmatmul.msk.bf16.vlgmr.msra.gmra.mxu0 %vm140_vm0, %v4462_v39 }
  0x9c   :  { %3737 = vmatmul.msk.bf16.vlgmr.msra.gmra.mxu1 %vm140_vm0, %v4462_v39 }
  0xa0   :  { %v368_v42 = vpop.f32.mrf.mxu2  ;;  %v5285_v43 = vpop.f32.mrf.mxu0 }
  0xa1   :  { %v5287_v44 = vadd.f32 %v368_v42, %v162_v40  ;;  %v396_v46 = vpop.f32.mrf.mxu3  ;;  %v192_v47 = vpop.f32.mrf.mxu1  ;;  %v225_v48 = vld [vmem:[#allocation2 + $0x8] sm:$0xff] }
  0xa2   :  { %213 = vst.msk [vmem:[#allocation2 + $0x18] sm:$0xff] %vm210_vm4, %v192_v47  ;;  %v416_v49 = vadd.f32 %v396_v46, %v225_v48 }
  0xa4   :  { %430 = vst.msk [vmem:[#allocation2 + $0x8] sm:$0xff] %vm210_vm4, %v416_v49 }
  0xa8   :  { %v5291_v50 = vpop.f32.mrf.mxu2  ;;  %v167_v52 = vpop.f32.mrf.mxu0 }
  0xa9   :  { %v398_v53 = vpop.f32.mrf.mxu3  ;;  %v195_v54 = vpop.f32.mrf.mxu1  ;;  %v227_v55 = vld [vmem:[#allocation2 + $0x18] sm:$0xff] }
  0xaa   :  { %215 = vst.msk [vmem:[#allocation2 + $0x28] sm:$0xff] %vm210_vm4, %v195_v54  ;;  %v418_v56 = vadd.f32 %v398_v53, %v227_v55 }
  0xab   :  { %3734 = vmatmul.msk.bf16.gmra.mxu0 %vm140_vm0, %v4463_v51  ;;  %v444_v31 = vld [vmem:[#allocation2 + $0x8] sm:$0xff] }
  0xac   :  { %432 = vst.msk [vmem:[#allocation2 + $0x18] sm:$0xff] %vm210_vm4, %v418_v56  ;;  %3738 = vmatmul.msk.bf16.gmra.mxu1 %vm140_vm0, %v4463_v51 }
  0xb0   :  { %v373_v57 = vpop.f32.mrf.mxu2  ;;  %v5300_v58 = vpop.f32.mrf.mxu0 }
  0xb1   :  { %v5302_v59 = vadd.f32 %v373_v57, %v167_v52  ;;  %v401_v60 = vpop.f32.mrf.mxu3  ;;  %v197_v61 = vpop.f32.mrf.mxu1  ;;  %v229_v62 = vld [vmem:[#allocation2 + $0x28] sm:$0xff] }
  0xb2   :  { %217 = vst.msk [vmem:[#allocation2 + $0x38] sm:$0xff] %vm210_vm4, %v197_v61  ;;  %v420_v63 = vadd.f32 %v401_v60, %v229_v62 }
  0xb3   :  { %v446_v37 = vld [vmem:[#allocation2 + $0x18] sm:$0xff] }
  0xb4   :  { %434 = vst.msk [vmem:[#allocation2 + $0x28] sm:$0xff] %vm210_vm4, %v420_v63 }
  0xb8   :  { %v5306_v0 = vpop.f32.mrf.mxu2  ;;  %v172_v2 = vpop.f32.mrf.mxu0 }
  0xb9   :  { %v403_v3 = vpop.f32.mrf.mxu3  ;;  %v200_v4 = vpop.f32.mrf.mxu1  ;;  %v231_v5 = vld [vmem:[#allocation2 + $0x38] sm:$0xff] }
  0xba   :  { %219 = vst.msk [vmem:[#allocation2 + $0x48] sm:$0xff] %vm210_vm4, %v200_v4  ;;  %v422_v6 = vadd.f32 %v403_v3, %v231_v5 }
  0xbb   :  { %3735 = vmatmul.msk.bf16.gmra.mxu0 %vm140_vm0, %v4464_v1  ;;  %v448_v48 = vld [vmem:[#allocation2 + $0x28] sm:$0xff] }
  0xbc   :  { %436 = vst.msk [vmem:[#allocation2 + $0x38] sm:$0xff] %vm210_vm4, %v422_v6  ;;  %3739 = vmatmul.msk.bf16.gmra.mxu1 %vm140_vm0, %v4464_v1 }
  0xc0   :  { %v378_v7 = vpop.f32.mrf.mxu2  ;;  %v5315_v8 = vpop.f32.mrf.mxu0 }
  0xc1   :  { %v5317_v9 = vadd.f32 %v378_v7, %v172_v2  ;;  %v406_v10 = vpop.f32.mrf.mxu3  ;;  %v202_v11 = vpop.f32.mrf.mxu1  ;;  %v233_v12 = vld [vmem:[#allocation2 + $0x48] sm:$0xff] }
  0xc2   :  { %221 = vst.msk [vmem:[#allocation2 + $0x58] sm:$0xff] %vm210_vm4, %v202_v11  ;;  %v424_v13 = vadd.f32 %v406_v10, %v233_v12 }
  0xc3   :  { %v450_v57 = vld [vmem:[#allocation2 + $0x38] sm:$0xff] }
  0xc4   :  { %438 = vst.msk [vmem:[#allocation2 + $0x48] sm:$0xff] %vm210_vm4, %v424_v13 }
  0xc8   :  { %v5322_v15 = vpop.f32.mrf.mxu2  ;;  %v177_v17 = vpop.f32.mrf.mxu0 }
  0xc9   :  { %v408_v18 = vpop.f32.mrf.mxu3  ;;  %v205_v19 = vpop.f32.mrf.mxu1  ;;  %v235_v20 = vld [vmem:[#allocation2 + $0x58] sm:$0xff] }
  0xca   :  { %223 = vst.msk [vmem:[#allocation2 + $0x68] sm:$0xff] %vm210_vm4, %v205_v19  ;;  %v426_v21 = vadd.f32 %v408_v18, %v235_v20 }
  0xcb   :  { %3736 = vmatmul.msk.bf16.gmra.mxu0 %vm140_vm0, %v932_v16  ;;  %v452_v4 = vld [vmem:[#allocation2 + $0x48] sm:$0xff] }
  0xcc   :  { %440 = vst.msk [vmem:[#allocation2 + $0x58] sm:$0xff] %vm210_vm4, %v426_v21  ;;  %3740 = vmatmul.msk.bf16.gmra.mxu1 %vm140_vm0, %v932_v16  ;;  %vm1177_vm0 = vcmask 274436  }
  0xd0   :  { %v383_v22 = vpop.f32.mrf.mxu2  ;;  %v179_v45 = vpop.f32.mrf.mxu0 }
  0xd1   :  { %v5328_v23 = vadd.f32 %v383_v22, %v177_v17  ;;  %v411_v24 = vpop.f32.mrf.mxu3  ;;  %v207_v25 = vpop.f32.mrf.mxu1  ;;  %v237_v26 = vld [vmem:[#allocation2 + $0x68] sm:$0xff] }
  0xd2   :  { %v428_v27 = vadd.f32 %v411_v24, %v237_v26 }
  0xd3   :  { %v454_v14 = vld [vmem:[#allocation2 + $0x58] sm:$0xff] }
  0xd4   :  { %442 = vst.msk [vmem:[#allocation2 + $0x68] sm:$0xff] %vm210_vm4, %v428_v27 }
  0xd8   :  { %v385_v28 = vpop.f32.mrf.mxu2  ;;  %v5331_v29 = vpop.f32.mrf.mxu0 }
  0xd9   :  { %v413_v30 = vpop.f32.mrf.mxu3  ;;  %v615_v32 = vpop.f32.mrf.mxu1 }
  0xda   :  { %v635_v33 = vadd.f32 %v615_v32, %v444_v31 }
  0xdb   :  { %v456_v45 = vld [vmem:[#allocation2 + $0x68] sm:$0xff] }
  0xdc   :  { %649 = vst.msk [vmem:[#allocation2 + $0x8] sm:$0xff] %vm210_vm4, %v635_v33 }
  0xe0   :  { %v5334_v34 = vpop.f32.mrf.mxu2  ;;  %v5336_v35 = vpop.f32.mrf.mxu0 }
  0xe1   :  { %v834_v36 = vpop.f32.mrf.mxu3  ;;  %v617_v38 = vpop.f32.mrf.mxu1 }
  0xe2   :  { %v637_v39 = vadd.f32 %v617_v38, %v446_v37  ;;  %v1103_v37 = vld [vmem:[%s6300_s2] sm:$0x3]  ;;  %v634_v38 = vadd.f32 %v5331_v29, %v5287_v44  ;;  %s4731_s2 = smov 122  }
  0xe3   :  { %v663_v40 = vld [vmem:[#allocation2 + $0x8] sm:$0xff] }
  0xe4   :  { %651 = vst.msk [vmem:[#allocation2 + $0x18] sm:$0xff] %vm210_vm4, %v637_v39  ;;  %v854_v41 = vadd.f32 %v834_v36, %v663_v40  ;;  %v853_v39 = vadd.f32 %v5334_v34, %v634_v38  ;;  %v5379_v40 = vperm.slane %v1103_v37, 0 }
  0xe6   :  { %868 = vst.msk [vmem:[#allocation2 + $0x8] sm:$0xff] %vm210_vm4, %v854_v41 }
  0xe8   :  { %v5340_v42 = vpop.f32.mrf.mxu2  ;;  %v5342_v46 = vpop.f32.mrf.mxu0 }
  0xe9   :  { %v836_v47 = vpop.f32.mrf.mxu3  ;;  %v620_v49 = vpop.f32.mrf.mxu1 }
  0xea   :  { %v639_v51 = vadd.f32 %v620_v49, %v448_v48 }
  0xeb   :  { %v665_v52 = vld [vmem:[#allocation2 + $0x18] sm:$0xff] }
  0xec   :  { %653 = vst.msk [vmem:[#allocation2 + $0x28] sm:$0xff] %vm210_vm4, %v639_v51  ;;  %v856_v53 = vadd.f32 %v836_v47, %v665_v52 }
  0xed   :  { %v882_v51 = vld [vmem:[#allocation2 + $0x8] sm:$0xff] }
  0xee   :  { %870 = vst.msk [vmem:[#allocation2 + $0x18] sm:$0xff] %vm210_vm4, %v856_v53 }
  0xf0   :  { %v5346_v54 = vpop.f32.mrf.mxu2  ;;  %v5348_v55 = vpop.f32.mrf.mxu0 }
  0xf1   :  { %v839_v56 = vpop.f32.mrf.mxu3  ;;  %v622_v60 = vpop.f32.mrf.mxu1 }
  0xf2   :  { %v641_v61 = vadd.f32 %v622_v60, %v450_v57  ;;  %v5387_v60 = vperm.slane %v1103_v37, 1 }
  0xf3   :  { %v667_v62 = vld [vmem:[#allocation2 + $0x28] sm:$0xff] }
  0xf4   :  { %655 = vst.msk [vmem:[#allocation2 + $0x38] sm:$0xff] %vm210_vm4, %v641_v61  ;;  %v858_v63 = vadd.f32 %v839_v56, %v667_v62  ;;  %v417_v56 = vadd.f32 %v5291_v50, %v5285_v43 }
  0xf6   :  { %872 = vst.msk [vmem:[#allocation2 + $0x28] sm:$0xff] %vm210_vm4, %v858_v63  ;;  %v636_v44 = vadd.f32 %v5336_v35, %v417_v56  ;;  %v884_v63 = vld [vmem:[#allocation2 + $0x18] sm:$0xff]  ;;  %v638_v35 = vadd.f32 %v5342_v46, %v5302_v59 }
  0xf8   :  { %v5352_v1 = vpop.f32.mrf.mxu2  ;;  %v5354_v2 = vpop.f32.mrf.mxu0  ;;  %v855_v34 = vadd.f32 %v5340_v42, %v636_v44 }
  0xf9   :  { %v841_v3 = vpop.f32.mrf.mxu3  ;;  %v625_v5 = vpop.f32.mrf.mxu1 }
  0xfa   :  { %v643_v6 = vadd.f32 %v625_v5, %v452_v4 }
  0xfb   :  { %v669_v7 = vld [vmem:[#allocation2 + $0x38] sm:$0xff] }
  0xfc   :  { %657 = vst.msk [vmem:[#allocation2 + $0x48] sm:$0xff] %vm210_vm4, %v643_v6  ;;  %v860_v10 = vadd.f32 %v841_v3, %v669_v7  ;;  %v857_v7 = vadd.f32 %v5346_v54, %v638_v35 }
  0xfe   :  { %874 = vst.msk [vmem:[#allocation2 + $0x38] sm:$0xff] %vm210_vm4, %v860_v10 }
 0x100   :  { %v5358_v11 = vpop.f32.mrf.mxu2  ;;  %v5360_v12 = vpop.f32.mrf.mxu0 }
 0x101   :  { %v844_v13 = vpop.f32.mrf.mxu3  ;;  %v627_v16 = vpop.f32.mrf.mxu1 }
 0x102   :  { %v645_v17 = vadd.f32 %v627_v16, %v454_v14  ;;  %v886_v14 = vld [vmem:[#allocation2 + $0x28] sm:$0xff] }
 0x103   :  { %v671_v18 = vld [vmem:[#allocation2 + $0x48] sm:$0xff] }
 0x104   :  { %659 = vst.msk [vmem:[#allocation2 + $0x58] sm:$0xff] %vm210_vm4, %v645_v17  ;;  %v862_v19 = vadd.f32 %v844_v13, %v671_v18  ;;  %v421_v18 = vadd.f32 %v5306_v0, %v5300_v58 }
 0x106   :  { %876 = vst.msk [vmem:[#allocation2 + $0x48] sm:$0xff] %vm210_vm4, %v862_v19  ;;  %v640_v46 = vadd.f32 %v5348_v55, %v421_v18 }
 0x108   :  { %v5364_v20 = vpop.f32.mrf.mxu2  ;;  %v5366_v21 = vpop.f32.mrf.mxu0 }
 0x109   :  { %v846_v22 = vpop.f32.mrf.mxu3  ;;  %v630_v24 = vpop.f32.mrf.mxu1 }
 0x10a   :  { %v647_v25 = vadd.f32 %v630_v24, %v456_v45 }
 0x10b   :  { %v673_v26 = vld [vmem:[#allocation2 + $0x58] sm:$0xff] }
 0x10c   :  { %661 = vst.msk [vmem:[#allocation2 + $0x68] sm:$0xff] %vm210_vm4, %v647_v25  ;;  %v864_v27 = vadd.f32 %v846_v22, %v673_v26  ;;  %v859_v26 = vadd.f32 %v5352_v1, %v640_v46 }
 0x10e   :  { %878 = vst.msk [vmem:[#allocation2 + $0x58] sm:$0xff] %vm210_vm4, %v864_v27 }
 0x110   :  { %v5370_v28 = vpop.f32.mrf.mxu2  ;;  %v604_v30 = vpop.f32.mrf.mxu0 }
 0x111   :  { %v849_v31 = vpop.f32.mrf.mxu3  ;;  %v632_v32 = vpop.f32.mrf.mxu1 }
 0x113   :  { %v675_v33 = vld [vmem:[#allocation2 + $0x68] sm:$0xff] }
 0x114   :  { %v866_v36 = vadd.f32 %v849_v31, %v675_v33  ;;  %v888_v31 = vld [vmem:[#allocation2 + $0x38] sm:$0xff] }
 0x116   :  { %880 = vst.msk [vmem:[#allocation2 + $0x68] sm:$0xff] %vm210_vm4, %v866_v36 }
 0x118   :  { %v823_v41 = vpop.f32.mrf.mxu2  ;;  %v1014_v47 = vpop.f32.mrf.mxu0 }
 0x119   :  { %v851_v48 = vpop.f32.mrf.mxu3  ;;  %v1061_v49 = vadd.f32 %v1014_v47, %v853_v39  ;;  %v1042_v52 = vpop.f32.mrf.mxu1 }
 0x11a   :  { %v1062_v53 = vadd.f32 %v1042_v52, %v882_v51  ;;  %v642_v51 = vadd.f32 %v5354_v2, %v5317_v9 }
 0x11b   :  { %v1109_v57 = vadd.f32 %v5379_v40, %v1061_v49 }
 0x11c   :  { %1076 = vst.msk [vmem:[#allocation2 + $0x8] sm:$0xff] %vm210_vm4, %v1062_v53 }
 0x11d   :  { %v1123_v29 = vmax.f32 %v1109_v57, 0.0  ;;  %v861_v57 = vadd.f32 %v5358_v11, %v642_v51 }
 0x11f   :  { %1137 = vst [vmem:[#allocation2] sm:$0xff] %v1123_v29 }
 0x120   :  { %v1016_v61 = vpop.f32.mrf.mxu0 }
 0x121   :  { %v1063_v62 = vadd.f32 %v1016_v61, %v855_v34  ;;  %v1044_v3 = vpop.f32.mrf.mxu1 }
 0x122   :  { %v1064_v4 = vadd.f32 %v1044_v3, %v884_v63  ;;  %v890_v3 = vld [vmem:[#allocation2 + $0x48] sm:$0xff] }
 0x123   :  { %v1090_v5 = vld [vmem:[#allocation2 + $0x8] sm:$0xff]  ;;  %v1111_v43 = vadd.f32 %v5379_v40, %v1063_v62 }
 0x124   :  { %v1110_v50 = vadd.f32 %v5387_v60, %v1090_v5  ;;  %1078 = vst.msk [vmem:[#allocation2 + $0x18] sm:$0xff] %vm210_vm4, %v1064_v4 }
 0x125   :  { %v1125_v6 = vmax.f32 %v1111_v43, 0.0 }
 0x126   :  { %v1124_v42 = vmax.f32 %v1110_v50, 0.0  ;;  %v1182_v45 = vld [vmem:[#allocation2] sm:$0xc0]  ;;  %v1180_v33 = vld [vmem:[#allocation2] sm:$0x30] }
 0x127   :  { %1139 = vst [vmem:[#allocation2 + $0x10] sm:$0xff] %v1125_v6  ;;  %v1186_v25 = vrot.slane %v1182_v45, 2 }
 0x128   :  { %1138 = vst.msk [vmem:[#allocation2 + $0x8] sm:$0xff] %vm210_vm4, %v1124_v42  ;;  %v1019_v10 = vpop.f32.mrf.mxu0 }
 0x129   :  { %v1065_v13 = vadd.f32 %v1019_v10, %v857_v7  ;;  %v1047_v16 = vpop.f32.mrf.mxu1  ;;  %v5404_v38 = vmax.f32 %v1180_v33, %v1186_v25  ;;  %v425_v7 = vadd.f32 %v5322_v15, %v5315_v8 }
 0x12a   :  { %v1066_v17 = vadd.f32 %v1047_v16, %v886_v14 }
 0x12b   :  { %v1092_v19 = vld [vmem:[#allocation2 + $0x18] sm:$0xff]  ;;  %v1113_v22 = vadd.f32 %v5379_v40, %v1065_v13  ;;  %v644_v45 = vadd.f32 %v5360_v12, %v425_v7 }
 0x12c   :  { %v1112_v59 = vadd.f32 %v5387_v60, %v1092_v19  ;;  %1080 = vst.msk [vmem:[#allocation2 + $0x28] sm:$0xff] %vm210_vm4, %v1066_v17  ;;  %v892_v12 = vld [vmem:[#allocation2 + $0x58] sm:$0xff] }
 0x12d   :  { %v1127_v54 = vmax.f32 %v1113_v22, 0.0  ;;  %v1153_v22 = vld [vmem:[#allocation2] sm:$0xc] }
 0x12e   :  { %v1126_v24 = vmax.f32 %v1112_v59, 0.0  ;;  %v1245_v1 = vld [vmem:[#allocation2 + $0x10] sm:$0xc0]  ;;  %v1214_v49 = vld [vmem:[#allocation2 + $0x10] sm:$0xc]  ;;  %v1157_v25 = vrot.slane %v1153_v22, 2 }
 0x12f   :  { %1141 = vst [vmem:[#allocation2 + $0x20] sm:$0xff] %v1127_v54  ;;  %v1183_v27 = vld [vmem:[#allocation2 + $0x8] sm:$0xc0]  ;;  %v1181_v36 = vld [vmem:[#allocation2 + $0x8] sm:$0x30]  ;;  %v1249_v56 = vrot.slane %v1245_v1, 2 }
 0x130   :  { %1140 = vst.msk [vmem:[#allocation2 + $0x18] sm:$0xff] %vm210_vm4, %v1126_v24  ;;  %v1021_v58 = vpop.f32.mrf.mxu0  ;;  %v1187_v0 = vrot.slane %v1183_v27, 2  ;;  %v1218_v29 = vrot.slane %v1214_v49, 2  ;;  %v1243_v9 = vld [vmem:[#allocation2 + $0x10] sm:$0x30]  ;;  %v863_v24 = vadd.f32 %v5364_v20, %v644_v45 }
 0x131   :  { %v1067_v30 = vadd.f32 %v1021_v58, %v859_v26  ;;  %v1049_v32 = vpop.f32.mrf.mxu1  ;;  %v5418_v50 = vmax.f32 %v1243_v9, %v1249_v56  ;;  %v1212_v11 = vld [vmem:[#allocation2 + $0x10] sm:$0x3]  ;;  %v1154_v42 = vld [vmem:[#allocation2 + $0x8] sm:$0xc]  ;;  %v1152_v58 = vld [vmem:[#allocation2 + $0x8] sm:$0x3] }
 0x132   :  { %v1068_v37 = vadd.f32 %v1049_v32, %v888_v31  ;;  %v5406_v55 = vmax.f32 %v1181_v36, %v1187_v0  ;;  %v5425_v14 = vmax.f32 %v1212_v11, %v1218_v29  ;;  %v1158_v15 = vrot.slane %v1154_v42, 2  ;;  %v1151_v20 = vld [vmem:[#allocation2] sm:$0x3]  ;;  %v1572_v22 = vld [vmem:[%s6303_s5 + $0x50] sm:$0x1] }
 0x133   :  { %v1094_v39 = vld [vmem:[#allocation2 + $0x28] sm:$0xff]  ;;  %v1115_v41 = vadd.f32 %v5379_v40, %v1067_v30  ;;  %v5447_v49 = vmax.f32 %v1151_v20, %v1157_v25 }
 0x134   :  { %v1114_v47 = vadd.f32 %v5387_v60, %v1094_v39  ;;  %1082 = vst.msk [vmem:[#allocation2 + $0x38] sm:$0xff] %vm210_vm4, %v1068_v37  ;;  %v4607_v48 = vpack.i.bf16 %v5406_v55, %v5404_v38  ;;  %v5440_v32 = vmax.f32 %v1152_v58, %v1158_v15  ;;  %v1632_v15 = vunpack.c.l.b16 %v1572_v22 }
 0x135   :  { %v1129_v52 = vmax.f32 %v1115_v41, 0.0 }
 0x136   :  { %v1128_v53 = vmax.f32 %v1114_v47, 0.0  ;;  %4608 = vrot.lane.b32.xlu0 %v4607_v48, %s4731_s2  ;;  %v1301_v17 = vld [vmem:[#allocation2 + $0x20] sm:$0xc0]  ;;  %v1299_v33 = vld [vmem:[#allocation2 + $0x20] sm:$0x30] }
 0x137   :  { %1143 = vst [vmem:[#allocation2 + $0x30] sm:$0xff] %v1129_v52  ;;  %v1246_v44 = vld [vmem:[#allocation2 + $0x18] sm:$0xc0]  ;;  %v1215_v62 = vld [vmem:[#allocation2 + $0x18] sm:$0xc]  ;;  %v1305_v54 = vrot.slane %v1301_v17, 2 }
 0x138   :  { %1142 = vst.msk [vmem:[#allocation2 + $0x28] sm:$0xff] %vm210_vm4, %v1128_v53  ;;  %v1024_v34 = vpop.f32.mrf.mxu0  ;;  %v1250_v61 = vrot.slane %v1246_v44, 2  ;;  %v1244_v2 = vld [vmem:[#allocation2 + $0x18] sm:$0x30]  ;;  %v1219_v5 = vrot.slane %v1215_v62, 2  ;;  %v646_v44 = vadd.f32 %v5366_v21, %v5328_v23 }
 0x139   :  { %v1069_v63 = vadd.f32 %v1024_v34, %v861_v57  ;;  %v1052_v4 = vpop.f32.mrf.mxu1  ;;  %v1213_v6 = vld [vmem:[#allocation2 + $0x18] sm:$0x3]  ;;  %v5442_v41 = vmax.f32 %v1299_v33, %v1305_v54  ;;  %v1276_v51 = vld [vmem:[#allocation2 + $0x20] sm:$0xc]  ;;  %v4637_v34 = vpack.i.bf16 %v5440_v32, %v5447_v49  ;;  %v1274_v21 = vld [vmem:[#allocation2 + $0x20] sm:$0x3] }
 0x13a   :  { %v1070_v43 = vadd.f32 %v1052_v4, %v890_v3  ;;  %v5420_v35 = vmax.f32 %v1244_v2, %v1250_v61  ;;  %v5427_v16 = vmax.f32 %v1213_v6, %v1219_v5  ;;  %v1280_v62 = vrot.slane %v1276_v51, 2  ;;  %v894_v4 = vld [vmem:[#allocation2 + $0x68] sm:$0xff] }
 0x13b   :  { %v1096_v10 = vld [vmem:[#allocation2 + $0x38] sm:$0xff]  ;;  %v1117_v13 = vadd.f32 %v5379_v40, %v1069_v63  ;;  %v865_v3 = vadd.f32 %v5370_v28, %v646_v44 }
 0x13c   :  { %v1116_v18 = vadd.f32 %v5387_v60, %v1096_v10  ;;  %1084 = vst.msk [vmem:[#allocation2 + $0x48] sm:$0xff] %vm210_vm4, %v1070_v43  ;;  %v4617_v19 = vpack.i.bf16 %v5420_v35, %v5418_v50  ;;  %v4612_v8 = vpack.i.bf16 %v5427_v16, %v5425_v14  ;;  %v4488_v28 = vld [vmem:[%s6303_s5 + $0x38] sm:$0xff]  ;;  %v5466_v17 = vmax.f32 %v1274_v21, %v1280_v62 }
 0x13d   :  { %v1131_v59 = vmax.f32 %v1117_v13, 0.0  ;;  %1664 = vmatpush.bf16.msra.mxu2 %v4488_v28 }
 0x13e   :  { %v1130_v46 = vmax.f32 %v1116_v18, 0.0  ;;  %4618 = vrot.lane.b32.xlu1 %v4617_v19, %s4731_s2  ;;  %4613 = vrot.lane.b32.xlu0 %v4612_v8, %s4731_s2  ;;  %v1330_v52 = vld [vmem:[#allocation2 + $0x30] sm:$0xc]  ;;  %v1328_v43 = vld [vmem:[#allocation2 + $0x30] sm:$0x3] }
 0x13f   :  { %1145 = vst [vmem:[#allocation2 + $0x40] sm:$0xff] %v1131_v59  ;;  %v1302_v26 = vld [vmem:[#allocation2 + $0x28] sm:$0xc0]  ;;  %v1300_v36 = vld [vmem:[#allocation2 + $0x28] sm:$0x30]  ;;  %v1334_v63 = vrot.slane %v1330_v52, 2 }
 0x140   :  { %1144 = vst.msk [vmem:[#allocation2 + $0x38] sm:$0xff] %vm210_vm4, %v1130_v46  ;;  %v1026_v27 = vpop.f32.mrf.mxu0  ;;  %v1306_v0 = vrot.slane %v1302_v26, 2  ;;  %v1277_v37 = vld [vmem:[#allocation2 + $0x28] sm:$0xc]  ;;  %v1275_v9 = vld [vmem:[#allocation2 + $0x28] sm:$0x3] }
 0x141   :  { %v1071_v30 = vadd.f32 %v1026_v27, %v863_v24  ;;  %v1054_v31 = vpop.f32.mrf.mxu1  ;;  %v1281_v57 = vrot.slane %v1277_v37, 2  ;;  %v5468_v18 = vmax.f32 %v1328_v43, %v1334_v63  ;;  %v1358_v8 = vld [vmem:[#allocation2 + $0x30] sm:$0xc0]  ;;  %v1356_v37 = vld [vmem:[#allocation2 + $0x30] sm:$0x30] }
 0x142   :  { %v1072_v39 = vadd.f32 %v1054_v31, %v892_v12  ;;  %v5444_v1 = vmax.f32 %v1300_v36, %v1306_v0  ;;  %v4487_v46 = vld [vmem:[%s6303_s5 + $0x30] sm:$0xff]  ;;  %v1362_v58 = vrot.slane %v1358_v8, 2 }
 0x143   :  { %v1098_v47 = vld [vmem:[#allocation2 + $0x48] sm:$0xff]  ;;  %v1119_v48 = vadd.f32 %v5379_v40, %v1071_v30  ;;  %v5461_v5 = vmax.f32 %v1275_v9, %v1281_v57  ;;  %1665 = vmatpush.bf16.msra.mxu2 %v4487_v46 }
 0x144   :  { %v1118_v53 = vadd.f32 %v5387_v60, %v1098_v47  ;;  %1086 = vst.msk [vmem:[#allocation2 + $0x58] sm:$0xff] %vm210_vm4, %v1072_v39  ;;  %v4622_v56 = vpack.i.bf16 %v5444_v1, %v5442_v41  ;;  %v4486_v30 = vld [vmem:[%s6303_s5 + $0x28] sm:$0xff]  ;;  %v5494_v47 = vmax.f32 %v1356_v37, %v1362_v58 }
 0x145   :  { %v1133_v29 = vmax.f32 %v1119_v48, 0.0  ;;  %v4642_v24 = vpack.i.bf16 %v5461_v5, %v5466_v17 }
 0x146   :  { %v1132_v61 = vmax.f32 %v1118_v53, 0.0  ;;  %4623 = vrot.lane.b32.xlu1 %v4622_v56, %s4731_s2  ;;  %4638 = vrot.lane.b32.xlu0 %v4637_v34, %s4731_s2  ;;  %v1411_v51 = vld [vmem:[#allocation2 + $0x40] sm:$0xc0] }
 0x147   :  { %1147 = vst [vmem:[#allocation2 + $0x50] sm:$0xff] %v1133_v29  ;;  %v1331_v2 = vld [vmem:[#allocation2 + $0x38] sm:$0xc]  ;;  %v1329_v7 = vld [vmem:[#allocation2 + $0x38] sm:$0x3]  ;;  %1666 = vmatpush.bf16.msra.mxu2 %v4486_v30  ;;  %v1415_v34 = vrot.slane %v1411_v51, 2 }
 0x148   :  { %1146 = vst.msk [vmem:[#allocation2 + $0x48] sm:$0xff] %vm210_vm4, %v1132_v61  ;;  %v1029_v23 = vpop.f32.mrf.mxu0  ;;  %v1335_v11 = vrot.slane %v1331_v2, 2  ;;  %v1359_v10 = vld [vmem:[#allocation2 + $0x38] sm:$0xc0]  ;;  %v1357_v0 = vld [vmem:[#allocation2 + $0x38] sm:$0x30] }
 0x149   :  { %v1073_v6 = vadd.f32 %v1029_v23, %v865_v3  ;;  %v1057_v42 = vpop.f32.mrf.mxu1  ;;  %v1363_v26 = vrot.slane %v1359_v10, 2 }
 0x14a   :  { %v1074_v13 = vadd.f32 %v1057_v42, %v894_v4  ;;  %v5470_v19 = vmax.f32 %v1329_v7, %v1335_v11  ;;  %v1409_v4 = vld [vmem:[#allocation2 + $0x40] sm:$0x30] }
 0x14b   :  { %v1100_v45 = vld [vmem:[#allocation2 + $0x58] sm:$0xff]  ;;  %v1121_v59 = vadd.f32 %v5379_v40, %v1073_v6  ;;  %v1643_v40 = vpack.c.b16 %v1632_v15, %v1632_v15  ;;  %v5491_v33 = vmax.f32 %v1357_v0, %v1363_v26  ;;  %v5503_v11 = vmax.f32 %v1409_v4, %v1415_v34  ;;  %v1386_v15 = vld [vmem:[#allocation2 + $0x40] sm:$0xc] }
 0x14c   :  { %v1120_v54 = vadd.f32 %v5387_v60, %v1100_v45  ;;  %1088 = vst.msk [vmem:[#allocation2 + $0x68] sm:$0xff] %vm210_vm4, %v1074_v13  ;;  %v4627_v25 = vpack.i.bf16 %v5470_v19, %v5468_v18  ;;  %v1390_v26 = vrot.slane %v1386_v15, 2  ;;  %v4489_v4 = vld [vmem:[%s6303_s5 + $0x40] sm:$0xff] }
 0x14d   :  { %v1135_v27 = vmax.f32 %v1121_v59, 0.0  ;;  %v1662_v20 = vsel %vm1176_vm5, %v1643_v40, 0  ;;  %v4632_v56 = vpack.i.bf16 %v5491_v33, %v5494_v47 }
 0x14e   :  { %v1134_v12 = vmax.f32 %v1120_v54, 0.0  ;;  %4643 = vrot.lane.b32.xlu1 %v4642_v24, %s4731_s2  ;;  %4628 = vrot.lane.b32.xlu2 %v4627_v25, %s4731_s2  ;;  %v1468_v52 = vld [vmem:[#allocation2 + $0x50] sm:$0xc0]  ;;  %v1440_v44 = vld [vmem:[#allocation2 + $0x50] sm:$0xc] }
 0x14f   :  { %1149 = vst [vmem:[#allocation2 + $0x60] sm:$0xff] %v1135_v27  ;;  %v1412_v39 = vld [vmem:[#allocation2 + $0x48] sm:$0xc0]  ;;  %1688 = vmatpush.bf16.msra.mxu3 %v1662_v20  ;;  %v1472_v61 = vrot.slane %v1468_v52, 2  ;;  %v1410_v62 = vld [vmem:[#allocation2 + $0x48] sm:$0x30] }
 0x150   :  { %1148 = vst.msk [vmem:[#allocation2 + $0x58] sm:$0xff] %vm210_vm4, %v1134_v12  ;;  %v1031_v31 = vpop.f32.mrf.mxu0  ;;  %v1416_v57 = vrot.slane %v1412_v39, 2  ;;  %v1444_v3 = vrot.slane %v1440_v44, 2  ;;  %v1466_v23 = vld [vmem:[#allocation2 + $0x50] sm:$0x30] }
 0x151   :  { %v1059_v36 = vpop.f32.mrf.mxu1  ;;  %v5505_v6 = vmax.f32 %v1466_v23, %v1472_v61  ;;  %v1438_v7 = vld [vmem:[#allocation2 + $0x50] sm:$0x3]  ;;  %v1387_v28 = vld [vmem:[#allocation2 + $0x48] sm:$0xc]  ;;  %v1385_v12 = vld [vmem:[#allocation2 + $0x48] sm:$0x3] }
 0x152   :  { %v5501_v9 = vmax.f32 %v1410_v62, %v1416_v57  ;;  %v5509_v13 = vmax.f32 %v1438_v7, %v1444_v3  ;;  %v1391_v24 = vrot.slane %v1387_v28, 2  ;;  %v1384_v39 = vld [vmem:[#allocation2 + $0x40] sm:$0x3]  ;;  %v4490_v61 = vld [vmem:[%s6303_s5 + $0x48] sm:$0xff]  ;;  %v4483_v3 = vld [vmem:[%s6303_s5 + $0x10] sm:$0xff] }
 0x153   :  { %v1102_v48 = vld [vmem:[#allocation2 + $0x68] sm:$0xff]  ;;  %v4485_v62 = vld [vmem:[%s6303_s5 + $0x20] sm:$0xff]  ;;  %1689 = vmatpush.bf16.msra.mxu3 %v4490_v61 }
 0x154   :  { %v1122_v53 = vadd.f32 %v5387_v60, %v1102_v48  ;;  %v4647_v59 = vpack.i.bf16 %v5501_v9, %v5503_v11  ;;  %v5522_v30 = vmax.f32 %v1385_v12, %v1391_v24  ;;  %1667 = vmatpush.bf16.msra.mxu2 %v4485_v62  ;;  %v4501_v24 = vld [vmem:[%s6301_s3 + $0x44] sm:$0xf0] }
 0x156   :  { %v1136_v29 = vmax.f32 %v1122_v53, 0.0  ;;  %4633 = vrot.lane.b32.xlu2 %v4632_v56, %s4731_s2  ;;  %v1521_v45 = vld [vmem:[#allocation2 + $0x60] sm:$0xc0]  ;;  %v1496_v46 = vld [vmem:[#allocation2 + $0x60] sm:$0xc]  ;;  %v5528_v53 = vmax.f32 %v1384_v39, %v1390_v26 }
 0x157   :  { %v1469_v63 = vld [vmem:[#allocation2 + $0x58] sm:$0xc0]  ;;  %v1441_v60 = vld [vmem:[#allocation2 + $0x58] sm:$0xc]  ;;  %v1467_v21 = vld [vmem:[#allocation2 + $0x58] sm:$0x30]  ;;  %1690 = vmatpush.bf16.msra.mxu3 %v4489_v4 }
 0x158   :  { %1150 = vst.msk [vmem:[#allocation2 + $0x68] sm:$0xff] %vm210_vm4, %v1136_v29  ;;  %v1473_v2 = vrot.slane %v1469_v63, 2  ;;  %v1445_v43 = vrot.slane %v1441_v60, 2  ;;  %v1439_v10 = vld [vmem:[#allocation2 + $0x58] sm:$0x3]  ;;  %v1525_v25 = vrot.slane %v1521_v45, 2  ;;  %v4667_v29 = vpack.i.bf16 %v5522_v30, %v5528_v53  ;;  %vm5615_vm4 = vmor %vm1177_vm0, %vm1176_vm5 }
 0x159   :  { %v1500_v40 = vrot.slane %v1496_v46, 2  ;;  %v1519_v31 = vld [vmem:[#allocation2 + $0x60] sm:$0x30]  ;;  %v1494_v51 = vld [vmem:[#allocation2 + $0x60] sm:$0x3]  ;;  %v4484_v63 = vld [vmem:[%s6303_s5 + $0x18] sm:$0xff] }
 0x15a   :  { %v5507_v42 = vmax.f32 %v1467_v21, %v1473_v2  ;;  %v5511_v22 = vmax.f32 %v1439_v10, %v1445_v43  ;;  %v5524_v20 = vmax.f32 %v1519_v31, %v1525_v25  ;;  %1668 = vmatpush.bf16.msra.mxu2 %v4484_v63  ;;  %vm2551_vm0 = vcmask 129030  }
 0x15b   :  { %v5530_v56 = vmax.f32 %v1494_v51, %v1500_v40 }
 0x15c   :  { %v4657_v8 = vpack.i.bf16 %v5507_v42, %v5505_v6  ;;  %v4652_v54 = vpack.i.bf16 %v5511_v22, %v5509_v13 }
 0x15e   :  { %4648 = vrot.lane.b32.xlu2 %v4647_v59, %s4731_s2  ;;  %4658 = vrot.lane.b32.xlu1 %v4657_v8, %s4731_s2  ;;  %v4482_v8 = vld [vmem:[%s6303_s5 + $0x8] sm:$0xff] }
 0x15f   :  { %4653 = vrot.lane.b32.xlu0 %v4652_v54, %s4731_s2  ;;  %v1522_v27 = vld [vmem:[#allocation2 + $0x68] sm:$0xc0]  ;;  %v1497_v0 = vld [vmem:[#allocation2 + $0x68] sm:$0xc]  ;;  %v1520_v36 = vld [vmem:[#allocation2 + $0x68] sm:$0x30]  ;;  %1669 = vmatpush.bf16.msra.mxu2 %v4483_v3 }
 0x160   :  { %v1526_v58 = vrot.slane %v1522_v27, 2  ;;  %v1501_v37 = vrot.slane %v1497_v0, 2  ;;  %v1495_v52 = vld [vmem:[#allocation2 + $0x68] sm:$0x3] }
 0x162   :  { %v5526_v48 = vmax.f32 %v1520_v36, %v1526_v58  ;;  %v5532_v57 = vmax.f32 %v1495_v52, %v1501_v37 }
 0x163   :  { %1670 = vmatpush.bf16.msra.mxu2 %v4482_v8 }
 0x164   :  { %v4662_v44 = vpack.i.bf16 %v5526_v48, %v5524_v20  ;;  %v4672_v34 = vpack.i.bf16 %v5532_v57, %v5530_v56 }
 0x166   :  { %4663 = vrot.lane.b32.xlu2 %v4662_v44, %s4731_s2  ;;  %4673 = vrot.lane.b32.xlu1 %v4672_v34, %s4731_s2 }
 0x167   :  { %4668 = vrot.lane.b32.xlu0 %v4667_v29, %s4731_s2 }
 0x1a8   :  { %v4609_v2 = vpop.permute.xlu0 %4608  ;;  %v4629_v60 = vpop.permute.xlu2 %4628 }
 0x1a9   :  { %v4611_v23 = vunpack.i.h.bf16 %v4609_v2  ;;  %v4610_v21 = vunpack.i.l.bf16 %v4609_v2  ;;  %v4631_v43 = vunpack.i.h.bf16 %v4629_v60  ;;  %v4630_v7 = vunpack.i.l.bf16 %v4629_v60 }
 0x1ab   :  { %v1202_v10 = vmax.f32 %v5406_v55, %v4611_v23  ;;  %v1198_v28 = vsel %vm1169_vm6, %v4610_v21, %v4611_v23  ;;  %v1350_v45 = vmax.f32 %v5470_v19, %v4631_v43  ;;  %v1346_v59 = vsel %vm1169_vm6, %v4630_v7, %v4631_v43  ;;  %v4481_v55 = vld [vmem:[%s6303_s5] sm:$0xff] }
 0x1ac   :  { %v1201_v15 = vmax.f32 %v5404_v38, %v1198_v28  ;;  %v1349_v46 = vmax.f32 %v5468_v18, %v1346_v59  ;;  %1671 = vmatpush.bf16.msra.mxu2 %v4481_v55 }
 0x1ae   :  { %v1203_v19 = vpack.c.bf16 %v1202_v10, %v1201_v15  ;;  %v1351_v54 = vpack.c.bf16 %v1350_v45, %v1349_v46 }
 0x1b0   :  { %v3741_v25 = vrot.slane %v1203_v19, 9  ;;  %v1353_v18 = vrot.slane %v1351_v54, 6  ;;  %v4619_v26 = vpop.permute.xlu1 %4618  ;;  %v4634_v27 = vpop.permute.xlu2 %4633 }
 0x1b1   :  { %v4621_v40 = vunpack.i.h.bf16 %v4619_v26  ;;  %v4620_v12 = vunpack.i.l.bf16 %v4619_v26  ;;  %v4614_v58 = vpop.permute.xlu0 %4613  ;;  %v4636_v0 = vunpack.i.h.bf16 %v4634_v27  ;;  %v4635_v31 = vunpack.i.l.bf16 %v4634_v27 }
 0x1b2   :  { %1211 = vst.msk [vmem:[#allocation3] sm:$0x22] %vm5571_vm11, %v3741_v25  ;;  %v4616_v36 = vunpack.i.h.bf16 %v4614_v58  ;;  %v4615_v37 = vunpack.i.l.bf16 %v4614_v58 }
 0x1b3   :  { %1355 = vst.msk [vmem:[#allocation3 + $0x8] sm:$0x44] %vm5576_vm12, %v1353_v18  ;;  %v1265_v39 = vmax.f32 %v5420_v35, %v4621_v40  ;;  %v1261_v51 = vsel %vm1169_vm6, %v4620_v12, %v4621_v40  ;;  %v1378_v52 = vmax.f32 %v5491_v33, %v4636_v0  ;;  %v1374_v44 = vsel %vm1169_vm6, %v4635_v31, %v4636_v0 }
 0x1b4   :  { %v1264_v29 = vmax.f32 %v5418_v50, %v1261_v51  ;;  %v1234_v34 = vmax.f32 %v5427_v16, %v4616_v36  ;;  %v1230_v61 = vsel %vm1169_vm6, %v4615_v37, %v4616_v36  ;;  %v1377_v62 = vmax.f32 %v5494_v47, %v1374_v44 }
 0x1b5   :  { %v1233_v63 = vmax.f32 %v5425_v14, %v1230_v61 }
 0x1b6   :  { %v1266_v3 = vpack.c.bf16 %v1265_v39, %v1264_v29  ;;  %v1379_v4 = vpack.c.bf16 %v1378_v52, %v1377_v62  ;;  %v3841_v62 = vld [vmem:[%s6301_s3 + $0x40] sm:$0xf] }
 0x1b7   :  { %v1235_v33 = vpack.c.bf16 %v1234_v34, %v1233_v63 }
 0x1b8   :  { %v1268_v2 = vrot.slane %v1266_v3, 7  ;;  %v1381_v60 = vrot.slane %v1379_v4, 7  ;;  %v4624_v50 = vpop.permute.xlu1 %4623  ;;  %v4649_v23 = vpop.permute.xlu2 %4648 }
 0x1b9   :  { %v1237_v16 = vrot.slane %v1235_v33, 6  ;;  %v4639_v21 = vpop.permute.xlu0 %4638  ;;  %v4626_v43 = vunpack.i.h.bf16 %v4624_v50  ;;  %v4625_v7 = vunpack.i.l.bf16 %v4624_v50  ;;  %v4651_v47 = vunpack.i.h.bf16 %v4649_v23 }
 0x1ba   :  { %1273 = vst.msk [vmem:[#allocation3] sm:$0x88] %vm5595_vm15, %v1268_v2  ;;  %v4641_v14 = vunpack.i.h.bf16 %v4639_v21  ;;  %v4640_v10 = vunpack.i.l.bf16 %v4639_v21  ;;  %v4650_v28 = vunpack.i.l.bf16 %v4649_v23 }
 0x1bb   :  { %1242 = vst.msk [vmem:[#allocation3] sm:$0x44] %vm5576_vm12, %v1237_v16  ;;  %v1321_v45 = vmax.f32 %v5444_v1, %v4626_v43  ;;  %v1317_v59 = vsel %vm1169_vm6, %v4625_v7, %v4626_v43  ;;  %v1431_v8 = vmax.f32 %v5501_v9, %v4651_v47  ;;  %v3842_v7 = vor.u32 %v4501_v24, %v3841_v62  ;;  %v4511_v1 = vld [vmem:[%s6301_s3 + $0x9c] sm:$0xf]  ;;  %v4498_v24 = vld [vmem:[%s6301_s3 + $0x34] sm:$0xf] }
 0x1bc   :  { %1383 = vst.msk [vmem:[#allocation3 + $0x8] sm:$0x88] %vm5595_vm15, %v1381_v60  ;;  %v1174_v15 = vmax.f32 %v5440_v32, %v4641_v14  ;;  %v1170_v46 = vsel %vm1169_vm6, %v4640_v10, %v4641_v14  ;;  %v1320_v55 = vmax.f32 %v5442_v41, %v1317_v59  ;;  %v1427_v19 = vsel %vm1169_vm6, %v4650_v28, %v4651_v47  ;;  %v4500_v47 = vld [vmem:[%s6301_s3 + $0x44] sm:$0xf]  ;;  %v3843_v14 = vld [vmem:[%s6301_s3 + $0x48] sm:$0xf0] }
 0x1bd   :  { %v1173_v54 = vmax.f32 %v5447_v49, %v1170_v46  ;;  %v1430_v25 = vmax.f32 %v5503_v11, %v1427_v19 }
 0x1be   :  { %v1322_v9 = vpack.c.bf16 %v1321_v45, %v1320_v55 }
 0x1bf   :  { %v1175_v18 = vpack.c.bf16 %v1174_v15, %v1173_v54  ;;  %v1432_v26 = vpack.c.bf16 %v1431_v8, %v1430_v25 }
 0x1c0   :  { %v3742_v27 = vrot.slane %v1322_v9, 9  ;;  %v4644_v32 = vpop.permute.xlu1 %4643  ;;  %v4664_v40 = vpop.permute.xlu2 %4663  ;;  %v3846_v9 = vor.u32 %v4500_v47, %v3843_v14  ;;  %v3894_v47 = vld [vmem:[%s6301_s3 + $0x90] sm:$0xf0]  ;;  %v3817_v14 = vld [vmem:[%s6301_s3 + $0x10] sm:$0xf] }
 0x1c1   :  { %1179 = vst.msk [vmem:[#allocation3] sm:$0x11] %vm5615_vm4, %v1175_v18  ;;  %v3743_v41 = vrot.slane %v1432_v26, 9  ;;  %v4646_v12 = vunpack.i.h.bf16 %v4644_v32  ;;  %v4645_v58 = vunpack.i.l.bf16 %v4644_v32  ;;  %v4666_v49 = vunpack.i.h.bf16 %v4664_v40 }
 0x1c2   :  { %1327 = vst.msk [vmem:[#allocation3 + $0x8] sm:$0x22] %vm5571_vm11, %v3742_v27  ;;  %v4665_v11 = vunpack.i.l.bf16 %v4664_v40 }
 0x1c3   :  { %1437 = vst.msk [vmem:[#allocation3 + $0x10] sm:$0x22] %vm5571_vm11, %v3743_v41  ;;  %v1296_v0 = vmax.f32 %v5461_v5, %v4646_v12  ;;  %v1292_v31 = vsel %vm1169_vm6, %v4645_v58, %v4646_v12  ;;  %v1541_v36 = vmax.f32 %v5526_v48, %v4666_v49  ;;  %v3861_v5 = vld [vmem:[%s6301_s3 + $0xa8] sm:$0x33] }
 0x1c4   :  { %v1295_v37 = vmax.f32 %v5466_v17, %v1292_v31  ;;  %v1537_v39 = vsel %vm1169_vm6, %v4665_v11, %v4666_v49  ;;  %v1725_v17 = vld [vmem:[%s6301_s3 + $0x50] sm:$0x33]  ;;  %v1910_v48 = vunpack.c.l.b16 %v3861_v5  ;;  %v1911_v34 = vunpack.c.h.b16 %v3861_v5 }
 0x1c5   :  { %v1540_v51 = vmax.f32 %v5524_v20, %v1537_v39  ;;  %v1765_v20 = vunpack.c.l.b16 %v1725_v17  ;;  %v1766_v61 = vunpack.c.h.b16 %v1725_v17 }
 0x1c6   :  { %v1297_v52 = vpack.c.bf16 %v1296_v0, %v1295_v37  ;;  %v1922_v2 = vpack.c.b16 %v1910_v48, %v1910_v48  ;;  %v1923_v60 = vpack.c.b16 %v1911_v34, %v1911_v34  ;;  %v3902_v48 = vld [vmem:[%s6301_s3 + $0xa0] sm:$0xf0]  ;;  %v3833_v34 = vld [vmem:[%s6301_s3 + $0x30] sm:$0xf] }
 0x1c7   :  { %v1542_v44 = vpack.c.bf16 %v1541_v36, %v1540_v51  ;;  %v1777_v50 = vpack.c.b16 %v1765_v20, %v1765_v20  ;;  %v1778_v23 = vpack.c.b16 %v1766_v61, %v1766_v61  ;;  %v4499_v20 = vld [vmem:[%s6301_s3 + $0x34] sm:$0xf0]  ;;  %v3905_v61 = vor.u32 %v4511_v1, %v3902_v48  ;;  %v4521_v1 = vld [vmem:[%s6301_s3 + $0xe4] sm:$0xf0] }
 0x1c8   :  { %1298 = vst.msk [vmem:[#allocation3 + $0x8] sm:$0x11] %vm5615_vm4, %v1297_v52  ;;  %v3747_v63 = vld [vmem:[#allocation3] sm:$0xf]  ;;  %v4477_v4 = vld [vmem:[#allocation3 + $0x4] sm:$0xf]  ;;  %v3834_v62 = vor.u32 %v4499_v20, %v3833_v34 }
 0x1c9   :  { %v3744_v29 = vrot.slane %v1542_v44, 9  ;;  %v1941_v59 = vsel %vm1796_vm10, %v1922_v2, 0  ;;  %v1944_v8 = vsel %vm1796_vm10, %v1923_v60, 0  ;;  %v1798_v55 = vsel %vm1796_vm10, %v1777_v50, 0  ;;  %v4496_v2 = vld [vmem:[%s6301_s3 + $0x24] sm:$0xf] }
 0x1ca   :  { %v1801_v19 = vsel %vm1796_vm10, %v1778_v23, 0  ;;  %1948 = vmatpush.bf16.msrb.mxu0 %v1941_v59  ;;  %1966 = vmatpush.bf16.msrb.mxu1 %v1944_v8  ;;  %v3827_v50 = vld [vmem:[%s6301_s3 + $0x28] sm:$0xf0]  ;;  %v4494_v59 = vld [vmem:[%s6301_s3 + $0x14] sm:$0xf] }
 0x1cb   :  { %1547 = vst.msk [vmem:[#allocation3 + $0x18] sm:$0x22] %vm5571_vm11, %v3744_v29  ;;  %1805 = vmatpush.bf16.msrb.mxu2 %v1798_v55  ;;  %1823 = vmatpush.bf16.msrb.mxu3 %v1801_v19  ;;  %v3830_v23 = vor.u32 %v4496_v2, %v3827_v50  ;;  %v3819_v8 = vld [vmem:[%s6301_s3 + $0x18] sm:$0xf0]  ;;  %v4493_v55 = vld [vmem:[%s6301_s3 + $0x4] sm:$0xf0] }
 0x1cc   :  { %v4492_v19 = vld [vmem:[%s6301_s3 + $0x4] sm:$0xf]  ;;  %vm1789_vm11 = vcmask 687104  }
 0x1cd   :  { %v3870_v2 = vld [vmem:[%s6301_s3 + $0x60] sm:$0xf0] }
 0x1ce   :  { %1967 = vmatpush.bf16.msrb.mxu1 %v3905_v61  ;;  %v3953_v61 = vld [vmem:[%s6301_s3 + $0xe8] sm:$0xf0] }
 0x1cf   :  { %v4478_v3 = vld [vmem:[#allocation3 + $0x4] sm:$0xf0]  ;;  %v3749_v33 = vld [vmem:[#allocation3 + $0x8] sm:$0xf0]  ;;  %1806 = vmatpush.bf16.msrb.mxu2 %v3842_v7  ;;  %1824 = vmatpush.bf16.msrb.mxu3 %v3846_v9 }
 0x1d0   :  { %v4659_v16 = vpop.permute.xlu1 %4658  ;;  %v3748_v21 = vor.u32 %v4478_v3, %v3747_v63  ;;  %v3752_v43 = vor.u32 %v4477_v4, %v3749_v33  ;;  %v3835_v63 = vld [vmem:[%s6301_s3 + $0x38] sm:$0xf0]  ;;  %v3825_v4 = vld [vmem:[%s6301_s3 + $0x20] sm:$0xf]  ;;  %v4497_v33 = vld [vmem:[%s6301_s3 + $0x24] sm:$0xf0] }
 0x1d1   :  { %v4661_v10 = vunpack.i.h.bf16 %v4659_v16  ;;  %v4660_v28 = vunpack.i.l.bf16 %v4659_v16  ;;  %v4654_v45 = vpop.permute.xlu0 %4653  ;;  %v3838_v3 = vor.u32 %v4498_v24, %v3835_v63  ;;  %v3826_v60 = vor.u32 %v4497_v33, %v3825_v4  ;;  %v3892_v16 = vld [vmem:[%s6301_s3 + $0x88] sm:$0xf]  ;;  %v3884_v9 = vld [vmem:[%s6301_s3 + $0x78] sm:$0xf]  ;;  %v4504_v24 = vld [vmem:[%s6301_s3 + $0x5c] sm:$0xf0] }
 0x1d2   :  { %v4656_v15 = vunpack.i.h.bf16 %v4654_v45  ;;  %v4655_v46 = vunpack.i.l.bf16 %v4654_v45  ;;  %1672 = vmatmul.bf16.vlgmr.msra.gmra.mxu2 %v3748_v21  ;;  %3801 = vmatmul.msk.bf16.vlgmr.msra.gmra.mxu3 %vm1654_vm8, %v3752_v43  ;;  %v4510_v21 = vld [vmem:[%s6301_s3 + $0x8c] sm:$0xf0]  ;;  %v4509_v43 = vld [vmem:[%s6301_s3 + $0x8c] sm:$0xf]  ;;  %v4503_v33 = vld [vmem:[%s6301_s3 + $0x5c] sm:$0xf] }
 0x1d3   :  { %v1488_v54 = vmax.f32 %v5507_v42, %v4661_v10  ;;  %v1484_v25 = vsel %vm1169_vm6, %v4660_v28, %v4661_v10  ;;  %1807 = vmatpush.bf16.msrb.mxu2 %v3834_v62  ;;  %1825 = vmatpush.bf16.msrb.mxu3 %v3838_v3  ;;  %v3893_v7 = vor.u32 %v4510_v21, %v3892_v16  ;;  %v4495_v10 = vld [vmem:[%s6301_s3 + $0x14] sm:$0xf0]  ;;  %v4518_v21 = vld [vmem:[%s6301_s3 + $0xd4] sm:$0xf] }
 0x1d4   :  { %v1487_v18 = vmax.f32 %v5505_v6, %v1484_v25  ;;  %v1460_v26 = vmax.f32 %v5511_v22, %v4656_v15  ;;  %v1456_v27 = vsel %vm1169_vm6, %v4655_v46, %v4656_v15  ;;  %v3897_v28 = vor.u32 %v4509_v43, %v3894_v47  ;;  %v3809_v15 = vld [vmem:[%s6301_s3] sm:$0xf]  ;;  %v3868_v62 = vld [vmem:[%s6301_s3 + $0x58] sm:$0xf] }
 0x1d5   :  { %v1459_v32 = vmax.f32 %v5509_v13, %v1456_v27  ;;  %v3818_v45 = vor.u32 %v4495_v10, %v3817_v14  ;;  %v3822_v46 = vor.u32 %v4494_v59, %v3819_v8  ;;  %v3810_v25 = vor.u32 %v4493_v55, %v3809_v15  ;;  %v4519_v16 = vld [vmem:[%s6301_s3 + $0xd4] sm:$0xf0]  ;;  %v3935_v14 = vld [vmem:[%s6301_s3 + $0xc0] sm:$0xf]  ;;  %v4517_v10 = vld [vmem:[%s6301_s3 + $0xc4] sm:$0xf0] }
 0x1d6   :  { %v1489_v40 = vpack.c.bf16 %v1488_v54, %v1487_v18  ;;  %v3811_v54 = vld [vmem:[%s6301_s3 + $0x8] sm:$0xf0]  ;;  %1968 = vmatpush.bf16.msrb.mxu1 %v3897_v28  ;;  %v4508_v18 = vld [vmem:[%s6301_s3 + $0x7c] sm:$0xf0]  ;;  %v3869_v4 = vor.u32 %v4504_v24, %v3868_v62  ;;  %v4516_v28 = vld [vmem:[%s6301_s3 + $0xc4] sm:$0xf]  ;;  %v3936_v59 = vor.u32 %v4517_v10, %v3935_v14 }
 0x1d7   :  { %v1461_v41 = vpack.c.bf16 %v1460_v26, %v1459_v32  ;;  %1808 = vmatpush.bf16.msrb.mxu2 %v3826_v60  ;;  %1826 = vmatpush.bf16.msrb.mxu3 %v3830_v23  ;;  %v4507_v26 = vld [vmem:[%s6301_s3 + $0x7c] sm:$0xf]  ;;  %v3814_v27 = vor.u32 %v4492_v19, %v3811_v54  ;;  %v3885_v32 = vor.u32 %v4508_v18, %v3884_v9  ;;  %v3943_v23 = vld [vmem:[%s6301_s3 + $0xd0] sm:$0xf]  ;;  %v4515_v55 = vld [vmem:[%s6301_s3 + $0xb4] sm:$0xf0] }
 0x1d8   :  { %v1491_v12 = vrot.slane %v1489_v40, 7  ;;  %v4674_v49 = vpop.permute.xlu1 %4673  ;;  %v3886_v40 = vld [vmem:[%s6301_s3 + $0x80] sm:$0xf0]  ;;  %v3873_v60 = vor.u32 %v4503_v33, %v3870_v2  ;;  %v3944_v43 = vor.u32 %v4519_v16, %v3943_v23  ;;  %v3927_v15 = vld [vmem:[%s6301_s3 + $0xb0] sm:$0xf] }
 0x1d9   :  { %v1463_v42 = vrot.slane %v1461_v41, 6  ;;  %v4669_v58 = vpop.permute.xlu0 %4668  ;;  %v4676_v22 = vunpack.i.h.bf16 %v4674_v49  ;;  %v4675_v0 = vunpack.i.l.bf16 %v4674_v49  ;;  %v3889_v41 = vor.u32 %v4507_v26, %v3886_v40  ;;  %v4514_v19 = vld [vmem:[%s6301_s3 + $0xb4] sm:$0xf]  ;;  %v3929_v54 = vld [vmem:[%s6301_s3 + $0xb8] sm:$0xf0] }
 0x1da   :  { %1493 = vst.msk [vmem:[#allocation3 + $0x10] sm:$0x88] %vm5595_vm15, %v1491_v12  ;;  %v4671_v6 = vunpack.i.h.bf16 %v4669_v58  ;;  %v4670_v11 = vunpack.i.l.bf16 %v4669_v58  ;;  %v3920_v12 = vld [vmem:[%s6301_s3 + $0x100] sm:$0x33]  ;;  %v3932_v40 = vor.u32 %v4514_v19, %v3929_v54  ;;  %v4530_v62 = vld [vmem:[%s6301_s3 + $0x12c] sm:$0xf]  ;;  %vm2522_vm15 = vmor %vm2521_vm14, %vm1208_vm7 }
 0x1db   :  { %1465 = vst.msk [vmem:[#allocation3 + $0x10] sm:$0x44] %vm5576_vm12, %v1463_v42  ;;  %v1516_v36 = vmax.f32 %v5532_v57, %v4676_v22  ;;  %v1512_v37 = vsel %vm1169_vm6, %v4675_v0, %v4676_v22  ;;  %1809 = vmatpush.bf16.msrb.mxu2 %v3818_v45  ;;  %1827 = vmatpush.bf16.msrb.mxu3 %v3822_v46  ;;  %v2057_v42 = vunpack.c.l.b16 %v3920_v12  ;;  %v2058_v58 = vunpack.c.h.b16 %v3920_v12  ;;  %v3937_v45 = vld [vmem:[%s6301_s3 + $0xc8] sm:$0xf0]  ;;  %v3979_v46 = vld [vmem:[%s6301_s3 + $0x158] sm:$0x33]  ;;  %vm2552_vm7 = vmor %vm2551_vm0, %vm1239_vm9 }
 0x1dc   :  { %v1406_v13 = vmax.f32 %v5522_v30, %v4671_v6  ;;  %v1402_v31 = vsel %vm1169_vm6, %v4670_v11, %v4671_v6  ;;  %v1515_v35 = vmax.f32 %v5530_v56, %v1512_v37  ;;  %v4512_v56 = vld [vmem:[%s6301_s3 + $0x9c] sm:$0xf0]  ;;  %1969 = vmatpush.bf16.msrb.mxu1 %v3889_v41  ;;  %v3959_v11 = vld [vmem:[%s6301_s3 + $0xf0] sm:$0xf]  ;;  %v3961_v37 = vld [vmem:[%s6301_s3 + $0xf8] sm:$0xf0]  ;;  %v3940_v8 = vor.u32 %v4516_v28, %v3937_v45 }
 0x1dd   :  { %v1405_v39 = vmax.f32 %v5528_v53, %v1402_v31  ;;  %v3900_v53 = vld [vmem:[%s6301_s3 + $0x98] sm:$0xf]  ;;  %v2069_v0 = vpack.c.b16 %v2057_v42, %v2057_v42  ;;  %vm1706_vm6 = vcmask 683008   ;;  %v2208_v9 = vunpack.c.h.b16 %v3979_v46  ;;  %v4022_v42 = vld [vmem:[%s6301_s3 + $0x148] sm:$0xf] }
 0x1de   :  { %v1517_v52 = vpack.c.bf16 %v1516_v36, %v1515_v35  ;;  %v3901_v17 = vor.u32 %v4512_v56, %v3900_v53  ;;  %v4523_v31 = vld [vmem:[%s6301_s3 + $0xf4] sm:$0xf0]  ;;  %v4522_v36 = vld [vmem:[%s6301_s3 + $0xf4] sm:$0xf]  ;;  %v3951_v56 = vld [vmem:[%s6301_s3 + $0xe0] sm:$0xf] }
 0x1df   :  { %v1407_v51 = vpack.c.bf16 %v1406_v13, %v1405_v39  ;;  %1810 = vmatpush.bf16.msrb.mxu2 %v3810_v25  ;;  %1828 = vmatpush.bf16.msrb.mxu3 %v3814_v27  ;;  %v2070_v13 = vpack.c.b16 %v2058_v58, %v2058_v58  ;;  %v2088_v35 = vsel %vm1796_vm10, %v2069_v0, 0  ;;  %v3952_v20 = vor.u32 %v4521_v1, %v3951_v56  ;;  %v4535_v58 = vld [vmem:[%s6301_s3 + $0x14c] sm:$0xf0]  ;;  %v4546_v56 = vld [vmem:[%s6301_s3 + $0x1a4] sm:$0xf0] }
 0x1e0   :  { %1518 = vst.msk [vmem:[#allocation3 + $0x18] sm:$0x11] %vm5615_vm4, %v1517_v52  ;;  %1949 = vmatpush.bf16.msrb.mxu0 %v3901_v17  ;;  %v3960_v52 = vor.u32 %v4523_v31, %v3959_v11  ;;  %v4520_v17 = vld [vmem:[%s6301_s3 + $0xe4] sm:$0xf]  ;;  %v2207_v25 = vunpack.c.l.b16 %v3979_v46  ;;  %v2220_v26 = vpack.c.b16 %v2208_v9, %v2208_v9  ;;  %v4024_v11 = vld [vmem:[%s6301_s3 + $0x150] sm:$0xf0] }
 0x1e1   :  { %1408 = vst.msk [vmem:[#allocation3 + $0x10] sm:$0x11] %vm5615_vm4, %v1407_v51  ;;  %v2091_v51 = vsel %vm1796_vm10, %v2070_v13, 0  ;;  %v3956_v3 = vor.u32 %v4520_v17, %v3953_v61  ;;  %v4545_v1 = vld [vmem:[%s6301_s3 + $0x1a4] sm:$0xf]  ;;  %vm1710_vm12 = vcmask 680960  }
 0x1e2   :  { %v2219_v18 = vpack.c.b16 %v2207_v25, %v2207_v25  ;;  %v2241_v12 = vsel %vm1796_vm10, %v2220_v26, 0  ;;  %v4083_v17 = vld [vmem:[%s6301_s3 + $0x1a8] sm:$0xf0]  ;;  %v4531_v61 = vld [vmem:[%s6301_s3 + $0x12c] sm:$0xf0]  ;;  %vm2710_vm4 = vcmask 130048  }
 0x1e3   :  { %2095 = vmatpush.bf16.msra.mxu2 %v2088_v35  ;;  %2113 = vmatpush.bf16.msra.mxu3 %v2091_v51  ;;  %v4014_v35 = vld [vmem:[%s6301_s3 + $0x138] sm:$0xf]  ;;  %v4533_v51 = vld [vmem:[%s6301_s3 + $0x13c] sm:$0xf0]  ;;  %v4073_v33 = vld [vmem:[%s6301_s3 + $0x190] sm:$0xf] }
 0x1e4   :  { %1950 = vmatpush.bf16.msrb.mxu0 %v3893_v7  ;;  %v3945_v7 = vld [vmem:[%s6301_s3 + $0xd8] sm:$0xf0]  ;;  %v2238_v41 = vsel %vm1796_vm10, %v2219_v18, 0  ;;  %v4544_v2 = vld [vmem:[%s6301_s3 + $0x194] sm:$0xf0]  ;;  %vm2490_vm9 = vcmask 126980  }
 0x1e5   :  { %v3948_v47 = vor.u32 %v4518_v21, %v3945_v7  ;;  %v4543_v16 = vld [vmem:[%s6301_s3 + $0x194] sm:$0xf]  ;;  %v4075_v21 = vld [vmem:[%s6301_s3 + $0x198] sm:$0xf0]  ;;  %v4000_v10 = vld [vmem:[%s6301_s3 + $0x120] sm:$0xf0] }
 0x1e6   :  { %v4528_v14 = vld [vmem:[%s6301_s3 + $0x11c] sm:$0xf]  ;;  %v4078_v46 = vor.u32 %v4543_v16, %v4075_v21  ;;  %v3990_v26 = vld [vmem:[%s6301_s3 + $0x108] sm:$0xf] }
 0x1e7   :  { %v4480_v44 = vld [vmem:[#allocation3 + $0x14] sm:$0x30]  ;;  %v3757_v29 = vld [vmem:[#allocation3 + $0x18] sm:$0x30]  ;;  %2096 = vmatpush.bf16.msra.mxu2 %v3960_v52  ;;  %v4532_v52 = vld [vmem:[%s6301_s3 + $0x13c] sm:$0xf] }
 0x1e8   :  { %v3755_v38 = vld [vmem:[#allocation3 + $0x10] sm:$0xf]  ;;  %v4479_v30 = vld [vmem:[#allocation3 + $0x14] sm:$0xf]  ;;  %1951 = vmatpush.bf16.msrb.mxu0 %v3885_v32  ;;  %v3928_v32 = vor.u32 %v4515_v55, %v3927_v15  ;;  %v4074_v15 = vor.u32 %v4544_v2, %v4073_v33 }
 0x1e9   :  { %v3756_v5 = vor.u32 %v4480_v44, %v3755_v38  ;;  %v3760_v57 = vor.u32 %v4479_v30, %v3757_v29  ;;  %v3964_v38 = vor.u32 %v4522_v36, %v3961_v37  ;;  %v3876_v30 = vld [vmem:[%s6301_s3 + $0x68] sm:$0xf]  ;;  %v4506_v44 = vld [vmem:[%s6301_s3 + $0x6c] sm:$0xf0]  ;;  %v4505_v29 = vld [vmem:[%s6301_s3 + $0x6c] sm:$0xf] }
 0x1ea   :  { %v4042_v36 = vld [vmem:[%s6301_s3 + $0x1b0] sm:$0x33] }
 0x1eb   :  { %1677 = vmatmul.bf16.gmra.mxu2 %v3756_v5  ;;  %3802 = vmatmul.msk.bf16.gmra.mxu3 %vm1654_vm8, %v3760_v57  ;;  %v3877_v5 = vor.u32 %v4506_v44, %v3876_v30  ;;  %v3878_v57 = vld [vmem:[%s6301_s3 + $0x70] sm:$0xf0]  ;;  %v2351_v37 = vunpack.c.l.b16 %v4042_v36  ;;  %v4015_v30 = vor.u32 %v4533_v51, %v4014_v35  ;;  %v4016_v44 = vld [vmem:[%s6301_s3 + $0x140] sm:$0xf0]  ;;  %v4057_v51 = vld [vmem:[%s6301_s3 + $0x170] sm:$0xf] }
 0x1ec   :  { %v3881_v53 = vor.u32 %v4505_v29, %v3878_v57  ;;  %2114 = vmatpush.bf16.msra.mxu3 %v3964_v38  ;;  %2097 = vmatpush.bf16.msra.mxu2 %v3952_v20  ;;  %v4019_v57 = vor.u32 %v4532_v52, %v4016_v44  ;;  %v4540_v52 = vld [vmem:[%s6301_s3 + $0x174] sm:$0xf0]  ;;  %v4059_v44 = vld [vmem:[%s6301_s3 + $0x178] sm:$0xf0]  ;;  %vm6205_vm8 = vmor %vm2490_vm9, %vm1176_vm5  ;;  %vm2581_vm5 = vcmask 130055  }
 0x1ed   :  { %1952 = vmatpush.bf16.msrb.mxu0 %v3877_v5  ;;  %v2363_v29 = vpack.c.b16 %v2351_v37, %v2351_v37 }
 0x1ee   :  { %1970 = vmatpush.bf16.msrb.mxu1 %v3881_v53  ;;  %v4081_v53 = vld [vmem:[%s6301_s3 + $0x1a0] sm:$0xf] }
 0x1ef   :  { %v4082_v24 = vor.u32 %v4546_v56, %v4081_v53  ;;  %v4537_v53 = vld [vmem:[%s6301_s3 + $0x164] sm:$0xf]  ;;  %v4051_v56 = vld [vmem:[%s6301_s3 + $0x168] sm:$0xf0] }
 0x1f0   :  { %2115 = vmatpush.bf16.msra.mxu3 %v3956_v3  ;;  %2098 = vmatpush.bf16.msra.mxu2 %v3944_v43  ;;  %v3998_v43 = vld [vmem:[%s6301_s3 + $0x118] sm:$0xf] }
 0x1f1   :  { %1953 = vmatpush.bf16.msrb.mxu0 %v3869_v4  ;;  %v4008_v4 = vld [vmem:[%s6301_s3 + $0x130] sm:$0xf0] }
 0x1f2   :  { %1971 = vmatpush.bf16.msrb.mxu1 %v3873_v60  ;;  %v4011_v23 = vor.u32 %v4530_v62, %v4008_v4 }
 0x1f4   :  { %2116 = vmatpush.bf16.msra.mxu3 %v3948_v47  ;;  %2099 = vmatpush.bf16.msra.mxu2 %v3936_v59  ;;  %v4529_v47 = vld [vmem:[%s6301_s3 + $0x11c] sm:$0xf0]  ;;  %v4003_v59 = vor.u32 %v4528_v14, %v4000_v10 }
 0x1f5   :  { %2245 = vmatpush.bf16.msra.mxu0 %v2238_v41  ;;  %v3999_v45 = vor.u32 %v4529_v47, %v3998_v43 }
 0x1f6   :  { %2263 = vmatpush.bf16.msra.mxu1 %v2241_v12  ;;  %v3992_v12 = vld [vmem:[%s6301_s3 + $0x110] sm:$0xf0] }
 0x1f8   :  { %2117 = vmatpush.bf16.msra.mxu3 %v3940_v8  ;;  %2100 = vmatpush.bf16.msra.mxu2 %v3928_v32  ;;  %v4526_v32 = vld [vmem:[%s6301_s3 + $0x10c] sm:$0xf] }
 0x1fc   :  { %2118 = vmatpush.bf16.msra.mxu3 %v3932_v40 }
 0x255   :  { %v1673_v49 = vpop.f32.mrf.mxu2  ;;  %v1692_v6 = vpop.f32.mrf.mxu3 }
 0x256   :  { %v1693_v22 = vadd.f32 %v1692_v6, %v1673_v49  ;;  %v4534_v49 = vld [vmem:[%s6301_s3 + $0x14c] sm:$0xf]  ;;  %v4023_v6 = vor.u32 %v4535_v58, %v4022_v42 }
 0x257   :  { %v4027_v13 = vor.u32 %v4534_v49, %v4024_v11  ;;  %v3995_v49 = vor.u32 %v4526_v32, %v3992_v12 }
 0x258   :  { %v1702_v39 = vpack.c.bf16 %v1693_v22, %v1693_v22  ;;  %2246 = vmatpush.bf16.msra.mxu0 %v4023_v6 }
 0x259   :  { %2264 = vmatpush.bf16.msra.mxu1 %v4027_v13 }
 0x25a   :  { %1707 = vst.msk [vmem:[#allocation4] sm:$0xf] %vm1706_vm6, %v1702_v39  ;;  %v2352_v39 = vunpack.c.h.b16 %v4042_v36  ;;  %v4067_v36 = vld [vmem:[%s6301_s3 + $0x188] sm:$0xf0] }
 0x25c   :  { %v2364_v5 = vpack.c.b16 %v2352_v39, %v2352_v39  ;;  %2247 = vmatpush.bf16.msra.mxu0 %v4015_v30  ;;  %v4539_v30 = vld [vmem:[%s6301_s3 + $0x174] sm:$0xf] }
 0x25d   :  { %v1675_v48 = vpop.f32.mrf.mxu2  ;;  %v1694_v34 = vpop.f32.mrf.mxu3  ;;  %2265 = vmatpush.bf16.msra.mxu1 %v4019_v57  ;;  %v4538_v57 = vld [vmem:[%s6301_s3 + $0x164] sm:$0xf0] }
 0x25e   :  { %v1695_v63 = vadd.f32 %v1694_v34, %v1675_v48  ;;  %v4006_v48 = vld [vmem:[%s6301_s3 + $0x128] sm:$0xf]  ;;  %v2382_v34 = vsel %vm1796_vm10, %v2363_v29, 0  ;;  %v2385_v20 = vsel %vm1796_vm10, %v2364_v5, 0  ;;  %v4049_v29 = vld [vmem:[%s6301_s3 + $0x160] sm:$0xf]  ;;  %v4062_v5 = vor.u32 %v4539_v30, %v4059_v44 }
 0x25f   :  { %v4007_v3 = vor.u32 %v4531_v61, %v4006_v48 }
 0x260   :  { %v1703_v50 = vpack.c.bf16 %v1695_v63, %v1695_v63  ;;  %v4086_v63 = vor.u32 %v4545_v1, %v4083_v17 }
 0x261   :  { %2248 = vmatpush.bf16.msra.mxu0 %v4007_v3  ;;  %2266 = vmatpush.bf16.msra.mxu1 %v4011_v23  ;;  %v3864_v19 = vld [vmem:[#allocation4] sm:$0xe] }
 0x262   :  { %1708 = vst.msk [vmem:[#allocation4 + $0x4] sm:$0xf] %vm1706_vm6, %v1703_v50  ;;  %v3923_v48 = vld [vmem:[#allocation4] sm:$0xc] }
 0x265   :  { %2249 = vmatpush.bf16.msra.mxu0 %v3999_v45  ;;  %2267 = vmatpush.bf16.msra.mxu1 %v4003_v59 }
 0x269   :  { %v4491_v27 = vld [vmem:[#allocation4] sm:$0xff]  ;;  %2268 = vmatpush.bf16.msra.mxu1 %v3995_v49 }
 0x26a   :  { %3847 = vmatmul.msk.bf16.vlgmr.msrb.gmra.mxu2 %vm1789_vm11, %v4491_v27  ;;  %3849 = vmatmul.msk.bf16.vlgmr.msrb.gmra.mxu3 %vm1789_vm11, %v4491_v27  ;;  %v4502_v28 = vld [vmem:[#allocation4] sm:$0xf0]  ;;  %v4527_v27 = vld [vmem:[%s6301_s3 + $0x10c] sm:$0xf0] }
 0x26b   :  { %2389 = vmatpush.bf16.msrb.mxu2 %v2382_v34  ;;  %2407 = vmatpush.bf16.msrb.mxu3 %v2385_v20  ;;  %v3865_v18 = vor.u32 %v4502_v28, %v3864_v19  ;;  %v3991_v58 = vor.u32 %v4527_v27, %v3990_v26  ;;  %v4513_v1 = vld [vmem:[#allocation4] sm:$0xf0]  ;;  %v4050_v34 = vor.u32 %v4538_v57, %v4049_v29 }
 0x26c   :  { %v4054_v20 = vor.u32 %v4537_v53, %v4051_v56  ;;  %v3924_v61 = vor.u32 %v4513_v1, %v3923_v48  ;;  %v4524_v4 = vld [vmem:[#allocation4] sm:$0xf0] }
 0x26d   :  { %v1876_v6 = vrot.slane %v3865_v18, 1  ;;  %2250 = vmatpush.bf16.msra.mxu0 %v3991_v58 }
 0x26e   :  { %v1678_v22 = vpop.f32.mrf.mxu2  ;;  %v1697_v0 = vpop.f32.mrf.mxu3 }
 0x26f   :  { %v1698_v31 = vadd.f32 %v1697_v0, %v1678_v22  ;;  %2390 = vmatpush.bf16.msrb.mxu2 %v4082_v24  ;;  %2408 = vmatpush.bf16.msrb.mxu3 %v4086_v63  ;;  %v4065_v22 = vld [vmem:[%s6301_s3 + $0x180] sm:$0xf]  ;;  %v4542_v0 = vld [vmem:[%s6301_s3 + $0x184] sm:$0xf0]  ;;  %v2023_v24 = vrot.slane %v3924_v61, 2 }
 0x270   :  { %v4066_v13 = vor.u32 %v4542_v0, %v4065_v22 }
 0x271   :  { %v1704_v38 = vpack.c.bf16 %v1698_v31, %v1698_v31  ;;  %v4541_v31 = vld [vmem:[%s6301_s3 + $0x184] sm:$0xf] }
 0x272   :  { %v4070_v39 = vor.u32 %v4541_v31, %v4067_v36 }
 0x273   :  { %1709 = vst.msk [vmem:[#allocation4 + $0x8] sm:$0xf] %vm1706_vm6, %v1704_v38  ;;  %2391 = vmatpush.bf16.msrb.mxu2 %v4074_v15  ;;  %2409 = vmatpush.bf16.msrb.mxu3 %v4078_v46  ;;  %v4058_v38 = vor.u32 %v4540_v52, %v4057_v51  ;;  %vm2582_vm6 = vmor %vm2581_vm5, %vm1270_vm13  ;;  %vm3238_vm13 = vcmask 1043456  }
 0x276   :  { %v1680_v60 = vpop.f32.mrf.mxu2  ;;  %v1699_v50 = vpop.f32.mrf.mxu3 }
 0x277   :  { %v1700_v7 = vadd.f32 %v1699_v50, %v1680_v60  ;;  %2392 = vmatpush.bf16.msrb.mxu2 %v4066_v13  ;;  %2410 = vmatpush.bf16.msrb.mxu3 %v4070_v39  ;;  %v3982_v60 = vld [vmem:[#allocation4] sm:$0x8] }
 0x278   :  { %v3983_v50 = vor.u32 %v4524_v4, %v3982_v60 }
 0x279   :  { %v1705_v8 = vpack.c.bf16 %v1700_v7, %v1700_v7 }
 0x27a   :  { %v1714_v55 = vld [vmem:[#allocation4 + $0x8] sm:$0x3]  ;;  %v2173_v16 = vrot.slane %v3983_v50, 3 }
 0x27b   :  { %v1855_v54 = vld [vmem:[#allocation4 + $0x8] sm:$0x7]  ;;  %1711 = vst.msk [vmem:[#allocation4 + $0xc] sm:$0x3] %vm1710_vm12, %v1705_v8  ;;  %v1731_v25 = vunpack.c.l.b16 %v1714_v55  ;;  %2393 = vmatpush.bf16.msrb.mxu2 %v4058_v38  ;;  %2411 = vmatpush.bf16.msrb.mxu3 %v4062_v5 }
 0x27c   :  { %v1873_v9 = vunpack.c.l.b16 %v1855_v54  ;;  %v2002_v42 = vld [vmem:[#allocation4 + $0x8] sm:$0xf] }
 0x27d   :  { %v1733_v40 = vpack.c.b16 %v1731_v25, %v1731_v25  ;;  %v2020_v35 = vunpack.c.l.b16 %v2002_v42  ;;  %v3986_v33 = vld [vmem:[#allocation4 + $0x8] sm:$0xf] }
 0x27e   :  { %v1875_v41 = vpack.c.b16 %v1873_v9, %v1873_v9  ;;  %v4536_v43 = vld [vmem:[#allocation4 + $0x4] sm:$0xff] }
 0x27f   :  { %3848 = vmatmul.msk.bf16.gmra.mxu2 %vm1789_vm11, %v1733_v40  ;;  %3850 = vmatmul.msk.bf16.gmra.mxu3 %vm1789_vm11, %v1733_v40  ;;  %v2022_v17 = vpack.c.b16 %v2020_v35, %v2020_v35 }
 0x280   :  { %v1877_v11 = vrot.slane %v1875_v41, 1  ;;  %2394 = vmatpush.bf16.msrb.mxu2 %v4050_v34  ;;  %2412 = vmatpush.bf16.msrb.mxu3 %v4054_v20 }
 0x281   :  { %v2024_v62 = vrot.slane %v2022_v17, 2 }
 0x282   :  { %v1878_v37 = vsel %vm279_vm1, %v1876_v6, %v1877_v11  ;;  %v4525_v3 = vld [vmem:[#allocation4 + $0x8] sm:$0x10]  ;;  %vm1840_vm1 = vcmask 261120  }
 0x283   :  { %3906 = vmatmul.msk.bf16.vlgmr.msrb.gmra.mxu0 %vm1789_vm11, %v1878_v37  ;;  %3908 = vmatmul.msk.bf16.vlgmr.msrb.gmra.mxu1 %vm1789_vm11, %v1878_v37  ;;  %v2025_v63 = vsel %vm498_vm2, %v2023_v24, %v2024_v62  ;;  %v3987_v2 = vor.u32 %v4525_v3, %v3986_v33  ;;  %v2299_v7 = vld [vmem:[#allocation4 + $0xc] sm:$0x3]  ;;  %vm1845_vm2 = vcmask 257024   ;;  %v2441_v24 = vld [vmem:[%s6302_s4] sm:$0x3] }
 0x284   :  { %v2317_v47 = vunpack.c.l.b16 %v2299_v7 }
 0x285   :  { %v2174_v23 = vrot.slane %v3987_v2, 3 }
 0x286   :  { %v2319_v14 = vpack.c.b16 %v2317_v47, %v2317_v47 }
 0x287   :  { %v2175_v21 = vsel %vm717_vm3, %v2173_v16, %v2174_v23  ;;  %v6026_v16 = vperm.slane %v2441_v24, 0  ;;  %vm2483_vm3 = vcmask 916480  }
 0x28f   :  { %3965 = vmatmul.msk.bf16.vlgmr.msra.gmra.mxu2 %vm1789_vm11, %v2025_v63  ;;  %3967 = vmatmul.msk.bf16.vlgmr.msra.gmra.mxu3 %vm1789_vm11, %v2025_v63 }
 0x293   :  { %3907 = vmatmul.msk.bf16.gmra.mxu0 %vm1789_vm11, %v1877_v11  ;;  %3909 = vmatmul.msk.bf16.gmra.mxu1 %vm1789_vm11, %v1877_v11 }
 0x29f   :  { %3966 = vmatmul.msk.bf16.gmra.mxu2 %vm1789_vm11, %v2024_v62  ;;  %3968 = vmatmul.msk.bf16.gmra.mxu3 %vm1789_vm11, %v2024_v62 }
 0x2a3   :  { %4028 = vmatmul.msk.bf16.vlgmr.msra.gmra.mxu0 %vm1789_vm11, %v2175_v21  ;;  %4030 = vmatmul.msk.bf16.vlgmr.msra.gmra.mxu1 %vm1789_vm11, %v2175_v21 }
 0x2af   :  { %4087 = vmatmul.msk.bf16.vlgmr.msrb.gmra.mxu2 %vm1789_vm11, %v4536_v43  ;;  %4089 = vmatmul.msk.bf16.vlgmr.msrb.gmra.mxu3 %vm1789_vm11, %v4536_v43 }
 0x2b3   :  { %4029 = vmatmul.msk.bf16.gmra.mxu0 %vm1789_vm11, %v2174_v23  ;;  %4031 = vmatmul.msk.bf16.gmra.mxu1 %vm1789_vm11, %v2174_v23 }
 0x2bf   :  { %4088 = vmatmul.msk.bf16.gmra.mxu2 %vm1789_vm11, %v2319_v14  ;;  %4090 = vmatmul.msk.bf16.gmra.mxu3 %vm1789_vm11, %v2319_v14 }
 0x2ed   :  { %v1830_v10 = vpop.f32.mrf.mxu3  ;;  %v1812_v28 = vpop.f32.mrf.mxu2 }
 0x2ee   :  { %1841 = vst.msk [vmem:[#allocation5 + $0x8] sm:$0xff] %vm1840_vm1, %v1830_v10 }
 0x2f5   :  { %v1832_v45 = vpop.f32.mrf.mxu3  ;;  %v6010_v59 = vpop.f32.mrf.mxu2  ;;  %v1848_v15 = vld [vmem:[#allocation5 + $0x8] sm:$0xff] }
 0x2f6   :  { %1843 = vst.msk [vmem:[#allocation5 + $0x18] sm:$0xff] %vm1840_vm1, %v1832_v45 }
 0x2fd   :  { %v1850_v9 = vld [vmem:[#allocation5 + $0x18] sm:$0xff] }
 0x300   :  { %v1955_v8 = vpop.f32.mrf.mxu0  ;;  %v1973_v46 = vpop.f32.mrf.mxu1 }
 0x301   :  { %v1983_v55 = vadd.f32 %v1973_v46, %v1848_v15  ;;  %v1982_v62 = vadd.f32 %v1955_v8, %v1812_v28 }
 0x302   :  { %v1817_v19 = vpop.f32.mrf.mxu2  ;;  %v1835_v54 = vpop.f32.mrf.mxu3 }
 0x303   :  { %1989 = vst.msk [vmem:[#allocation5 + $0x8] sm:$0xff] %vm1840_vm1, %v1983_v55 }
 0x304   :  { %1844 = vst [vmem:[#allocation5 + $0x20] sm:$0xf] %v1817_v19  ;;  %v2444_v19 = vperm.slane %v2441_v24, 1 }
 0x305   :  { %1846 = vst.msk [vmem:[#allocation5 + $0x28] sm:$0xf] %vm1845_vm2, %v1835_v54 }
 0x308   :  { %v6014_v25 = vpop.f32.mrf.mxu0  ;;  %v1975_v18 = vpop.f32.mrf.mxu1 }
 0x309   :  { %v1985_v26 = vadd.f32 %v1975_v18, %v1850_v9  ;;  %v1984_v10 = vadd.f32 %v6014_v25, %v6010_v59 }
 0x30a   :  { %v1819_v27 = vpop.f32.mrf.mxu2  ;;  %v1837_v32 = vpop.f32.mrf.mxu3  ;;  %v1995_v11 = vld [vmem:[#allocation5 + $0x8] sm:$0xff] }
 0x30b   :  { %1991 = vst.msk [vmem:[#allocation5 + $0x18] sm:$0xff] %vm1840_vm1, %v1985_v26  ;;  %v1851_v40 = vld [vmem:[#allocation5 + $0x20] sm:$0xf] }
 0x30c   :  { %v1852_v12 = vld [vmem:[#allocation5 + $0x28] sm:$0xf] }
 0x310   :  { %v1960_v41 = vpop.f32.mrf.mxu0  ;;  %v1978_v42 = vpop.f32.mrf.mxu1 }
 0x311   :  { %v1986_v58 = vadd.f32 %v1960_v41, %v1851_v40  ;;  %v1987_v49 = vadd.f32 %v1978_v42, %v1852_v12  ;;  %v4563_v12 = vld [vmem:[%s6304_s6 + $0x80] sm:$0xff] }
 0x312   :  { %v2102_v6 = vpop.f32.mrf.mxu2  ;;  %v2120_v22 = vpop.f32.mrf.mxu3  ;;  %v1997_v37 = vld [vmem:[#allocation5 + $0x18] sm:$0xff]  ;;  %2714 = vmatpush.bf16.msra.mxu3 %v4563_v12 }
 0x313   :  { %1992 = vst [vmem:[#allocation5 + $0x20] sm:$0xf] %v1986_v58  ;;  %v2130_v0 = vadd.f32 %v2120_v22, %v1995_v11  ;;  %v2129_v63 = vadd.f32 %v2102_v6, %v1982_v62  ;;  %v4554_v11 = vld [vmem:[%s6304_s6 + $0x38] sm:$0xff] }
 0x314   :  { %1993 = vst.msk [vmem:[#allocation5 + $0x28] sm:$0xf] %vm1845_vm2, %v1987_v49  ;;  %2803 = vmatpush.bf16.msra.mxu2 %v4554_v11  ;;  %v4571_v11 = vld [vmem:[%s6304_s6 + $0xc0] sm:$0xff] }
 0x315   :  { %2136 = vst.msk [vmem:[#allocation5 + $0x8] sm:$0xff] %vm1840_vm1, %v2130_v0 }
 0x318   :  { %v1962_v13 = vpop.f32.mrf.mxu0  ;;  %v1980_v31 = vpop.f32.mrf.mxu1 }
 0x319   :  { %v4562_v13 = vld [vmem:[%s6304_s6 + $0x78] sm:$0xff] }
 0x31a   :  { %v2104_v36 = vpop.f32.mrf.mxu2  ;;  %v2122_v39 = vpop.f32.mrf.mxu3  ;;  %v1998_v44 = vld [vmem:[#allocation5 + $0x20] sm:$0xf]  ;;  %2715 = vmatpush.bf16.msra.mxu3 %v4562_v13  ;;  %v4570_v13 = vld [vmem:[%s6304_s6 + $0xb8] sm:$0xff] }
 0x31b   :  { %v2132_v35 = vadd.f32 %v2122_v39, %v1997_v37  ;;  %v1999_v5 = vld [vmem:[#allocation5 + $0x28] sm:$0xf]  ;;  %v2131_v45 = vadd.f32 %v2104_v36, %v1984_v10 }
 0x31c   :  { %v2142_v52 = vld [vmem:[#allocation5 + $0x8] sm:$0xff] }
 0x31d   :  { %2138 = vst.msk [vmem:[#allocation5 + $0x18] sm:$0xff] %vm1840_vm1, %v2132_v35 }
 0x320   :  { %v2252_v51 = vpop.f32.mrf.mxu0  ;;  %v2270_v38 = vpop.f32.mrf.mxu1 }
 0x321   :  { %v2280_v30 = vadd.f32 %v2270_v38, %v2142_v52  ;;  %v2279_v23 = vadd.f32 %v2252_v51, %v2129_v63 }
 0x322   :  { %v2107_v29 = vpop.f32.mrf.mxu2  ;;  %v2125_v57 = vpop.f32.mrf.mxu3 }
 0x323   :  { %2286 = vst.msk [vmem:[#allocation5 + $0x8] sm:$0xff] %vm1840_vm1, %v2280_v30  ;;  %v2133_v53 = vadd.f32 %v2107_v29, %v1998_v44  ;;  %v2134_v56 = vadd.f32 %v2125_v57, %v1999_v5 }
 0x324   :  { %v2144_v17 = vld [vmem:[#allocation5 + $0x18] sm:$0xff] }
 0x325   :  { %2139 = vst [vmem:[#allocation5 + $0x20] sm:$0xf] %v2133_v53 }
 0x326   :  { %2140 = vst.msk [vmem:[#allocation5 + $0x28] sm:$0xf] %vm1845_vm2, %v2134_v56 }
 0x328   :  { %v2254_v1 = vpop.f32.mrf.mxu0  ;;  %v2272_v48 = vpop.f32.mrf.mxu1 }
 0x329   :  { %v2282_v34 = vadd.f32 %v2272_v48, %v2144_v17  ;;  %v2281_v55 = vadd.f32 %v2254_v1, %v2131_v45 }
 0x32a   :  { %v2109_v20 = vpop.f32.mrf.mxu2  ;;  %v2127_v61 = vpop.f32.mrf.mxu3  ;;  %v2292_v43 = vld [vmem:[#allocation5 + $0x8] sm:$0xff] }
 0x32b   :  { %2288 = vst.msk [vmem:[#allocation5 + $0x18] sm:$0xff] %vm1840_vm1, %v2282_v34 }
 0x32c   :  { %v2145_v3 = vld [vmem:[#allocation5 + $0x20] sm:$0xf] }
 0x32d   :  { %v2146_v33 = vld [vmem:[#allocation5 + $0x28] sm:$0xf] }
 0x330   :  { %v2257_v4 = vpop.f32.mrf.mxu0  ;;  %v2275_v2 = vpop.f32.mrf.mxu1 }
 0x331   :  { %v2283_v60 = vadd.f32 %v2257_v4, %v2145_v3  ;;  %v2284_v50 = vadd.f32 %v2275_v2, %v2146_v33 }
 0x332   :  { %v2396_v21 = vpop.f32.mrf.mxu2  ;;  %v2414_v7 = vpop.f32.mrf.mxu3  ;;  %v2294_v9 = vld [vmem:[#allocation5 + $0x18] sm:$0xff] }
 0x333   :  { %2289 = vst [vmem:[#allocation5 + $0x20] sm:$0xf] %v2283_v60  ;;  %v2423_v47 = vadd.f32 %v2396_v21, %v2279_v23  ;;  %v2424_v14 = vadd.f32 %v2414_v7, %v2292_v43 }
 0x334   :  { %2290 = vst.msk [vmem:[#allocation5 + $0x28] sm:$0xf] %vm1845_vm2, %v2284_v50 }
 0x335   :  { %v2447_v28 = vadd.f32 %v6026_v16, %v2423_v47  ;;  %2430 = vst.msk [vmem:[#allocation5 + $0x8] sm:$0xff] %vm1840_vm1, %v2424_v14 }
 0x337   :  { %v2453_v8 = vmax.f32 %v2447_v28, 0.0 }
 0x338   :  { %v2259_v15 = vpop.f32.mrf.mxu0  ;;  %v2277_v46 = vpop.f32.mrf.mxu1 }
 0x339   :  { %2459 = vst [vmem:[#allocation5] sm:$0xff] %v2453_v8 }
 0x33a   :  { %v2398_v54 = vpop.f32.mrf.mxu2  ;;  %v2416_v18 = vpop.f32.mrf.mxu3  ;;  %v2295_v42 = vld [vmem:[#allocation5 + $0x20] sm:$0xf] }
 0x33b   :  { %v2425_v26 = vadd.f32 %v2398_v54, %v2281_v55  ;;  %v2426_v27 = vadd.f32 %v2416_v18, %v2294_v9  ;;  %v2296_v49 = vld [vmem:[#allocation5 + $0x28] sm:$0xf] }
 0x33c   :  { %v2436_v32 = vld [vmem:[#allocation5 + $0x8] sm:$0xff] }
 0x33d   :  { %v2448_v40 = vadd.f32 %v2444_v19, %v2436_v32  ;;  %v2449_v59 = vadd.f32 %v6026_v16, %v2425_v26  ;;  %2432 = vst.msk [vmem:[#allocation5 + $0x18] sm:$0xff] %vm1840_vm1, %v2426_v27 }
 0x33f   :  { %v2454_v25 = vmax.f32 %v2448_v40, 0.0  ;;  %v2455_v41 = vmax.f32 %v2449_v59, 0.0 }
 0x340   :  { %v2495_v36 = vld [vmem:[#allocation5] sm:$0xc0]  ;;  %v2467_v39 = vld [vmem:[#allocation5] sm:$0xc]  ;;  %v2493_v57 = vld [vmem:[#allocation5] sm:$0x30] }
 0x341   :  { %2460 = vst.msk [vmem:[#allocation5 + $0x8] sm:$0xff] %vm1840_vm1, %v2454_v25  ;;  %v2499_v51 = vrot.slane %v2495_v36, 2  ;;  %v2471_v38 = vrot.slane %v2467_v39, 2  ;;  %v2465_v48 = vld [vmem:[#allocation5] sm:$0x3]  ;;  %v4558_v36 = vld [vmem:[%s6304_s6 + $0x58] sm:$0xff] }
 0x342   :  { %2461 = vst [vmem:[#allocation5 + $0x10] sm:$0xff] %v2455_v41  ;;  %v2401_v58 = vpop.f32.mrf.mxu2  ;;  %v2419_v6 = vpop.f32.mrf.mxu3  ;;  %v4550_v39 = vld [vmem:[%s6304_s6 + $0x18] sm:$0xff] }
 0x343   :  { %v2427_v22 = vadd.f32 %v2401_v58, %v2295_v42  ;;  %v2428_v0 = vadd.f32 %v2419_v6, %v2296_v49  ;;  %v6047_v1 = vmax.f32 %v2493_v57, %v2499_v51  ;;  %v6051_v61 = vmax.f32 %v2465_v48, %v2471_v38  ;;  %v4561_v42 = vld [vmem:[%s6304_s6 + $0x70] sm:$0xff]  ;;  %v4572_v58 = vld [vmem:[%s6304_s6 + $0xc8] sm:$0xff]  ;;  %v4547_v57 = vld [vmem:[%s6304_s6] sm:$0xff] }
 0x344   :  { %v2438_v31 = vld [vmem:[#allocation5 + $0x18] sm:$0xff]  ;;  %2716 = vmatpush.bf16.msra.mxu3 %v4561_v42  ;;  %2914 = vmatpush.bf16.msrb.mxu0 %v4572_v58  ;;  %v4553_v49 = vld [vmem:[%s6304_s6 + $0x30] sm:$0xff]  ;;  %v4560_v6 = vld [vmem:[%s6304_s6 + $0x68] sm:$0xff] }
 0x345   :  { %v2450_v37 = vadd.f32 %v2444_v19, %v2438_v31  ;;  %2433 = vst [vmem:[#allocation5 + $0x20] sm:$0xf] %v2427_v22  ;;  %2804 = vmatpush.bf16.msra.mxu2 %v4553_v49  ;;  %v4552_v22 = vld [vmem:[%s6304_s6 + $0x28] sm:$0xff]  ;;  %v4551_v31 = vld [vmem:[%s6304_s6 + $0x20] sm:$0xff]  ;;  %v4549_v38 = vld [vmem:[%s6304_s6 + $0x10] sm:$0xff] }
 0x346   :  { %2434 = vst.msk [vmem:[#allocation5 + $0x28] sm:$0xf] %vm1845_vm2, %v2428_v0  ;;  %v4559_v0 = vld [vmem:[%s6304_s6 + $0x60] sm:$0xff]  ;;  %v4568_v51 = vld [vmem:[%s6304_s6 + $0xa8] sm:$0xff]  ;;  %v4581_v48 = vld [vmem:[%s6304_s6 + $0x110] sm:$0xff] }
 0x347   :  { %v2456_v35 = vmax.f32 %v2450_v37, 0.0  ;;  %v4569_v37 = vld [vmem:[%s6304_s6 + $0xb0] sm:$0xff]  ;;  %v4574_v49 = vld [vmem:[%s6304_s6 + $0xd8] sm:$0xff] }
 0x348   :  { %v2496_v52 = vld [vmem:[#allocation5 + $0x8] sm:$0xc0]  ;;  %v2468_v44 = vld [vmem:[#allocation5 + $0x8] sm:$0xc]  ;;  %v2494_v53 = vld [vmem:[#allocation5 + $0x8] sm:$0x30]  ;;  %2717 = vmatpush.bf16.msra.mxu3 %v4560_v6  ;;  %2915 = vmatpush.bf16.msrb.mxu0 %v4571_v11 }
 0x349   :  { %2462 = vst.msk [vmem:[#allocation5 + $0x18] sm:$0xff] %vm1840_vm1, %v2456_v35  ;;  %v2500_v30 = vrot.slane %v2496_v52, 2  ;;  %v2472_v56 = vrot.slane %v2468_v44, 2  ;;  %v2466_v34 = vld [vmem:[#allocation5 + $0x8] sm:$0x3]  ;;  %2805 = vmatpush.bf16.msra.mxu2 %v4552_v22  ;;  %v4557_v35 = vld [vmem:[%s6304_s6 + $0x50] sm:$0xff] }
 0x34a   :  { %v2403_v29 = vpop.f32.mrf.mxu2  ;;  %v2421_v5 = vpop.f32.mrf.mxu3  ;;  %v2556_v24 = vld [vmem:[#allocation5 + $0x10] sm:$0xc0]  ;;  %v2526_v60 = vld [vmem:[#allocation5 + $0x10] sm:$0xc]  ;;  %v2524_v15 = vld [vmem:[#allocation5 + $0x10] sm:$0x3] }
 0x34b   :  { %v6049_v17 = vmax.f32 %v2494_v53, %v2500_v30  ;;  %v6053_v62 = vmax.f32 %v2466_v34, %v2472_v56  ;;  %v2560_v23 = vrot.slane %v2556_v24, 2  ;;  %v2530_v47 = vrot.slane %v2526_v60, 2  ;;  %v4564_v52 = vld [vmem:[%s6304_s6 + $0x88] sm:$0xff]  ;;  %v4567_v44 = vld [vmem:[%s6304_s6 + $0xa0] sm:$0xff]  ;;  %v4566_v5 = vld [vmem:[%s6304_s6 + $0x98] sm:$0xff] }
 0x34c   :  { %v2439_v20 = vld [vmem:[#allocation5 + $0x20] sm:$0xf]  ;;  %2718 = vmatpush.bf16.msra.mxu3 %v4559_v0  ;;  %2916 = vmatpush.bf16.msrb.mxu0 %v4570_v13  ;;  %v4556_v30 = vld [vmem:[%s6304_s6 + $0x48] sm:$0xff]  ;;  %v4573_v53 = vld [vmem:[%s6304_s6 + $0xd0] sm:$0xff] }
 0x34d   :  { %v2451_v63 = vadd.f32 %v6026_v16, %v2439_v20  ;;  %v2440_v3 = vld [vmem:[#allocation5 + $0x28] sm:$0xf]  ;;  %v4677_v4 = vpack.i.bf16 %v6049_v17, %v6047_v1  ;;  %v4682_v2 = vpack.i.bf16 %v6053_v62, %v6051_v61  ;;  %v2554_v16 = vld [vmem:[#allocation5 + $0x10] sm:$0x30]  ;;  %2806 = vmatpush.bf16.msra.mxu2 %v4551_v31  ;;  %2734 = vmatpush.bf16.msrb.mxu1 %v4564_v52  ;;  %v4555_v34 = vld [vmem:[%s6304_s6 + $0x40] sm:$0xff] }
 0x34e   :  { %v2452_v33 = vadd.f32 %v2444_v19, %v2440_v3  ;;  %v6063_v28 = vmax.f32 %v2554_v16, %v2560_v23  ;;  %v6069_v19 = vmax.f32 %v2524_v15, %v2530_v47  ;;  %v4548_v29 = vld [vmem:[%s6304_s6 + $0x8] sm:$0xff]  ;;  %v4565_v56 = vld [vmem:[%s6304_s6 + $0x90] sm:$0xff] }
 0x34f   :  { %v2457_v50 = vmax.f32 %v2451_v63, 0.0  ;;  %4678 = vrot.lane.b32.xlu2 %v4677_v4, %s4732_s0  ;;  %4683 = vrot.lane.b32.xlu0 %v4682_v2, %s4732_s0  ;;  %v4580_v3 = vld [vmem:[%s6304_s6 + $0x108] sm:$0xff] }
 0x350   :  { %v2458_v21 = vmax.f32 %v2452_v33, 0.0  ;;  %v2557_v43 = vld [vmem:[#allocation5 + $0x18] sm:$0xc0]  ;;  %v2555_v14 = vld [vmem:[#allocation5 + $0x18] sm:$0x30]  ;;  %2719 = vmatpush.bf16.msra.mxu3 %v4558_v36  ;;  %2917 = vmatpush.bf16.msrb.mxu0 %v4569_v37  ;;  %v4576_v15 = vld [vmem:[%s6304_s6 + $0xe8] sm:$0xff] }
 0x351   :  { %2463 = vst [vmem:[#allocation5 + $0x20] sm:$0xf] %v2457_v50  ;;  %v2561_v7 = vrot.slane %v2557_v43, 2  ;;  %v2527_v10 = vld [vmem:[#allocation5 + $0x18] sm:$0xc]  ;;  %2807 = vmatpush.bf16.msra.mxu2 %v4550_v39  ;;  %2934 = vmatpush.bf16.msra.mxu1 %v4573_v53  ;;  %v4579_v50 = vld [vmem:[%s6304_s6 + $0x100] sm:$0xff] }
 0x352   :  { %2464 = vst.msk [vmem:[#allocation5 + $0x28] sm:$0xf] %vm1845_vm2, %v2458_v21  ;;  %v2531_v8 = vrot.slane %v2527_v10, 2  ;;  %v2525_v46 = vld [vmem:[#allocation5 + $0x18] sm:$0x3]  ;;  %v4588_v31 = vld [vmem:[%s6304_s6 + $0x148] sm:$0xff] }
 0x353   :  { %v6065_v45 = vmax.f32 %v2555_v14, %v2561_v7  ;;  %v4577_v14 = vld [vmem:[%s6304_s6 + $0xf0] sm:$0xff] }
 0x354   :  { %v6071_v54 = vmax.f32 %v2525_v46, %v2531_v8  ;;  %2720 = vmatpush.bf16.msra.mxu3 %v4557_v35  ;;  %2918 = vmatpush.bf16.msrb.mxu0 %v4568_v51 }
 0x355   :  { %v4687_v55 = vpack.i.bf16 %v6065_v45, %v6063_v28  ;;  %2808 = vmatpush.bf16.msra.mxu2 %v4549_v38 }
 0x356   :  { %v4692_v9 = vpack.i.bf16 %v6071_v54, %v6069_v19 }
 0x357   :  { %4688 = vrot.lane.b32.xlu1 %v4687_v55, %s4732_s0 }
 0x358   :  { %v2586_v18 = vld [vmem:[#allocation5 + $0x20] sm:$0xc]  ;;  %4693 = vrot.lane.b32.xlu2 %v4692_v9, %s4732_s0  ;;  %v2584_v32 = vld [vmem:[#allocation5 + $0x20] sm:$0x3]  ;;  %2721 = vmatpush.bf16.msra.mxu3 %v4556_v30 }
 0x359   :  { %v2587_v26 = vld [vmem:[#allocation5 + $0x28] sm:$0xc]  ;;  %v2590_v27 = vrot.slane %v2586_v18, 2  ;;  %v2585_v59 = vld [vmem:[#allocation5 + $0x28] sm:$0x3]  ;;  %2919 = vmatpush.bf16.msrb.mxu0 %v4567_v44  ;;  %2809 = vmatpush.bf16.msra.mxu2 %v4548_v29 }
 0x35a   :  { %v2591_v40 = vrot.slane %v2587_v26, 2  ;;  %v4582_v26 = vld [vmem:[%s6304_s6 + $0x118] sm:$0xff] }
 0x35b   :  { %v6077_v25 = vmax.f32 %v2584_v32, %v2590_v27 }
 0x35c   :  { %v6079_v41 = vmax.f32 %v2585_v59, %v2591_v40  ;;  %2823 = vmatpush.bf16.msrb.mxu3 %v4555_v34  ;;  %v4575_v40 = vld [vmem:[%s6304_s6 + $0xe0] sm:$0xff] }
 0x35d   :  { %2920 = vmatpush.bf16.msrb.mxu0 %v4566_v5  ;;  %2810 = vmatpush.bf16.msra.mxu2 %v4547_v57  ;;  %v4586_v57 = vld [vmem:[%s6304_s6 + $0x138] sm:$0xff] }
 0x35e   :  { %v4697_v12 = vpack.i.bf16 %v6079_v41, %v6077_v25 }
 0x360   :  { %4698 = vrot.lane.b32.xlu0 %v4697_v12, %s4732_s0  ;;  %v4589_v12 = vld [vmem:[%s6304_s6 + $0x150] sm:$0xff] }
 0x361   :  { %2921 = vmatpush.bf16.msrb.mxu0 %v4565_v56  ;;  %3026 = vmatpush.bf16.msrb.mxu2 %v4581_v48 }
 0x365   :  { %3027 = vmatpush.bf16.msrb.mxu2 %v4580_v3  ;;  %v4585_v3 = vld [vmem:[%s6304_s6 + $0x130] sm:$0xff] }
 0x369   :  { %3028 = vmatpush.bf16.msrb.mxu2 %v4579_v50 }
 0x3a9   :  { %v4679_v20 = vpop.permute.xlu2 %4678 }
 0x3aa   :  { %v4681_v24 = vunpack.i.h.bf16 %v4679_v20  ;;  %v4680_v63 = vunpack.i.l.bf16 %v4679_v20 }
 0x3ac   :  { %v2515_v4 = vmax.f32 %v6049_v17, %v4681_v24  ;;  %v2511_v33 = vsel %vm2483_vm3, %v4680_v63, %v4681_v24  ;;  %v4578_v17 = vld [vmem:[%s6304_s6 + $0xf8] sm:$0xff] }
 0x3ad   :  { %v2514_v2 = vmax.f32 %v6047_v1, %v2511_v33  ;;  %3029 = vmatpush.bf16.msrb.mxu2 %v4578_v17 }
 0x3af   :  { %v2516_v60 = vpack.c.bf16 %v2515_v4, %v2514_v2  ;;  %v4591_v4 = vld [vmem:[%s6304_s6 + $0x160] sm:$0xff] }
 0x3b1   :  { %v4091_v23 = vrot.slane %v2516_v60, 9  ;;  %3030 = vmatpush.bf16.msrb.mxu2 %v4577_v14 }
 0x3b2   :  { %v4694_v21 = vpop.permute.xlu2 %4693 }
 0x3b3   :  { %2523 = vst.msk [vmem:[#allocation6] sm:$0x22] %vm2522_vm15, %v4091_v23  ;;  %v4696_v43 = vunpack.i.h.bf16 %v4694_v21  ;;  %v4695_v16 = vunpack.i.l.bf16 %v4694_v21  ;;  %v4584_v21 = vld [vmem:[%s6304_s6 + $0x128] sm:$0xff] }
 0x3b5   :  { %v2546_v1 = vmax.f32 %v6071_v54, %v4696_v43  ;;  %v2542_v7 = vsel %vm2483_vm3, %v4695_v16, %v4696_v43  ;;  %3031 = vmatpush.bf16.msrb.mxu2 %v4576_v15 }
 0x3b6   :  { %v2545_v47 = vmax.f32 %v6069_v19, %v2542_v7  ;;  %v4590_v19 = vld [vmem:[%s6304_s6 + $0x158] sm:$0xff] }
 0x3b8   :  { %v2547_v10 = vpack.c.bf16 %v2546_v1, %v2545_v47 }
 0x3b9   :  { %3032 = vmatpush.bf16.msrb.mxu2 %v4575_v40 }
 0x3ba   :  { %v2628_v8 = vld [vmem:[#allocation6] sm:$0x22]  ;;  %v2549_v46 = vrot.slane %v2547_v10, 6 }
 0x3bb   :  { %v2649_v55 = vunpack.c.l.b16 %v2628_v8  ;;  %v2650_v54 = vunpack.c.h.b16 %v2628_v8 }
 0x3bc   :  { %2553 = vst.msk [vmem:[#allocation6] sm:$0x44] %vm2552_vm7, %v2549_v46 }
 0x3bd   :  { %v2651_v9 = vpack.c.b16 %v2649_v55, %v2649_v55  ;;  %v2652_v18 = vpack.c.b16 %v2650_v54, %v2650_v54  ;;  %3033 = vmatpush.bf16.msrb.mxu2 %v4574_v49 }
 0x3bf   :  { %v2653_v27 = vrot.slane %v2651_v9, 1  ;;  %v2654_v32 = vrot.slane %v2652_v18, 1  ;;  %v3184_v9 = vld [vmem:[%s6306_s8 + $0x38] sm:$0xf] }
 0x3c0   :  { %v3218_v18 = vunpack.c.l.b16 %v3184_v9 }
 0x3c1   :  { %2722 = vmatmul.bf16.vlgmr.msra.gmra.mxu3 %v2653_v27  ;;  %4146 = vmatmul.msk.bf16.vlgmr.msrb.gmra.mxu1 %vm2710_vm4, %v2654_v32  ;;  %v4684_v59 = vpop.permute.xlu0 %4683 }
 0x3c2   :  { %3136 = vmatpush.bf16.msrb.mxu1 %v4590_v19  ;;  %3046 = vmatpush.bf16.msra.mxu3 %v4582_v26  ;;  %v4686_v42 = vunpack.i.h.bf16 %v4684_v59  ;;  %v4685_v58 = vunpack.i.l.bf16 %v4684_v59  ;;  %v3226_v26 = vpack.c.b16 %v3218_v18, %v3218_v18  ;;  %v4598_v59 = vld [vmem:[%s6306_s8 + $0x30] sm:$0xff] }
 0x3c3   :  { %v2829_v6 = vld [vmem:[#allocation6] sm:$0x44] }
 0x3c4   :  { %v2488_v11 = vmax.f32 %v6053_v62, %v4686_v42  ;;  %v2484_v22 = vsel %vm2483_vm3, %v4685_v58, %v4686_v42  ;;  %v2850_v0 = vunpack.c.l.b16 %v2829_v6  ;;  %v2851_v36 = vunpack.c.h.b16 %v2829_v6  ;;  %v4597_v42 = vld [vmem:[%s6306_s8 + $0x28] sm:$0xff]  ;;  %v4596_v6 = vld [vmem:[%s6306_s8 + $0x20] sm:$0xff] }
 0x3c5   :  { %v2487_v13 = vmax.f32 %v6051_v61, %v2484_v22  ;;  %v4587_v61 = vld [vmem:[%s6304_s6 + $0x140] sm:$0xff]  ;;  %v3240_v32 = vsel %vm3238_vm13, %v3226_v26, 0 }
 0x3c6   :  { %3137 = vmatpush.bf16.msrb.mxu1 %v4589_v12  ;;  %v2852_v37 = vpack.c.b16 %v2850_v0, %v2850_v0  ;;  %v2853_v30 = vpack.c.b16 %v2851_v36, %v2851_v36  ;;  %3242 = vmatpush.bf16.msra.mxu0 %v3240_v32  ;;  %v4593_v36 = vld [vmem:[%s6306_s8 + $0x8] sm:$0xff] }
 0x3c7   :  { %v2489_v35 = vpack.c.bf16 %v2488_v11, %v2487_v13  ;;  %v4595_v11 = vld [vmem:[%s6306_s8 + $0x18] sm:$0xff] }
 0x3c8   :  { %v2854_v51 = vrot.slane %v2852_v37, 2  ;;  %v2855_v56 = vrot.slane %v2853_v30, 2 }
 0x3c9   :  { %v4689_v62 = vpop.permute.xlu1 %4688  ;;  %2492 = vst.msk [vmem:[#allocation6] sm:$0x11] %vm6205_vm8, %v2489_v35  ;;  %v4592_v35 = vld [vmem:[%s6306_s8] sm:$0xff] }
 0x3ca   :  { %v4691_v52 = vunpack.i.h.bf16 %v4689_v62  ;;  %v4690_v38 = vunpack.i.l.bf16 %v4689_v62  ;;  %3138 = vmatpush.bf16.msrb.mxu1 %v4588_v31  ;;  %2922 = vmatmul.bf16.vlgmr.msrb.gmra.mxu0 %v2854_v51  ;;  %v4594_v31 = vld [vmem:[%s6306_s8 + $0x10] sm:$0xff]  ;;  %v3267_v51 = vld [vmem:[%s6308_s10 + $0x28] sm:$0x3] }
 0x3cb   :  { %3243 = vmatpush.bf16.msra.mxu0 %v4598_v59 }
 0x3cc   :  { %v2576_v44 = vmax.f32 %v6065_v45, %v4691_v52  ;;  %v2572_v29 = vsel %vm2483_vm3, %v4690_v38, %v4691_v52  ;;  %v3293_v52 = vunpack.c.l.b16 %v3267_v51 }
 0x3cd   :  { %v2575_v5 = vmax.f32 %v6063_v28, %v2572_v29  ;;  %v4603_v29 = vld [vmem:[%s6308_s10 + $0x20] sm:$0xff] }
 0x3ce   :  { %3139 = vmatpush.bf16.msrb.mxu1 %v4587_v61  ;;  %v3299_v38 = vpack.c.b16 %v3293_v52, %v3293_v52 }
 0x3cf   :  { %v2577_v53 = vpack.c.bf16 %v2576_v44, %v2575_v5  ;;  %3244 = vmatpush.bf16.msra.mxu0 %v4597_v42 }
 0x3d0   :  { %v2609_v34 = vld [vmem:[#allocation6] sm:$0x11]  ;;  %v3309_v44 = vsel %vm1796_vm10, %v3299_v38, 0  ;;  %vm3234_vm10 = vcmask 982016  }
 0x3d1   :  { %v2579_v48 = vrot.slane %v2577_v53, 7  ;;  %4238 = vmatmul.msk.bf16.vlgmr.msra.gmra.mxu1 %vm2710_vm4, %v2855_v56  ;;  %v2741_v45 = vunpack.c.l.b16 %v2609_v34  ;;  %v2742_v24 = vunpack.c.h.b16 %v2609_v34  ;;  %v4602_v53 = vld [vmem:[%s6308_s10 + $0x18] sm:$0xff] }
 0x3d2   :  { %v4699_v20 = vpop.permute.xlu0 %4698  ;;  %3140 = vmatpush.bf16.msrb.mxu1 %v4586_v57 }
 0x3d3   :  { %2583 = vst.msk [vmem:[#allocation6] sm:$0x88] %vm2582_vm6, %v2579_v48  ;;  %v4701_v63 = vunpack.i.h.bf16 %v4699_v20  ;;  %v4700_v28 = vunpack.i.l.bf16 %v4699_v20  ;;  %v2743_v33 = vpack.c.b16 %v2741_v45, %v2741_v45  ;;  %v2744_v2 = vpack.c.b16 %v2742_v24, %v2742_v24  ;;  %3245 = vmatpush.bf16.msra.mxu0 %v4596_v6  ;;  %v4601_v20 = vld [vmem:[%s6308_s10 + $0x10] sm:$0xff] }
 0x3d5   :  { %v2606_v60 = vmax.f32 %v6079_v41, %v4701_v63  ;;  %v2602_v50 = vsel %vm2483_vm3, %v4700_v28, %v4701_v63  ;;  %2811 = vmatmul.bf16.vlgmr.msra.gmra.mxu2 %v2743_v33  ;;  %4183 = vmatmul.msk.bf16.vlgmr.msrb.gmra.mxu3 %vm2710_vm4, %v2744_v2  ;;  %v4583_v41 = vld [vmem:[%s6304_s6 + $0x120] sm:$0xff] }
 0x3d6   :  { %v2605_v23 = vmax.f32 %v6077_v25, %v2602_v50  ;;  %3141 = vmatpush.bf16.msrb.mxu1 %v4585_v3  ;;  %3156 = vmatpush.bf16.msrb.mxu3 %v4591_v4  ;;  %v4702_v2 = vld [vmem:[%s6305_s7] ss:$0 sm:$0xff] }
 0x3d7   :  { %3246 = vmatpush.bf16.msra.mxu0 %v4595_v11  ;;  %3313 = vmatpush.bf16.msra.mxu2 %v3309_v44 }
 0x3d8   :  { %v2607_v17 = vpack.c.bf16 %v2606_v60, %v2605_v23 }
 0x3da   :  { %2608 = vst.msk [vmem:[#allocation6 + $0x8] sm:$0x11] %vm6205_vm8, %v2607_v17  ;;  %v2941_v43 = vld [vmem:[#allocation6] sm:$0x88]  ;;  %3142 = vmatpush.bf16.msrb.mxu1 %v4584_v21 }
 0x3db   :  { %v2962_v25 = vunpack.c.l.b16 %v2941_v43  ;;  %v2963_v16 = vunpack.c.h.b16 %v2941_v43  ;;  %3247 = vmatpush.bf16.msra.mxu0 %v4594_v31  ;;  %3314 = vmatpush.bf16.msra.mxu2 %v4603_v29  ;;  %v4600_v43 = vld [vmem:[%s6308_s10 + $0x8] sm:$0xff] }
 0x3dd   :  { %v2964_v1 = vpack.c.b16 %v2962_v25, %v2962_v25  ;;  %v2965_v7 = vpack.c.b16 %v2963_v16, %v2963_v16  ;;  %v4703_v25 = vld [vmem:[%s6307_s9] ss:$0 sm:$0xff] }
 0x3de   :  { %3143 = vmatpush.bf16.msrb.mxu1 %v4583_v41  ;;  %v4599_v41 = vld [vmem:[%s6308_s10] sm:$0xff] }
 0x3df   :  { %v2966_v10 = vrot.slane %v2964_v1, 3  ;;  %v2967_v8 = vrot.slane %v2965_v7, 3  ;;  %3248 = vmatpush.bf16.msra.mxu0 %v4593_v36  ;;  %3315 = vmatpush.bf16.msra.mxu2 %v4602_v53 }
 0x3e1   :  { %v3053_v47 = vld [vmem:[#allocation6 + $0x8] sm:$0x11] }
 0x3e2   :  { %v3074_v14 = vunpack.c.l.b16 %v3053_v47  ;;  %v3075_v46 = vunpack.c.h.b16 %v3053_v47 }
 0x3e3   :  { %3249 = vmatpush.bf16.msra.mxu0 %v4592_v35  ;;  %3316 = vmatpush.bf16.msra.mxu2 %v4601_v20 }
 0x3e4   :  { %v3076_v15 = vpack.c.b16 %v3074_v14, %v3074_v14  ;;  %v3077_v55 = vpack.c.b16 %v3075_v46, %v3075_v46 }
 0x3e5   :  { %3034 = vmatmul.bf16.vlgmr.msrb.gmra.mxu2 %v2966_v10  ;;  %4293 = vmatmul.msk.bf16.vlgmr.msra.gmra.mxu3 %vm2710_vm4, %v2967_v8  ;;  %v4704_v10 = vld [vmem:[%s6309_s11] ss:$0 sm:$0xff] }
 0x3e6   :  { %3144 = vmatmul.bf16.vlgmr.msrb.gmra.mxu1 %v3076_v15 }
 0x3e7   :  { %3317 = vmatpush.bf16.msra.mxu2 %v4600_v43 }
 0x3eb   :  { %3318 = vmatpush.bf16.msra.mxu2 %v4599_v41 }
 0x3f5   :  { %4348 = vmatmul.msk.bf16.vlgmr.msrb.gmra.mxu3 %vm2710_vm4, %v3077_v55 }
 0x43e   :  { %v2736_v54 = vpop.f32.mrf.mxu1 }
 0x444   :  { %v2723_v19 = vpop.f32.mrf.mxu3 }
 0x445   :  { %v2737_v57 = vadd.f32 %v2736_v54, %v2723_v19 }
 0x446   :  { %v2738_v27 = vpop.f32.mrf.mxu1 }
 0x447   :  { %v2923_v40 = vpop.f32.mrf.mxu0 }
 0x44c   :  { %v2725_v12 = vpop.f32.mrf.mxu3 }
 0x44e   :  { %v2936_v58 = vpop.f32.mrf.mxu1 }
 0x44f   :  { %v2925_v49 = vpop.f32.mrf.mxu0  ;;  %v2937_v24 = vadd.f32 %v2936_v58, %v2923_v40 }
 0x456   :  { %v2938_v22 = vpop.f32.mrf.mxu1 }
 0x458   :  { %v2812_v0 = vpop.f32.mrf.mxu2  ;;  %v2825_v13 = vpop.f32.mrf.mxu3 }
 0x459   :  { %v2813_v56 = vadd.f32 %v2812_v0, %v2737_v57 }
 0x45b   :  { %v2826_v45 = vadd.f32 %v2825_v13, %v2813_v56 }
 0x45d   :  { %v2940_v28 = vadd.f32 %v2937_v24, %v2826_v45 }
 0x460   :  { %v2814_v37 = vpop.f32.mrf.mxu2  ;;  %v2827_v39 = vpop.f32.mrf.mxu3 }
 0x463   :  { %v3145_v62 = vpop.f32.mrf.mxu1 }
 0x468   :  { %v3035_v61 = vpop.f32.mrf.mxu2  ;;  %v3048_v30 = vpop.f32.mrf.mxu3 }
 0x469   :  { %v3049_v63 = vadd.f32 %v3048_v30, %v3035_v61 }
 0x46b   :  { %v3147_v5 = vpop.f32.mrf.mxu1  ;;  %v3052_v4 = vadd.f32 %v3049_v63, %v2940_v28 }
 0x470   :  { %v3037_v48 = vpop.f32.mrf.mxu2  ;;  %v3050_v34 = vpop.f32.mrf.mxu3 }
 0x478   :  { %v3158_v3 = vpop.f32.mrf.mxu3 }
 0x479   :  { %v3159_v33 = vadd.f32 %v3158_v3, %v3145_v62 }
 0x47b   :  { %v3162_v60 = vadd.f32 %v3159_v33, %v3052_v4 }
 0x47d   :  { %v3167_v50 = vadd.f32 %v4702_v2, %v3162_v60 }
 0x47f   :  { %v3168_v23 = vmax.f32 %v3167_v50, 0.0 }
 0x480   :  { %v3160_v21 = vpop.f32.mrf.mxu3 }
 0x481   :  { %v3169_v17 = vpack.c.bf16 %v3168_v23, %v3168_v23 }
 0x483   :  { %4377 = vmatmul.msk.bf16.vlgmr.msra.gmra.mxu0 %vm3234_vm10, %v3169_v17 }
 0x500   :  { %v3251_v16 = vpop.f32.mrf.mxu0 }
 0x501   :  { %v3252_v1 = vadd.f32 %v4703_v25, %v3251_v16 }
 0x503   :  { %v3255_v7 = vmax.f32 %v3252_v1, 0.0 }
 0x505   :  { %v3256_v47 = vpack.c.bf16 %v3255_v7, %v3255_v7 }
 0x507   :  { %4398 = vmatmul.msk.bf16.vlgmr.msra.gmra.mxu2 %vm1789_vm11, %v3256_v47 }
 0x508   :  { %v3253_v14 = vpop.f32.mrf.mxu0 }
 0x58a   :  { %v3320_v8 = vpop.f32.mrf.mxu2 }
 0x58b   :  { %v3321_v15 = vadd.f32 %v4704_v10, %v3320_v8 }
 0x58d   :  { %3324 = vst [vmem:[#allocation7] sm:$0x3] %v3321_v15 }
 0x58e   :  { %3335 = dma.vmem_to_hbm [thread:$0]  %s3331_s18, 32, %s3333_s20, [#allocation8]  }
 0x592   :  { %v3322_v46 = vpop.f32.mrf.mxu2 }
 0x593   :  { %4729 = dma.done.wait [#allocation8], 32  }
 0x594   :  { %4730 = vsyncadd [#allocation8], 4294967264 }
 0x595   :  { %3340 = vsyncpa [#allocation8], 1 }

</bundles_post_ra>
